<compile_context>
chip_gen: v7x
topology: tpu7x:2x2x1
jax: 0.10.0
libtpu: 0.0.40
codegen_flags: <defaults>
</compile_context>

<pallas_src>
import functools

import numpy as np
import jax
import jax.numpy as jnp
from jax.experimental import pallas as pl
from jax.experimental.pallas import tpu as pltpu

# -------------------- config constants ("configer" values) --------------------
TEMPERATURE = 0.1
BASE_TEMPERATURE = 0.07
IGNORE_LABEL = -1
MAX_SAMPLES = 1024
MAX_VIEWS = 16

_TM = 256  # anchor-row tile; full MXU rows on v6e/v7x, fewer grid steps everywhere


# ------------------------------ Pallas kernel ---------------------------------
def _contrastive_kernel(temp_over_base, tm,
                        n_ref, frows_ref, ft_ref, labc_ref, labr_ref, out_ref):
    """One (image, row-block) step of the supervised contrastive loss.

    n_ref     : SMEM (n_imgs,) int32 -- valid rows per image (scalar prefetch)
    frows_ref : VMEM (TM, Dp) bf16   -- this row block's anchors, pre-scaled by 1/T
    ft_ref    : VMEM (Dp, Np) bf16   -- this image's features, feature-major, resident
    labc_ref  : VMEM (TM, 1)  f32    -- labels of this row block (column vector)
    labr_ref  : VMEM (1, Np)  f32    -- labels of all columns (row vector)
    out_ref   : VMEM (8, 128) f32    -- sum of per-row losses of this block
    """
    img = pl.program_id(0)
    m = pl.program_id(1)
    n = n_ref[img]
    r0 = pl.multiple_of(m * tm, tm)

    @pl.when(r0 >= n)          # fully padded row block: skip all EUP/MXU work
    def _():
        out_ref[...] = jnp.zeros_like(out_ref)

    @pl.when(r0 < n)
    def _():
        a = frows_ref[...]                       # (TM, Dp) bf16, already * 1/T
        b = ft_ref[...]                          # (Dp, Np) bf16
        np_cols = b.shape[1]
        # anchor_dot_contrast slab: natural (M,K)x(K,N) -> no XLU transpose of the
        # big operand; f32 accumulation on the MXU.
        s = jax.lax.dot_general(a, b, (((1,), (0,)), ((), ())),
                                preferred_element_type=jnp.float32)   # (TM, Np)

        col = jax.lax.broadcasted_iota(jnp.int32, (tm, np_cols), 1)
        row = jax.lax.broadcasted_iota(jnp.int32, (tm, np_cols), 0) + r0
        valid_col = col < n

        # mask padded columns with a large-negative (finite) value before the row max
        s = jnp.where(valid_col, s, jnp.float32(-1e30))
        logits = s - jnp.max(s, axis=1, keepdims=True)   # .detach() is a no-op in fwd

        eq = labc_ref[...] == labr_ref[...]              # (TM, Np) label equality
        pos = eq & valid_col & (col != row)              # torch: mask * logits_mask
        neg = jnp.logical_not(eq) & valid_col            # torch: 1 - mask

        exp_logits = jnp.exp(logits)                     # f32 elementwise (v5e-safe)
        neg_sum = jnp.sum(jnp.where(neg, exp_logits, 0.0), axis=1, keepdims=True)
        log_prob = logits - jnp.log(exp_logits + neg_sum)

        pos_cnt = jnp.sum(jnp.where(pos, 1.0, 0.0), axis=1, keepdims=True)
        pos_sum = jnp.sum(jnp.where(pos, log_prob, 0.0), axis=1, keepdims=True)
        # Reference divides by mask.sum(1) unclamped; padded rows (0/0) are
        # discarded by the valid_row select below, so no NaN escapes the forward.
        mean_log_prob_pos = pos_sum / pos_cnt
        per_row = -temp_over_base * mean_log_prob_pos    # (TM, 1)

        valid_row = (jax.lax.broadcasted_iota(jnp.int32, (tm, 1), 0) + r0) < n
        partial = jnp.sum(jnp.where(valid_row, per_row, 0.0))
        out_ref[...] = jnp.full((8, 128), partial, dtype=jnp.float32)


def contrastive_loss_batched(f_rows, f_t, lab_col, lab_row, n_valid, tm,
                             temperature=TEMPERATURE,
                             base_temperature=BASE_TEMPERATURE):
    """Per-image supervised contrastive loss (== _contrastive per image).

    f_rows  : (n_imgs, Np, Dp) bf16  anchor rows, pre-scaled by 1/temperature
    f_t     : (n_imgs, Dp, Np) bf16  feature-major contrast features (resident RHS)
    lab_col : (n_imgs, Np, 1)  f32   per-row labels (pad = -2)
    lab_row : (n_imgs, 1, Np)  f32   per-row labels (pad = -3)
    n_valid : (n_imgs,)        i32   valid row count per image
    returns : (n_imgs,)        f32   per-image mean loss
    """
    n_imgs, np_rows, dp = f_rows.shape
    assert np_rows % tm == 0 and np_rows % 128 == 0 and dp % 16 == 0
    n_blk = np_rows // tm

    kernel = functools.partial(_contrastive_kernel,
                               float(temperature) / float(base_temperature), tm)
    out = pl.pallas_call(
        kernel,
        out_shape=jax.ShapeDtypeStruct((n_imgs, n_blk, 8, 128), jnp.float32),
        grid_spec=pltpu.PrefetchScalarGridSpec(
            num_scalar_prefetch=1,
            grid=(n_imgs, n_blk),
            in_specs=[
                # anchor rows of the current block only (small per-step DMA)
                pl.BlockSpec((None, tm, dp), lambda i, m, n_s: (i, m, 0)),
                # full feature-major F for this image, resident across row blocks
                pl.BlockSpec((None, dp, np_rows), lambda i, m, n_s: (i, 0, 0)),
                # labels of the current row block (column vector)
                pl.BlockSpec((None, tm, 1), lambda i, m, n_s: (i, m, 0)),
                # labels of all columns (row vector)
                pl.BlockSpec((None, 1, np_rows), lambda i, m, n_s: (i, 0, 0)),
            ],
            out_specs=pl.BlockSpec((None, None, 8, 128),
                                   lambda i, m, n_s: (i, m, 0, 0)),
        ),
        compiler_params=pltpu.CompilerParams(
            dimension_semantics=("parallel", "parallel"),
            vmem_limit_bytes=32 * 1024 * 1024),
    )(n_valid, f_rows, f_t, lab_col, lab_row)

    per_img_sum = out[:, :, 0, 0].sum(axis=1)              # (n_imgs,)
    return per_img_sum / n_valid.astype(jnp.float32)       # mean over N_i rows


# ----------------------------- host-side glue ----------------------------------
def _hard_anchor_sampling_indices(y_hat, y, max_samples, max_views, ignore_label,
                                  seed=0):
    """numpy re-implementation of the dynamic-shape sampling (indices only).

    y_hat: (B, HW) labels, y: (B, HW) predictions -- small int arrays on host.
    Returns (per_image list of (img_idx, idx (A, n_view), y_ (A,), A), n_view).
    # TODO(synk): torch.randperm RNG stream cannot be reproduced; a seeded
    # numpy permutation is used instead (same sampling distribution).
    """
    B = y_hat.shape[0]
    rng = np.random.RandomState(seed)

    classes, total_classes = [], 0
    for ii in range(B):
        this_y = y_hat[ii]
        uniq = np.unique(this_y)
        cl = [int(c) for c in uniq
              if c != ignore_label and int((this_y == c).sum()) > max_views]
        classes.append(cl)
        total_classes += len(cl)
    if total_classes == 0:
        return [], 0

    n_view = min(max_samples // total_classes, max_views)

    per_image = []
    for ii in range(B):
        cls_list = classes[ii]
        if len(cls_list) == 0:
            continue
        A = len(cls_list)
        idx = np.zeros((A, n_view), np.int32)
        y_ = np.zeros((A,), np.float32)
        for ci, cid in enumerate(cls_list):
            hard = np.nonzero((y_hat[ii] == cid) & (y[ii] != cid))[0]
            easy = np.nonzero((y_hat[ii] == cid) & (y[ii] == cid))[0]
            nh, ne = len(hard), len(easy)
            if nh >= n_view / 2 and ne >= n_view / 2:
                nhk = n_view // 2
                nek = n_view - nhk
            elif nh >= n_view / 2:
                nek = ne
                nhk = n_view - nek
            elif ne >= n_view / 2:
                nhk = nh
                nek = n_view - nhk
            else:
                raise Exception("this should never be touched! "
                                f"{nh} {ne} {n_view}")
            hard = hard[rng.permutation(nh)[:nhk]]
            easy = easy[rng.permutation(ne)[:nek]]
            idx[ci] = np.concatenate([hard, easy], axis=0).astype(np.int32)
            y_[ci] = cid
        per_image.append((ii, idx, y_, A))
    return per_image, n_view


def single_image_pixel_contrast_loss(feats, labels, predict, *,
                                     temperature=TEMPERATURE,
                                     base_temperature=BASE_TEMPERATURE,
                                     ignore_label=IGNORE_LABEL,
                                     max_samples=MAX_SAMPLES,
                                     max_views=MAX_VIEWS,
                                     seed=0):
    """Forward pass of SingleImagePixelContrastLoss.

    feats  : (B, C, H, W)  float  (NCHW, as in PyTorch) -- stays on device
    labels : (B, Hl, Wl)   int    ground-truth labels
    predict: (B, H, W)     int    predicted labels
    # TODO(synk): the hard-anchor sampling branches on data (unique/nonzero/randperm),
    # so the index selection runs on the host and this path is not jit-able end-to-end;
    # only small int label/index arrays cross the host boundary.
    """
    B, C, H, W = feats.shape
    Hl, Wl = labels.shape[1], labels.shape[2]

    # F.interpolate(labels[:,None].float(), (H, W), mode='nearest') -- host, small ints
    ridx = (np.arange(H) * Hl) // H
    cidx = (np.arange(W) * Wl) // W
    labels_np = np.asarray(labels)
    labels_rs = labels_np[:, ridx[:, None], cidx[None, :]].astype(np.int64)  # (B,H,W)
    assert labels_rs.shape[-1] == feats.shape[-1]

    labels_flat = labels_rs.reshape(B, -1)
    predict_flat = np.asarray(predict).reshape(B, -1)

    sampled, n_view = _hard_anchor_sampling_indices(
        labels_flat, predict_flat, max_samples, max_views, ignore_label, seed)
    if not sampled:
        # TODO(synk): reference returns (None, None) here and its forward loop
        # would fail; we return 0 for the no-qualifying-class case.
        return jnp.float32(0.0)

    n_imgs = len(sampled)
    # TM=256 feeds the full 256-wide MXU (v6e/v7x) and halves grid-step overhead;
    # drop to 128 when only one image is sampled so a 2-TC chip can still split work.
    tm = _TM if n_imgs > 1 else 128
    n_max = max(A * n_view for _, _, _, A in sampled)
    np_rows = max(tm, ((n_max + tm - 1) // tm) * tm)   # rows padded to multiple of TM
    dp = ((C + 15) // 16) * 16                          # feature dim pads to bf16 sublanes

    # ---- small host-built arrays (indices + labels only) ----
    idx_stack = np.zeros((n_imgs, np_rows), np.int32)
    img_ids = np.zeros((n_imgs,), np.int32)
    lab_col = np.full((n_imgs, np_rows, 1), -2.0, np.float32)
    lab_row = np.full((n_imgs, 1, np_rows), -3.0, np.float32)
    n_valid = np.zeros((n_imgs,), np.int32)
    n_cls = np.zeros((n_imgs,), np.float32)

    for k, (ii, idx, y_, A) in enumerate(sampled):
        N = A * n_view
        # contrast_feature = cat(unbind(feats_, dim=1)): row r holds idx[r % A, r // A]
        idx_stack[k, :N] = np.transpose(idx, (1, 0)).reshape(-1)
        img_ids[k] = ii
        lab = np.tile(y_, n_view)
        lab_col[k, :N, 0] = lab
        lab_row[k, 0, :N] = lab
        n_valid[k] = N
        n_cls[k] = A

    # ---- device-side gather / scale / cast / transpose (feats never leave device) ----
    feats_flat = jnp.transpose(feats, (0, 2, 3, 1)).reshape(B, H * W, C)
    idx_d = jnp.asarray(idx_stack)                       # (n_imgs, Np) i32
    img_d = jnp.asarray(img_ids)                         # (n_imgs,)   i32
    f_gather = feats_flat[img_d[:, None], idx_d, :]      # (n_imgs, Np, C) f32
    if dp > C:
        f_gather = jnp.pad(f_gather, ((0, 0), (0, 0), (0, dp - C)))
    # fold 1/temperature into the anchor-row copy; both MXU operands pre-cast to bf16
    f_rows = (f_gather * jnp.float32(1.0 / temperature)).astype(jnp.bfloat16)
    f_t = jnp.transpose(f_gather, (0, 2, 1)).astype(jnp.bfloat16)   # (n_imgs, Dp, Np)

    per_img = contrastive_loss_batched(
        f_rows, f_t, jnp.asarray(lab_col), jnp.asarray(lab_row),
        jnp.asarray(n_valid), tm, temperature, base_temperature)

    # The reference appends each image's (same, fully-filled) tensor once per
    # sampled class inside its class loop, so that image's loss is counted
    # n_cls times before dividing by the batch size.
    loss = jnp.sum(jnp.asarray(n_cls) * per_img) / B
    return loss


# ----------------------------------- main ---------------------------------------
if __name__ == "__main__":
    key = jax.random.PRNGKey(0)
    k1, k2, k3, k4 = jax.random.split(key, 4)

    B, C, H, W = 2, 32, 16, 16     # proj feats (NCHW)
    Hl, Wl = 32, 32                # label map at higher resolution
    NUM_CLASSES = 4

    feats = jax.random.normal(k1, (B, C, H, W), dtype=jnp.float32)
    # This loss consumes projection-head embeddings, which are L2-normalized in
    # the reference pipeline; normalize so logits/temperature stay in exp() range.
    feats = feats / (jnp.linalg.norm(feats, axis=1, keepdims=True) + 1e-12)

    labels = jax.random.randint(k2, (B, Hl, Wl), 0, NUM_CLASSES, dtype=jnp.int32)
    ignore = jax.random.uniform(k3, (B, Hl, Wl)) < 0.05
    labels = jnp.where(ignore, IGNORE_LABEL, labels)
    predict = jax.random.randint(k4, (B, H, W), 0, NUM_CLASSES, dtype=jnp.int32)

    loss = single_image_pixel_contrast_loss(feats, labels, predict)
    loss = jax.block_until_ready(loss)
    assert bool(jnp.isfinite(loss)), f"non-finite loss: {loss}"
    print("KERNEL_OK")
</pallas_src>

<mosaic_0001>
module attributes {stable_mosaic.version = 11 : i64} {
  func.func @_contrastive_kernel(%arg0: i32, %arg1: i32, %arg2: memref<2xi32, #tpu.memory_space<smem>>, %arg3: memref<1x256x32xbf16, #tpu.memory_space<vmem>>, %arg4: memref<1x32x256xbf16, #tpu.memory_space<vmem>>, %arg5: memref<1x256x1xf32, #tpu.memory_space<vmem>>, %arg6: memref<1x1x256xf32, #tpu.memory_space<vmem>>, %arg7: memref<1x1x8x128xf32, #tpu.memory_space<vmem>>) attributes {dimension_semantics = [#tpu.dimension_semantics<parallel>, #tpu.dimension_semantics<parallel>], iteration_bounds = array<i64: 2, 1>, scalar_prefetch = 1 : i64, scratch_operands = 0 : i64, tpu.core_type = #tpu.core_type<tc>, window_params = [{transform_indices = @transform_0, window_bounds = array<i64: 1, 256, 32>}, {transform_indices = @transform_1, window_bounds = array<i64: 1, 32, 256>}, {transform_indices = @transform_2, window_bounds = array<i64: 1, 256, 1>}, {transform_indices = @transform_3, window_bounds = array<i64: 1, 1, 256>}, {transform_indices = @transform_4, window_bounds = array<i64: 1, 1, 8, 128>}]} {
    %0 = arith.index_cast %arg0 : i32 to index
    %1 = memref.load %arg2[%0] : memref<2xi32, #tpu.memory_space<smem>>
    %c256_i32 = arith.constant 256 : i32
    %2 = arith.muli %arg1, %c256_i32 : i32
    %3 = tpu.assume_multiple %2, 256 : i32
    %4 = arith.cmpi sge, %3, %1 : i32
    %5 = arith.extui %4 : i1 to i32
    %c0_i32 = arith.constant 0 : i32
    %6 = arith.cmpi ne, %5, %c0_i32 : i32
    scf.if %6 {
      %cst = arith.constant 0.000000e+00 : f32
      %10 = vector.broadcast %cst : f32 to vector<8x128xf32>
      %c0 = arith.constant 0 : index
      %c0_1 = arith.constant 0 : index
      %c0_2 = arith.constant 0 : index
      %c0_3 = arith.constant 0 : index
      %11 = vector.load %arg7[%c0, %c0_1, %c0_2, %c0_3] : memref<1x1x8x128xf32, #tpu.memory_space<vmem>>, vector<1x1x8x128xf32>
      %12 = vector.shape_cast %11 : vector<1x1x8x128xf32> to vector<8x128xf32>
      %13 = vector.shape_cast %10 : vector<8x128xf32> to vector<1x1x8x128xf32>
      tpu.vector_store %arg7[%c0, %c0_1, %c0_2, %c0_3], %13 {strides = array<i32>} : memref<1x1x8x128xf32, #tpu.memory_space<vmem>>, vector<1x1x8x128xf32>,
    } else {
    }
    %7 = arith.cmpi slt, %3, %1 : i32
    %8 = arith.extui %7 : i1 to i32
    %c0_i32_0 = arith.constant 0 : i32
    %9 = arith.cmpi ne, %8, %c0_i32_0 : i32
    scf.if %9 {
      %c0 = arith.constant 0 : index
      %c0_1 = arith.constant 0 : index
      %c0_2 = arith.constant 0 : index
      %10 = vector.load %arg3[%c0, %c0_1, %c0_2] : memref<1x256x32xbf16, #tpu.memory_space<vmem>>, vector<1x256x32xbf16>
      %11 = vector.shape_cast %10 : vector<1x256x32xbf16> to vector<256x32xbf16>
      %c0_3 = arith.constant 0 : index
      %c0_4 = arith.constant 0 : index
      %c0_5 = arith.constant 0 : index
      %12 = vector.load %arg4[%c0_3, %c0_4, %c0_5] : memref<1x32x256xbf16, #tpu.memory_space<vmem>>, vector<1x32x256xbf16>
      %13 = vector.shape_cast %12 : vector<1x32x256xbf16> to vector<32x256xbf16>
      %cst = arith.constant dense<0.000000e+00> : vector<256x256xf32>
      %14 = tpu.matmul %11, %13, %cst {dimension_numbers = #tpu.dot_dimension_numbers<[1], [0], [0], [1], [0, 0, 1, 1], [], []>} : vector<256x32xbf16>, vector<32x256xbf16>, vector<256x256xf32> -> vector<256x256xf32>
      %15 = tpu.iota {dimensions = array<i32: 1>} : vector<256x256xi32>
      %16 = tpu.iota {dimensions = array<i32: 0>} : vector<256x256xi32>
      %17 = vector.broadcast %3 : i32 to vector<256x256xi32>
      %18 = arith.addi %16, %17 : vector<256x256xi32>
      %19 = vector.broadcast %1 : i32 to vector<256x256xi32>
      %20 = arith.cmpi slt, %15, %19 : vector<256x256xi32>
      %cst_6 = arith.constant -1.000000e+30 : f32
      %21 = vector.broadcast %cst_6 : f32 to vector<256x256xf32>
      %22 = arith.select %20, %14, %21 : vector<256x256xi1>, vector<256x256xf32>
      %cst_7 = arith.constant dense<0xFF800000> : vector<256xf32>
      %23 = vector.multi_reduction <maximumf>, %22, %cst_7 [1] : vector<256x256xf32> to vector<256xf32>
      %24 = vector.shape_cast %23 : vector<256xf32> to vector<256x1xf32>
      %25 = vector.broadcast %24 : vector<256x1xf32> to vector<256x256xf32>
      %26 = arith.subf %22, %25 : vector<256x256xf32>
      %c0_8 = arith.constant 0 : index
      %c0_9 = arith.constant 0 : index
      %c0_10 = arith.constant 0 : index
      %27 = vector.load %arg5[%c0_8, %c0_9, %c0_10] : memref<1x256x1xf32, #tpu.memory_space<vmem>>, vector<1x256x1xf32>
      %28 = vector.shape_cast %27 : vector<1x256x1xf32> to vector<256x1xf32>
      %c0_11 = arith.constant 0 : index
      %c0_12 = arith.constant 0 : index
      %c0_13 = arith.constant 0 : index
      %29 = vector.load %arg6[%c0_11, %c0_12, %c0_13] : memref<1x1x256xf32, #tpu.memory_space<vmem>>, vector<1x1x256xf32>
      %30 = vector.shape_cast %29 : vector<1x1x256xf32> to vector<1x256xf32>
      %31 = vector.broadcast %28 : vector<256x1xf32> to vector<256x256xf32>
      %32 = vector.broadcast %30 : vector<1x256xf32> to vector<256x256xf32>
      %33 = arith.cmpf oeq, %31, %32 : vector<256x256xf32>
      %34 = arith.andi %33, %20 : vector<256x256xi1>
      %35 = arith.cmpi ne, %15, %18 : vector<256x256xi32>
      %36 = arith.andi %34, %35 : vector<256x256xi1>
      %cst_14 = arith.constant dense<true> : vector<256x256xi1>
      %37 = arith.xori %33, %cst_14 : vector<256x256xi1>
      %38 = arith.andi %37, %20 : vector<256x256xi1>
      %39 = math.exp %26 : vector<256x256xf32>
      %cst_15 = arith.constant 0.000000e+00 : f32
      %40 = vector.broadcast %cst_15 : f32 to vector<256x256xf32>
      %41 = arith.select %38, %39, %40 : vector<256x256xi1>, vector<256x256xf32>
      %cst_16 = arith.constant dense<0.000000e+00> : vector<256xf32>
      %42 = vector.multi_reduction <add>, %41, %cst_16 [1] : vector<256x256xf32> to vector<256xf32>
      %43 = vector.shape_cast %42 : vector<256xf32> to vector<256x1xf32>
      %44 = vector.broadcast %43 : vector<256x1xf32> to vector<256x256xf32>
      %45 = arith.addf %39, %44 : vector<256x256xf32>
      %46 = math.log %45 : vector<256x256xf32>
      %47 = arith.subf %26, %46 : vector<256x256xf32>
      %cst_17 = arith.constant 1.000000e+00 : f32
      %cst_18 = arith.constant 0.000000e+00 : f32
      %48 = vector.broadcast %cst_17 : f32 to vector<256x256xf32>
      %49 = vector.broadcast %cst_18 : f32 to vector<256x256xf32>
      %50 = arith.select %36, %48, %49 : vector<256x256xi1>, vector<256x256xf32>
      %cst_19 = arith.constant dense<0.000000e+00> : vector<256xf32>
      %51 = vector.multi_reduction <add>, %50, %cst_19 [1] : vector<256x256xf32> to vector<256xf32>
      %52 = vector.shape_cast %51 : vector<256xf32> to vector<256x1xf32>
      %cst_20 = arith.constant 0.000000e+00 : f32
      %53 = vector.broadcast %cst_20 : f32 to vector<256x256xf32>
      %54 = arith.select %36, %47, %53 : vector<256x256xi1>, vector<256x256xf32>
      %cst_21 = arith.constant dense<0.000000e+00> : vector<256xf32>
      %55 = vector.multi_reduction <add>, %54, %cst_21 [1] : vector<256x256xf32> to vector<256xf32>
      %56 = vector.shape_cast %55 : vector<256xf32> to vector<256x1xf32>
      %57 = arith.divf %56, %52 : vector<256x1xf32>
      %cst_22 = arith.constant -1.42857146 : f32
      %58 = vector.broadcast %cst_22 : f32 to vector<256x1xf32>
      %59 = arith.mulf %58, %57 : vector<256x1xf32>
      %60 = tpu.iota {dimensions = array<i32: 0>} : vector<256x1xi32>
      %61 = vector.broadcast %3 : i32 to vector<256x1xi32>
      %62 = arith.addi %60, %61 : vector<256x1xi32>
      %63 = vector.broadcast %1 : i32 to vector<256x1xi32>
      %64 = arith.cmpi slt, %62, %63 : vector<256x1xi32>
      %cst_23 = arith.constant 0.000000e+00 : f32
      %65 = vector.broadcast %cst_23 : f32 to vector<256x1xf32>
      %66 = arith.select %64, %59, %65 : vector<256x1xi1>, vector<256x1xf32>
      %67 = vector.shape_cast %66 : vector<256x1xf32> to vector<1x256x1xf32>
      %cst_24 = arith.constant dense<0.000000e+00> : vector<1xf32>
      %68 = vector.multi_reduction <add>, %67, %cst_24 [1, 2] : vector<1x256x1xf32> to vector<1xf32>
      %69 = vector.shape_cast %68 : vector<1xf32> to vector<1x1x1xf32>
      %70 = vector.extract %69[0, 0, 0] : f32 from vector<1x1x1xf32>
      %71 = vector.broadcast %70 : f32 to vector<8x128xf32>
      %c0_25 = arith.constant 0 : index
      %c0_26 = arith.constant 0 : index
      %c0_27 = arith.constant 0 : index
      %c0_28 = arith.constant 0 : index
      %72 = vector.load %arg7[%c0_25, %c0_26, %c0_27, %c0_28] : memref<1x1x8x128xf32, #tpu.memory_space<vmem>>, vector<1x1x8x128xf32>
      %73 = vector.shape_cast %72 : vector<1x1x8x128xf32> to vector<8x128xf32>
      %74 = vector.shape_cast %71 : vector<8x128xf32> to vector<1x1x8x128xf32>
      tpu.vector_store %arg7[%c0_25, %c0_26, %c0_27, %c0_28], %74 {strides = array<i32>} : memref<1x1x8x128xf32, #tpu.memory_space<vmem>>, vector<1x1x8x128xf32>,
    } else {
    }
    return
  }
  func.func @transform_0(%arg0: i32, %arg1: i32, %arg2: memref<2xi32, #tpu.memory_space<smem>>) -> (i32, i32, i32) {
    %c0_i32 = arith.constant 0 : i32
    %c0_i32_0 = arith.constant 0 : i32
    return %arg0, %arg1, %c0_i32 : i32, i32, i32
  }
  func.func @transform_1(%arg0: i32, %arg1: i32, %arg2: memref<2xi32, #tpu.memory_space<smem>>) -> (i32, i32, i32) {
    %c0_i32 = arith.constant 0 : i32
    %c0_i32_0 = arith.constant 0 : i32
    %c0_i32_1 = arith.constant 0 : i32
    return %arg0, %c0_i32, %c0_i32_0 : i32, i32, i32
  }
  func.func @transform_2(%arg0: i32, %arg1: i32, %arg2: memref<2xi32, #tpu.memory_space<smem>>) -> (i32, i32, i32) {
    %c0_i32 = arith.constant 0 : i32
    %c0_i32_0 = arith.constant 0 : i32
    return %arg0, %arg1, %c0_i32 : i32, i32, i32
  }
  func.func @transform_3(%arg0: i32, %arg1: i32, %arg2: memref<2xi32, #tpu.memory_space<smem>>) -> (i32, i32, i32) {
    %c0_i32 = arith.constant 0 : i32
    %c0_i32_0 = arith.constant 0 : i32
    %c0_i32_1 = arith.constant 0 : i32
    return %arg0, %c0_i32, %c0_i32_0 : i32, i32, i32
  }
  func.func @transform_4(%arg0: i32, %arg1: i32, %arg2: memref<2xi32, #tpu.memory_space<smem>>) -> (i32, i32, i32, i32) {
    %c0_i32 = arith.constant 0 : i32
    %c0_i32_0 = arith.constant 0 : i32
    %c0_i32_1 = arith.constant 0 : i32
    return %arg0, %arg1, %c0_i32, %c0_i32_0 : i32, i32, i32, i32
  }
}

</mosaic_0001>

<bundles_post_ra>
// kernel: tpu_custom_call.1
= control target key start
LH: loop header
LB: loop body
LE: loop exit
PB: predicated region body
PF: predicated region fallthrough
CT: control target
= control target key end

     0   :  { %s6979_s0 = inlined_call_operand.vmem [shape: s32[2], index: 0, kind: input, shape index: {}]   ;;  %s6980_s1 = inlined_call_operand.vmem [shape: bf16[2,256,32], index: 1, kind: input, shape index: {}]   ;;  %s6981_s2 = inlined_call_operand.vmem [shape: bf16[2,32,256], index: 2, kind: input, shape index: {}]   ;;  %s6982_s3 = inlined_call_operand.vmem [shape: f32[2,256,1], index: 3, kind: input, shape index: {}]   ;;  %s6983_s4 = inlined_call_operand.vmem [shape: f32[2,1,256], index: 4, kind: input, shape index: {}]   ;;  %s6984_s5 = inlined_call_operand.hbm [shape: f32[2,1,8,128], index: 5, kind: output, shape index: {}]  }
   0x1   :  { %s10_s20 = sshll.u32 %s6979_s0, 4  ;;  %s11_s20 = int_to_ptr.vmem [resolvable:$true] %s10_s20 }
   0x2   :  { %s3280_s21 = scalar_lea.vmem %s11_s20, 16  ;;  %p3285_p1 = scmp.lt.s32.totalorder %s11_s20, %s11_s20 }
   0x3   :  { %p3281_p0 = scmp.ne.s32.totalorder %s11_s20, %s3280_s21  ;;  %p3286_p2 = scmp.lt.s32.totalorder %s3280_s21, %s3280_s21 }
   0x5   :  { %p3287_p3 = por %p3286_p2, %p3285_p1 }
   0x7   :  { %p3288_p4 = pnand %p3287_p3, %p3281_p0 }
   0x9   :  { %3291 = shalt.err (!%p3288_p4)  }
   0xa   :  { %s3374_s22 = smov [#allocation3]  }
   0xb   :  { %13 = dma.vmem_to_smem %s11_s20, 16, %s3374_s22, [#allocation2] }
   0xc   :  { %3344 = dma.done.wait [#allocation2], 16 }
   0xd   :  { %3345 = vsyncadd [#allocation2], 4294967280 }
   0xe   :  { %15 = sfence }
   0xf   :  { %16 = vsyncpa [#allocation5], 0 }
  0x10   :  { %18 = vsyncpa [#allocation5 + $0x1], 0  ;;  %s3413_s23 = smov 0   ;;  %s3415_s24 = smov 0  }
  0x11   :  { %s3417_s0 = smov 0   ;;  %s3419_s25 = smov 0  }
  0x12   :  { %s3421_s26 = smov 0   ;;  %s3423_s27 = smov 0  }
  0x13 LB: > { %7305 = sst [smem:[#allocation8_spill]] %s3360_s0  ;;  %s2810_s28 = sadd.s32 4294967295, %s3372_s27   ;;  %s3372_s27 = sphi %s3423_s27, %s24_s27   ;;  %s3368_s26 = sphi %s3421_s26, %s8228_s26   ;;  %s3364_s25 = sphi %s3419_s25, %s8227_s25   ;;  %s3360_s0 = sphi %s3417_s0, %s8226_s0   ;;  %s3356_s24 = sphi %s3415_s24, %s8230_s24   ;;  %s3352_s23 = sphi %s3413_s23, %s8229_s23  }
  0x14   : > { %7306 = sst [smem:[#allocation9_spill]] %s3368_s26  ;;  %s2811_s29 = sadd.s32 4294967294, %s3372_s27  }
  0x15   : > { %s36_s30 = sadd.s32 1, %s3368_s26  ;;  %s153_s6 = sadd.s32 1, %s3360_s0 }
  0x16   : > { %p38_p5 = scmp.ge.s32.totalorder %s36_s30, 2  ;;  %p163_p6 = scmp.ne.s32.totalorder %s3360_s0, %s3356_s24 }
  0x17   : > { %p164_p7 = scmp.eq.s32.totalorder %s2810_s28, 1  ;;  %p169_p8 = scmp.ne.s32.totalorder %s3356_s24, %s3352_s23 }
  0x18   : > { %s8232_s30 = smov (%p38_p5, %s36_s30), 0  ;;  %p170_p10 = scmp.eq.s32.totalorder %s2811_s29, 1 }
  0x19   : > { %7307 = sst [smem:[#allocation10_spill]] %s8232_s30  ;;  %p3453_p9 = por %p164_p7, %p163_p6 }
  0x1a   : > { %s148_s8 = ssub.s32 %s3368_s26, %s8232_s30  ;;  %p2814_p11 = scmp.ge.s32.totalorder %s3372_s27, 1 }
  0x1b   : > { %p151_p12 = scmp.eq.s32.totalorder %s148_s8, 0  ;;  %p3460_p13 = por %p170_p10, %p169_p8 }
  0x1c   : > { %p229_p0 = scmp.lt.s32.totalorder %s3372_s27, 3 }
  0x1d   : > { %s3466_s10 = scalar_select %p151_p12, %s3360_s0, %s153_s6  }
  0x1e   : > { %p230_p1 = pnand %p2814_p11, %p229_p0 }
  0x1f   : > { %7310 = sst [smem:[#allocation11_spill]] %s3466_s10  ;;  %s6985_s11 = sand.u32 (!%p230_p1), 1, %s3356_s24  }
  0x20   : > { %233 = sbr.rel (%p230_p1) target bundleno = 1289 (0x509), region = 36  ;;  %p278_p2 = scmp.lt.s32.totalorder (!%p230_p1), %s3364_s25, 1 }
  0x21   : > { %s2815_s12 = sshll.u32 (!%p230_p1), %s6985_s11, 3  ;;  %s3473_s13 = sld [smem:[#allocation3 + %s3364_s25]] (!%p230_p1) }
  0x22   : > { %s3494_s0 = scalar_lea.vmem (!%p230_p1), [#allocation4], %s2815_s12 }
  0x27   : > { %s279_s14 = scalar_select %p278_p2, %s3364_s25, 1 }
  0x28   : > { %p2824_p3 = scmp.gt.s32.totalorder %s3473_s13, 0 }
  0x29   : > { %s2867_s15 = sshll.u32 %s279_s14, 7  ;;  %s2868_s16 = sshll.u32 %s279_s14, 5  ;;  %v3375_v0 = vmov (!%p2824_p3), 0.0  }
  0x2a   : > { %s3479_s19 = scalar_lea.vmem %s6980_s1, %s2867_s15  ;;  %s291_s22 = scalar_lea.vmem %s6981_s2, %s2868_s16  ;;  %313 = vst [vmem:[%s3494_s0] sm:$0xff] (!%p2824_p3), %v3375_v0 }
  0x2b   : > { %s2869_s28 = sshll.u32 %s279_s14, 8  ;;  %s2822_s29 = sshll.u32 %s279_s14, 1 }
  0x2c   : > { %s3487_s11 = scalar_lea.vmem %s6982_s3, %s2869_s28  ;;  %s3492_s10 = scalar_lea.vmem %s6983_s4, %s2822_s29 }
  0x2d   : > { %312 = sbr.rel (%p2824_p3) target bundleno = 52 (0x34), region = 40 }
  0x34 PF: > { %p2826_p4 = scmp.le.s32.totalorder %s3473_s13, 0 }
  0x36   : > { %317 = sbr.rel (%p2826_p4) target bundleno = 1264 (0x4f0), region = 44 }
  0x3d   : > { %v2938_v1 = vld [vmem:[%s291_s22 + $0x4] ss:$8 sps:$4 sm:$0xff]   ;;  %v2940_v2 = vld [vmem:[%s291_s22] ss:$8 sps:$4 sm:$0xff]   ;;  %v3376_v3 = vmov 0   ;;  %vm454_vm0 = vcmask 261120   ;;  %v6989_v22 = vlaneseq  ;;  %v3535_v24 = vstv %s3473_s13 }
  0x3e   : > { %535 = vmatprep.mubr.bf16.mxu0 %v3376_v3  ;;  %615 = vmatprep.mubr.bf16.mxu1 %v3376_v3  ;;  %v2941_v4 = vld [vmem:[%s291_s22 + $0x14] ss:$8 sps:$4 sm:$0xff]   ;;  %v2943_v5 = vld [vmem:[%s291_s22 + $0x10] ss:$8 sps:$4 sm:$0xff]   ;;  %v2944_v6 = vld [vmem:[%s3479_s19] sm:$0xff]   ;;  %7311 = vst [vmem:[#allocation12_spill] sm:$0xff] %v3535_v24 }
  0x3f   : > { %503 = vmatprep.subr.bf16.mxu0 %v2938_v1  ;;  %2870 = vmatprep.subr.bf16.mxu1 %v2938_v1  ;;  %v2945_v7 = vld [vmem:[%s3479_s19 + $0x40] sm:$0xff]   ;;  %v2946_v8 = vld [vmem:[%s3479_s19 + $0x8] sm:$0xff]   ;;  %v2948_v10 = vld [vmem:[%s3479_s19 + $0x10] sm:$0xff]   ;;  %v3532_v23 = vand.u32 127, %v6989_v22  ;;  %vm7100_vm5 = vmmov 1  }
  0x40   : > { %504 = vmatpush1.bf16.msra.mxu0 %v2940_v2  ;;  %2872 = vmatpush1.bf16.msra.mxu1 %v2940_v2  ;;  %v2947_v9 = vld [vmem:[%s3479_s19 + $0x48] sm:$0xff]   ;;  %v2949_v11 = vld [vmem:[%s3479_s19 + $0x50] sm:$0xff]   ;;  %v2950_v12 = vld [vmem:[%s3479_s19 + $0x18] sm:$0xff]  }
  0x41   : > { %505 = vmatprep.subr.bf16.mxu0 %v2941_v4  ;;  %2871 = vmatprep.subr.bf16.mxu1 %v2941_v4  ;;  %v2951_v13 = vld [vmem:[%s3479_s19 + $0x58] sm:$0xff]   ;;  %v2952_v14 = vld [vmem:[%s3479_s19 + $0x20] sm:$0xff]   ;;  %v2954_v16 = vld [vmem:[%s3479_s19 + $0x28] sm:$0xff]   ;;  %v3538_v25 = vadd.s32 128, %v3532_v23  ;;  %vm3542_vm1 = vcmp.lt.s32.totalorder %v3532_v23, %v3535_v24 }
  0x42   : > { %2936 = vset.pattern.permute.xlu0 %v3376_v3  ;;  %2937 = vset.pattern.permute.xlu1 %v3376_v3  ;;  %v2953_v15 = vld [vmem:[%s3479_s19 + $0x60] sm:$0xff]   ;;  %v2956_v17 = vld [vmem:[%s3479_s19 + $0x68] sm:$0xff]   ;;  %v2955_v18 = vld [vmem:[%s3479_s19 + $0x30] sm:$0xff]  }
  0x43   : > { %v2958_v19 = vld [vmem:[%s3479_s19 + $0x70] sm:$0xff]   ;;  %v2957_v20 = vld [vmem:[%s3479_s19 + $0x38] sm:$0xff]   ;;  %7312 = vst [vmem:[#allocation13_spill] sm:$0xff] %v3538_v25  ;;  %vm3548_vm2 = vcmp.lt.s32.totalorder %v3538_v25, %v3535_v24 }
  0x44   : > { %506 = vmatpush1.bf16.msra.mxu0 %v2943_v5  ;;  %2873 = vmatpush1.bf16.msra.mxu1 %v2943_v5  ;;  %v2959_v21 = vld [vmem:[%s3479_s19 + $0x78] sm:$0xff]  }
  0x47   : > { %2847 = vmatmul.mubr.msk.bf16.vlgmr.msra.gmra.mrb[0].mxu0 %vm454_vm0, %v2944_v6  ;;  %2855 = vmatmul.mubr.msk.bf16.vlgmr.msra.gmra.mrb[0].mxu1 %vm454_vm0, %v2945_v7 }
  0x48   : > { %545 = vmatprep.mubr.bf16.mxu0 %v3376_v3  ;;  %625 = vmatprep.mubr.bf16.mxu1 %v3376_v3 }
  0x4f   : > { %2848 = vmatmul.mubr.msk.bf16.gmra.mrb[4].mxu0 %vm454_vm0, %v2946_v8  ;;  %2856 = vmatmul.mubr.msk.bf16.gmra.mrb[4].mxu1 %vm454_vm0, %v2947_v9 }
  0x50   : > { %555 = vmatprep.mubr.bf16.mxu0 %v3376_v3  ;;  %635 = vmatprep.mubr.bf16.mxu1 %v3376_v3 }
  0x57   : > { %2849 = vmatmul.mubr.msk.bf16.gmra.mrb[8].mxu0 %vm454_vm0, %v2948_v10  ;;  %2857 = vmatmul.mubr.msk.bf16.gmra.mrb[8].mxu1 %vm454_vm0, %v2949_v11 }
  0x58   : > { %565 = vmatprep.mubr.bf16.mxu0 %v3376_v3  ;;  %645 = vmatprep.mubr.bf16.mxu1 %v3376_v3 }
  0x5f   : > { %2850 = vmatmul.mubr.msk.bf16.gmra.mrb[12].mxu0 %vm454_vm0, %v2950_v12  ;;  %2858 = vmatmul.mubr.msk.bf16.gmra.mrb[12].mxu1 %vm454_vm0, %v2951_v13 }
  0x60   : > { %575 = vmatprep.mubr.bf16.mxu0 %v3376_v3  ;;  %655 = vmatprep.mubr.bf16.mxu1 %v3376_v3 }
  0x67   : > { %2851 = vmatmul.mubr.msk.bf16.gmra.mrb[16].mxu0 %vm454_vm0, %v2952_v14  ;;  %2859 = vmatmul.mubr.msk.bf16.gmra.mrb[16].mxu1 %vm454_vm0, %v2953_v15 }
  0x68   : > { %585 = vmatprep.mubr.bf16.mxu0 %v3376_v3  ;;  %665 = vmatprep.mubr.bf16.mxu1 %v3376_v3 }
  0x6f   : > { %2852 = vmatmul.mubr.msk.bf16.gmra.mrb[20].mxu0 %vm454_vm0, %v2954_v16  ;;  %2860 = vmatmul.mubr.msk.bf16.gmra.mrb[20].mxu1 %vm454_vm0, %v2956_v17 }
  0x70   : > { %595 = vmatprep.mubr.bf16.mxu0 %v3376_v3  ;;  %675 = vmatprep.mubr.bf16.mxu1 %v3376_v3 }
  0x77   : > { %2853 = vmatmul.mubr.msk.bf16.gmra.mrb[24].mxu0 %vm454_vm0, %v2955_v18  ;;  %2861 = vmatmul.mubr.msk.bf16.gmra.mrb[24].mxu1 %vm454_vm0, %v2958_v19 }
  0x78   : > { %605 = vmatprep.mubr.bf16.mxu0 %v3376_v3  ;;  %685 = vmatprep.mubr.bf16.mxu1 %v3376_v3 }
  0x7f   : > { %2854 = vmatmul.mubr.msk.bf16.gmra.mrb[28].mxu0 %vm454_vm0, %v2957_v20  ;;  %2862 = vmatmul.mubr.msk.bf16.gmra.mrb[28].mxu1 %vm454_vm0, %v2959_v21 }
 0x11a   : > { %v537_v28 = vpop.f32.mrb[0].mxu0  ;;  %v617_v29 = vpop.f32.mrb[0].mxu1 }
 0x11b   : > { %v3554_v30 = vsel %vm3542_vm1, %v537_v28, -1e+30  ;;  %v3558_v31 = vsel %vm3542_vm1, %v617_v29, -1e+30  ;;  %v539_v32 = vpop.f32.mrb[1].mxu0  ;;  %v619_v33 = vpop.f32.mrb[1].mxu1 }
 0x11c   : > { %v3562_v34 = vsel %vm3548_vm2, %v539_v32, -1e+30  ;;  %v3566_v35 = vsel %vm3548_vm2, %v619_v33, -1e+30  ;;  %v541_v36 = vpop.f32.mrb[2].mxu0  ;;  %v621_v37 = vpop.f32.mrb[2].mxu1 }
 0x11d   : > { %v3570_v38 = vsel %vm3542_vm1, %v621_v37, -1e+30  ;;  %v543_v39 = vpop.f32.mrb[3].mxu0  ;;  %v623_v40 = vpop.f32.mrb[3].mxu1  ;;  %v832_v41 = vmax.f32 %v3554_v30, %v3562_v34  ;;  %v880_v44 = vmax.f32 %v3558_v31, %v3566_v35  ;;  %v3584_v45 = vsel %vm3542_vm1, %v541_v36, -1e+30 }
 0x11e   : > { %7317 = vst [vmem:[#allocation14_spill] sm:$0xff] %v3570_v38  ;;  %v3576_v42 = vsel %vm3548_vm2, %v623_v40, -1e+30  ;;  %v3588_v46 = vsel %vm3548_vm2, %v543_v39, -1e+30 }
 0x11f   : > { %7318 = vst [vmem:[#allocation15_spill] sm:$0xff] %v3576_v42  ;;  %833 = vmax.xlane.f32.xlu0 %v832_v41  ;;  %v883_v43 = vmax.f32 %v3570_v38, %v3576_v42  ;;  %v835_v58 = vmax.f32 %v3584_v45, %v3588_v46  ;;  %v7360_v38 = vlaneseq }
 0x121   : > { %884 = vmax.xlane.f32.xlu1 %v883_v43 }
 0x122   : > { %v547_v47 = vpop.f32.mrb[4].mxu0  ;;  %v627_v48 = vpop.f32.mrb[4].mxu1 }
 0x123   : > { %v3592_v49 = vsel %vm3542_vm1, %v547_v47, -1e+30  ;;  %881 = vmax.xlane.f32.xlu0 %v880_v44  ;;  %v549_v50 = vpop.f32.mrb[5].mxu0  ;;  %v3596_v51 = vsel %vm3542_vm1, %v627_v48, -1e+30  ;;  %v629_v52 = vpop.f32.mrb[5].mxu1 }
 0x124   : > { %v3600_v53 = vsel %vm3548_vm2, %v549_v50, -1e+30  ;;  %v551_v54 = vpop.f32.mrb[6].mxu0  ;;  %v3604_v55 = vsel %vm3548_vm2, %v629_v52, -1e+30  ;;  %v631_v56 = vpop.f32.mrb[6].mxu1 }
 0x125   : > { %7319 = vst [vmem:[#allocation16_spill] sm:$0xff] %v3604_v55  ;;  %v553_v57 = vpop.f32.mrb[7].mxu0  ;;  %v838_v59 = vmax.f32 %v3592_v49, %v3600_v53  ;;  %v633_v60 = vpop.f32.mrb[7].mxu1  ;;  %v3612_v61 = vsel %vm3542_vm1, %v551_v54, -1e+30  ;;  %v886_v63 = vmax.f32 %v3596_v51, %v3604_v55 }
 0x126   : > { %v3616_v62 = vsel %vm3548_vm2, %v553_v57, -1e+30  ;;  %v3622_v0 = vsel %vm3542_vm1, %v631_v56, -1e+30  ;;  %v3626_v1 = vsel %vm3548_vm2, %v633_v60, -1e+30 }
 0x127   : > { %836 = vmax.xlane.f32.xlu0 %v835_v58  ;;  %839 = vmax.xlane.f32.xlu1 %v838_v59  ;;  %7320 = vst [vmem:[#allocation17_spill] sm:$0xff] %v3622_v0  ;;  %7321 = vst [vmem:[#allocation18_spill] sm:$0xff] %v3626_v1  ;;  %v841_v2 = vmax.f32 %v3612_v61, %v3616_v62  ;;  %v889_v9 = vmax.f32 %v3622_v0, %v3626_v1 }
 0x12a   : > { %v557_v3 = vpop.f32.mrb[8].mxu0  ;;  %v637_v4 = vpop.f32.mrb[8].mxu1 }
 0x12b   : > { %v3632_v5 = vsel %vm3542_vm1, %v557_v3, -1e+30  ;;  %887 = vmax.xlane.f32.xlu0 %v886_v63  ;;  %842 = vmax.xlane.f32.xlu1 %v841_v2  ;;  %v559_v6 = vpop.f32.mrb[9].mxu0  ;;  %v3636_v7 = vsel %vm3542_vm1, %v637_v4, -1e+30  ;;  %v639_v8 = vpop.f32.mrb[9].mxu1 }
 0x12c   : > { %7322 = vst [vmem:[#allocation19_spill] sm:$0xff] %v3636_v7  ;;  %v3642_v10 = vsel %vm3548_vm2, %v559_v6, -1e+30  ;;  %v561_v11 = vpop.f32.mrb[10].mxu0  ;;  %v3646_v12 = vsel %vm3548_vm2, %v639_v8, -1e+30 }
 0x12d   : > { %7323 = vst [vmem:[#allocation20_spill] sm:$0xff] %v3646_v12  ;;  %v641_v13 = vpop.f32.mrb[10].mxu1  ;;  %v563_v14 = vpop.f32.mrb[11].mxu0  ;;  %v844_v15 = vmax.f32 %v3632_v5, %v3642_v10  ;;  %v3652_v17 = vsel %vm3542_vm1, %v561_v11, -1e+30  ;;  %v892_v19 = vmax.f32 %v3636_v7, %v3646_v12 }
 0x12e   : > { %v643_v16 = vpop.f32.mrb[11].mxu1  ;;  %v3656_v18 = vsel %vm3548_vm2, %v563_v14, -1e+30  ;;  %v3662_v20 = vsel %vm3542_vm1, %v641_v13, -1e+30 }
 0x12f   : > { %890 = vmax.xlane.f32.xlu1 %v889_v9  ;;  %845 = vmax.xlane.f32.xlu0 %v844_v15  ;;  %7324 = vst [vmem:[#allocation21_spill] sm:$0xff] %v3662_v20  ;;  %v3666_v21 = vsel %vm3548_vm2, %v643_v16, -1e+30  ;;  %v847_v28 = vmax.f32 %v3652_v17, %v3656_v18 }
 0x130   : > { %7325 = vst [vmem:[#allocation22_spill] sm:$0xff] %v3666_v21  ;;  %v895_v40 = vmax.f32 %v3662_v20, %v3666_v21 }
 0x132   : > { %v567_v29 = vpop.f32.mrb[12].mxu0  ;;  %v647_v32 = vpop.f32.mrb[12].mxu1 }
 0x133   : > { %v3672_v33 = vsel %vm3542_vm1, %v567_v29, -1e+30  ;;  %893 = vmax.xlane.f32.xlu0 %v892_v19  ;;  %848 = vmax.xlane.f32.xlu1 %v847_v28  ;;  %v569_v36 = vpop.f32.mrb[13].mxu0  ;;  %v3676_v37 = vsel %vm3542_vm1, %v647_v32, -1e+30  ;;  %v649_v39 = vpop.f32.mrb[13].mxu1 }
 0x134   : > { %7326 = vst [vmem:[#allocation23_spill] sm:$0xff] %v3676_v37  ;;  %v3682_v41 = vsel %vm3548_vm2, %v569_v36, -1e+30  ;;  %v571_v43 = vpop.f32.mrb[14].mxu0  ;;  %v3686_v44 = vsel %vm3548_vm2, %v649_v39, -1e+30 }
 0x135   : > { %7327 = vst [vmem:[#allocation24_spill] sm:$0xff] %v3686_v44  ;;  %v651_v47 = vpop.f32.mrb[14].mxu1  ;;  %v573_v48 = vpop.f32.mrb[15].mxu0  ;;  %v850_v50 = vmax.f32 %v3672_v33, %v3682_v41  ;;  %v3692_v54 = vsel %vm3542_vm1, %v571_v43, -1e+30  ;;  %v898_v57 = vmax.f32 %v3676_v37, %v3686_v44 }
 0x136   : > { %v653_v52 = vpop.f32.mrb[15].mxu1  ;;  %v3696_v56 = vsel %vm3548_vm2, %v573_v48, -1e+30  ;;  %v3702_v58 = vsel %vm3542_vm1, %v651_v47, -1e+30 }
 0x137   : > { %896 = vmax.xlane.f32.xlu1 %v895_v40  ;;  %851 = vmax.xlane.f32.xlu0 %v850_v50  ;;  %7328 = vst [vmem:[#allocation25_spill] sm:$0xff] %v3702_v58  ;;  %v3706_v59 = vsel %vm3548_vm2, %v653_v52, -1e+30  ;;  %v853_v60 = vmax.f32 %v3692_v54, %v3696_v56 }
 0x138   : > { %7329 = vst [vmem:[#allocation26_spill] sm:$0xff] %v3706_v59  ;;  %v901_v9 = vmax.f32 %v3702_v58, %v3706_v59 }
 0x13a   : > { %v577_v63 = vpop.f32.mrb[16].mxu0  ;;  %v657_v2 = vpop.f32.mrb[16].mxu1 }
 0x13b   : > { %v3712_v3 = vsel %vm3542_vm1, %v577_v63, -1e+30  ;;  %899 = vmax.xlane.f32.xlu0 %v898_v57  ;;  %854 = vmax.xlane.f32.xlu1 %v853_v60  ;;  %v579_v4 = vpop.f32.mrb[17].mxu0  ;;  %v3716_v6 = vsel %vm3542_vm1, %v657_v2, -1e+30  ;;  %v659_v8 = vpop.f32.mrb[17].mxu1 }
 0x13c   : > { %7330 = vst [vmem:[#allocation27_spill] sm:$0xff] %v3716_v6  ;;  %v3722_v11 = vsel %vm3548_vm2, %v579_v4, -1e+30  ;;  %v581_v13 = vpop.f32.mrb[18].mxu0  ;;  %v3726_v14 = vsel %vm3548_vm2, %v659_v8, -1e+30 }
 0x13d   : > { %7331 = vst [vmem:[#allocation28_spill] sm:$0xff] %v3726_v14  ;;  %v661_v15 = vpop.f32.mrb[18].mxu1  ;;  %v583_v16 = vpop.f32.mrb[19].mxu0  ;;  %v856_v19 = vmax.f32 %v3712_v3, %v3722_v11  ;;  %v3732_v29 = vsel %vm3542_vm1, %v581_v13, -1e+30  ;;  %v904_v36 = vmax.f32 %v3716_v6, %v3726_v14 }
 0x13e   : > { %v663_v28 = vpop.f32.mrb[19].mxu1  ;;  %v3736_v32 = vsel %vm3548_vm2, %v583_v16, -1e+30 }
 0x13f   : > { %902 = vmax.xlane.f32.xlu1 %v901_v9  ;;  %857 = vmax.xlane.f32.xlu0 %v856_v19  ;;  %v859_v39 = vmax.f32 %v3732_v29, %v3736_v32 }
 0x142   : > { %v587_v40 = vpop.f32.mrb[20].mxu0  ;;  %v667_v43 = vpop.f32.mrb[20].mxu1 }
 0x143   : > { %v3744_v47 = vsel %vm3542_vm1, %v587_v40, -1e+30  ;;  %905 = vmax.xlane.f32.xlu0 %v904_v36  ;;  %860 = vmax.xlane.f32.xlu1 %v859_v39  ;;  %v589_v48 = vpop.f32.mrb[21].mxu0  ;;  %v669_v50 = vpop.f32.mrb[21].mxu1 }
 0x144   : > { %v3748_v52 = vsel %vm3548_vm2, %v589_v48, -1e+30  ;;  %v591_v57 = vpop.f32.mrb[22].mxu0  ;;  %v671_v60 = vpop.f32.mrb[22].mxu1  ;;  %v3802_v1 = vsel %vm3548_vm2, %v669_v50, -1e+30 }
 0x145   : > { %v3752_v63 = vsel %vm3542_vm1, %v591_v57, -1e+30  ;;  %v593_v2 = vpop.f32.mrb[23].mxu0  ;;  %v862_v4 = vmax.f32 %v3744_v47, %v3748_v52  ;;  %v673_v8 = vpop.f32.mrb[23].mxu1  ;;  %7334 = vst [vmem:[#allocation31_spill] sm:$0xff] %v3802_v1 }
 0x146   : > { %v3758_v9 = vsel %vm3548_vm2, %v593_v2, -1e+30  ;;  %v3838_v12 = vsel %vm3548_vm2, %v673_v8, -1e+30 }
 0x147   : > { %863 = vmax.xlane.f32.xlu0 %v862_v4  ;;  %v865_v13 = vmax.f32 %v3752_v63, %v3758_v9  ;;  %7341 = vst [vmem:[#allocation38_spill] sm:$0xff] %v3838_v12 }
 0x149   : > { %866 = vmax.xlane.f32.xlu1 %v865_v13 }
 0x14a   : > { %v597_v16 = vpop.f32.mrb[24].mxu0  ;;  %v677_v19 = vpop.f32.mrb[24].mxu1 }
 0x14b   : > { %v3764_v36 = vsel %vm3542_vm1, %v597_v16, -1e+30  ;;  %v599_v39 = vpop.f32.mrb[25].mxu0  ;;  %v679_v40 = vpop.f32.mrb[25].mxu1  ;;  %v3820_v50 = vsel %vm3542_vm1, %v677_v19, -1e+30 }
 0x14c   : > { %v3768_v48 = vsel %vm3548_vm2, %v599_v39, -1e+30  ;;  %v601_v57 = vpop.f32.mrb[26].mxu0  ;;  %v681_v2 = vpop.f32.mrb[26].mxu1  ;;  %7338 = vst [vmem:[#allocation35_spill] sm:$0xff] %v3820_v50 }
 0x14d   : > { %v3772_v4 = vsel %vm3542_vm1, %v601_v57, -1e+30  ;;  %v603_v22 = vpop.f32.mrb[27].mxu0  ;;  %v868_v13 = vmax.f32 %v3764_v36, %v3768_v48  ;;  %v683_v24 = vpop.f32.mrb[27].mxu1 }
 0x14e   : > { %v3778_v16 = vsel %vm3548_vm2, %v603_v22, -1e+30 }
 0x14f   : > { %869 = vmax.xlane.f32.xlu0 %v868_v13  ;;  %v871_v39 = vmax.f32 %v3772_v4, %v3778_v16 }
 0x151   : > { %872 = vmax.xlane.f32.xlu1 %v871_v39 }
 0x152   : > { %v607_v59 = vpop.f32.mrb[28].mxu0  ;;  %v687_v58 = vpop.f32.mrb[28].mxu1 }
 0x153   : > { %v3784_v57 = vsel %vm3542_vm1, %v607_v59, -1e+30  ;;  %v609_v14 = vpop.f32.mrb[29].mxu0  ;;  %v689_v6 = vpop.f32.mrb[29].mxu1  ;;  %v3798_v59 = vsel %vm3542_vm1, %v667_v43, -1e+30 }
 0x154   : > { %v3788_v21 = vsel %vm3548_vm2, %v609_v14, -1e+30  ;;  %v611_v20 = vpop.f32.mrb[30].mxu0  ;;  %v691_v22 = vpop.f32.mrb[30].mxu1  ;;  %7333 = vst [vmem:[#allocation30_spill] sm:$0xff] %v3798_v59 }
 0x155   : > { %v3792_v13 = vsel %vm3542_vm1, %v611_v20, -1e+30  ;;  %v613_v44 = vpop.f32.mrb[31].mxu0  ;;  %v874_v39 = vmax.f32 %v3784_v57, %v3788_v21  ;;  %v693_v37 = vpop.f32.mrb[31].mxu1  ;;  %v3810_v20 = vsel %vm3542_vm1, %v661_v15, -1e+30  ;;  %v910_v15 = vmax.f32 %v3798_v59, %v3802_v1 }
 0x156   : > { %7332 = vst [vmem:[#allocation29_spill] sm:$0xff] %v3792_v13  ;;  %v3806_v14 = vsel %vm3548_vm2, %v613_v44, -1e+30  ;;  %7336 = vst [vmem:[#allocation33_spill] sm:$0xff] %v3810_v20  ;;  %v3816_v43 = vsel %vm3548_vm2, %v663_v28, -1e+30 }
 0x157   : > { %7335 = vst [vmem:[#allocation32_spill] sm:$0xff] %v3806_v14  ;;  %875 = vmax.xlane.f32.xlu0 %v874_v39  ;;  %v877_v0 = vmax.f32 %v3792_v13, %v3806_v14  ;;  %7337 = vst [vmem:[#allocation34_spill] sm:$0xff] %v3816_v43  ;;  %v3824_v44 = vsel %vm3548_vm2, %v679_v40, -1e+30  ;;  %v3830_v39 = vsel %vm3542_vm1, %v671_v60, -1e+30  ;;  %v907_v28 = vmax.f32 %v3810_v20, %v3816_v43 }
 0x158   : > { %7339 = vst [vmem:[#allocation36_spill] sm:$0xff] %v3824_v44  ;;  %7340 = vst [vmem:[#allocation37_spill] sm:$0xff] %v3830_v39  ;;  %v916_v19 = vmax.f32 %v3820_v50, %v3824_v44  ;;  %v3846_v60 = vsel %vm3548_vm2, %v689_v6, -1e+30  ;;  %v913_v40 = vmax.f32 %v3830_v39, %v3838_v12 }
 0x159   : > { %878 = vmax.xlane.f32.xlu1 %v877_v0  ;;  %v3842_v0 = vsel %vm3542_vm1, %v687_v58, -1e+30  ;;  %7343 = vst [vmem:[#allocation40_spill] sm:$0xff] %v3846_v60  ;;  %v3854_v58 = vsel %vm3542_vm1, %v681_v2, -1e+30  ;;  %v993_v2 = vld [vmem:[%s3487_s11 + $0x8] sm:$0xff] }
 0x15a   : > { %7342 = vst [vmem:[#allocation39_spill] sm:$0xff] %v3842_v0  ;;  %v922_v8 = vmax.f32 %v3842_v0, %v3846_v60  ;;  %7344 = vst [vmem:[#allocation41_spill] sm:$0xff] %v3854_v58  ;;  %v998_v60 = vld [vmem:[%s3487_s11 + $0x30] sm:$0xff] }
 0x15b   : > { %911 = vmax.xlane.f32.xlu0 %v910_v15  ;;  %v3858_v15 = vsel %vm3548_vm2, %v683_v24, -1e+30  ;;  %v1014_v0 = vld [vmem:[%s3487_s11 + $0xb0] sm:$0xff] }
 0x15c   : > { %7345 = vst [vmem:[#allocation42_spill] sm:$0xff] %v3858_v15  ;;  %v919_v6 = vmax.f32 %v3854_v58, %v3858_v15  ;;  %v1020_v15 = vld [vmem:[%s3487_s11 + $0xe0] sm:$0xff] }
 0x15d   : > { %908 = vmax.xlane.f32.xlu1 %v907_v28  ;;  %v3864_v28 = vsel %vm3542_vm1, %v691_v22, -1e+30  ;;  %v995_v22 = vld [vmem:[%s3487_s11 + $0x18] sm:$0xff] }
 0x15e   : > { %7346 = vst [vmem:[#allocation43_spill] sm:$0xff] %v3864_v28 }
 0x15f   : > { %917 = vmax.xlane.f32.xlu0 %v916_v19  ;;  %v3868_v19 = vsel %vm3548_vm2, %v693_v37, -1e+30  ;;  %v996_v37 = vld [vmem:[%s3487_s11 + $0x20] sm:$0xff] }
 0x160   : > { %7347 = vst [vmem:[#allocation44_spill] sm:$0xff] %v3868_v19  ;;  %v925_v24 = vmax.f32 %v3864_v28, %v3868_v19  ;;  %v1021_v19 = vld [vmem:[%s3487_s11 + $0xe8] sm:$0xff] }
 0x161   : > { %914 = vmax.xlane.f32.xlu1 %v913_v40  ;;  %v992_v40 = vld [vmem:[%s3487_s11] sm:$0xff] }
 0x163   : > { %923 = vmax.xlane.f32.xlu0 %v922_v8  ;;  %v994_v8 = vld [vmem:[%s3487_s11 + $0x10] sm:$0xff] }
 0x165   : > { %920 = vmax.xlane.f32.xlu1 %v919_v6  ;;  %v997_v6 = vld [vmem:[%s3487_s11 + $0x28] sm:$0xff] }
 0x169   : > { %926 = vmax.xlane.f32.xlu1 %v925_v24  ;;  %v999_v24 = vld [vmem:[%s3487_s11 + $0x38] sm:$0xff] }
 0x179   : > { %1032 = vperm.xlu0 %2936, %v993_v2   ;;  %v1000_v2 = vld [vmem:[%s3487_s11 + $0x40] sm:$0xff] }
 0x17a   : > { %1027 = vperm.xlu1 %2937, %v992_v40   ;;  %v1001_v40 = vld [vmem:[%s3487_s11 + $0x48] sm:$0xff] }
 0x17d   : > { %1037 = vperm.xlu0 %2936, %v994_v8   ;;  %v1002_v8 = vld [vmem:[%s3487_s11 + $0x50] sm:$0xff] }
 0x17e   : > { %1042 = vperm.xlu1 %2937, %v995_v22   ;;  %v1003_v22 = vld [vmem:[%s3487_s11 + $0x58] sm:$0xff] }
 0x181   : > { %1047 = vperm.xlu0 %2936, %v996_v37   ;;  %v1004_v37 = vld [vmem:[%s3487_s11 + $0x60] sm:$0xff] }
 0x182   : > { %1052 = vperm.xlu1 %2937, %v997_v6   ;;  %v1005_v6 = vld [vmem:[%s3487_s11 + $0x68] sm:$0xff] }
 0x185   : > { %1057 = vperm.xlu0 %2936, %v998_v60   ;;  %v1006_v60 = vld [vmem:[%s3487_s11 + $0x70] sm:$0xff] }
 0x186   : > { %1062 = vperm.xlu1 %2937, %v999_v24   ;;  %v1007_v24 = vld [vmem:[%s3487_s11 + $0x78] sm:$0xff] }
 0x189   : > { %1067 = vperm.xlu0 %2936, %v1000_v2   ;;  %v1008_v2 = vld [vmem:[%s3487_s11 + $0x80] sm:$0xff] }
 0x18a   : > { %1072 = vperm.xlu1 %2937, %v1001_v40   ;;  %v1009_v40 = vld [vmem:[%s3487_s11 + $0x88] sm:$0xff] }
 0x18d   : > { %1077 = vperm.xlu0 %2936, %v1002_v8   ;;  %v1010_v8 = vld [vmem:[%s3487_s11 + $0x90] sm:$0xff] }
 0x18e   : > { %1082 = vperm.xlu1 %2937, %v1003_v22   ;;  %v1011_v22 = vld [vmem:[%s3487_s11 + $0x98] sm:$0xff] }
 0x191   : > { %1087 = vperm.xlu0 %2936, %v1004_v37   ;;  %v1012_v37 = vld [vmem:[%s3487_s11 + $0xa0] sm:$0xff] }
 0x192   : > { %1092 = vperm.xlu1 %2937, %v1005_v6   ;;  %v1013_v6 = vld [vmem:[%s3487_s11 + $0xa8] sm:$0xff] }
 0x195   : > { %1097 = vperm.xlu0 %2936, %v1006_v60   ;;  %v1016_v60 = vld [vmem:[%s3487_s11 + $0xc0] sm:$0xff] }
 0x196   : > { %1102 = vperm.xlu1 %2937, %v1007_v24   ;;  %v1015_v24 = vld [vmem:[%s3487_s11 + $0xb8] sm:$0xff] }
 0x199   : > { %1107 = vperm.xlu0 %2936, %v1008_v2   ;;  %v1017_v2 = vld [vmem:[%s3487_s11 + $0xc8] sm:$0xff] }
 0x19a   : > { %1112 = vperm.xlu1 %2937, %v1009_v40   ;;  %v1023_v40 = vld [vmem:[%s3487_s11 + $0xf8] sm:$0xff] }
 0x19d   : > { %1117 = vperm.xlu0 %2936, %v1010_v8  }
 0x19e   : > { %1122 = vperm.xlu1 %2937, %v1011_v22   ;;  %v1018_v22 = vld [vmem:[%s3487_s11 + $0xd0] sm:$0xff] }
 0x1a1   : > { %1127 = vperm.xlu0 %2936, %v1012_v37  }
 0x1a2   : > { %1132 = vperm.xlu1 %2937, %v1013_v6   ;;  %v1019_v6 = vld [vmem:[%s3487_s11 + $0xd8] sm:$0xff] }
 0x1a5   : > { %1137 = vperm.xlu0 %2936, %v1014_v0  }
 0x1a6   : > { %1147 = vperm.xlu1 %2937, %v1016_v60  }
 0x1a9   : > { %1142 = vperm.xlu0 %2936, %v1015_v24   ;;  %v1022_v24 = vld [vmem:[%s3487_s11 + $0xf0] sm:$0xff] }
 0x1aa   : > { %1172 = vperm.xlu1 %2937, %v1021_v19  }
 0x1ac   : > { %v834_v8 = vpop.xlane.xlu0 %833 }
 0x1ad   : > { %1152 = vperm.xlu0 %2936, %v1017_v2  }
 0x1ae   : > { %1182 = vperm.xlu1 %2937, %v1023_v40   ;;  %v3901_v28 = vpop.xlane.xlu1 %884 }
 0x1af   : > { %7348 = vst [vmem:[#allocation45_spill] sm:$0xff] %v3901_v28  ;;  %v3955_v28 = vshrl.u32 %v7360_v38, 7  ;;  %v3974_v38 = vsub.f32 %v3562_v34, %v834_v8 }
 0x1b0   : > { %v3903_v37 = vpop.xlane.xlu0 %881 }
 0x1b1   : > { %1157 = vperm.xlu0 %2936, %v1018_v22   ;;  %7361 = vst [vmem:[#allocation57_spill] sm:$0xff] %v3955_v28  ;;  %v1188_v13 = vsub.s32 0, %v3955_v28  ;;  %7366 = vst [vmem:[#allocation62_spill] sm:$0xff] %v3974_v38 }
 0x1b4   : > { %v837_v0 = vpop.xlane.xlu0 %836  ;;  %v840_v60 = vpop.xlane.xlu1 %839 }
 0x1b5   : > { %1162 = vperm.xlu0 %2936, %v1019_v6   ;;  %v3958_v25 = vsub.f32 %v3584_v45, %v837_v0  ;;  %v3961_v14 = vsub.f32 %v3588_v46, %v837_v0  ;;  %v1192_v46 = vsub.s32 1, %v3955_v28  ;;  %v3991_v34 = vsub.f32 %v3592_v49, %v840_v60 }
 0x1b7   : > { %7362 = vst [vmem:[#allocation58_spill] sm:$0xff] %v3958_v25  ;;  %v1586_v45 = vmul.f32 1.442695, %v3961_v14  ;;  %7367 = vst [vmem:[#allocation63_spill] sm:$0xff] %v3991_v34 }
 0x1b8   : > { %v3907_v58 = vpop.xlane.xlu0 %887  ;;  %v3909_v19 = vpop.xlane.xlu1 %842 }
 0x1b9   : > { %1167 = vperm.xlu0 %2936, %v1020_v15  }
 0x1bc   : > { %v3912_v12 = vpop.xlane.xlu1 %890  ;;  %v846_v2 = vpop.xlane.xlu0 %845 }
 0x1bd   : > { %7349 = vst [vmem:[#allocation46_spill] sm:$0xff] %v3912_v12  ;;  %1177 = vperm.xlu0 %2936, %v1022_v24  }
 0x1c0   : > { %v3914_v40 = vpop.xlane.xlu0 %893  ;;  %v3916_v39 = vpop.xlane.xlu1 %848 }
 0x1c1   : > { %7350 = vst [vmem:[#allocation47_spill] sm:$0xff] %v3914_v40 }
 0x1c4   : > { %v3918_v22 = vpop.xlane.xlu0 %851  ;;  %v3920_v44 = vpop.xlane.xlu1 %896 }
 0x1c5   : > { %7351 = vst [vmem:[#allocation48_spill] sm:$0xff] %v3920_v44 }
 0x1c8   : > { %v3922_v6 = vpop.xlane.xlu0 %899  ;;  %v3924_v50 = vpop.xlane.xlu1 %854 }
 0x1c9   : > { %7352 = vst [vmem:[#allocation49_spill] sm:$0xff] %v3922_v6 }
 0x1cc   : > { %v3926_v43 = vpop.xlane.xlu0 %857  ;;  %v3928_v15 = vpop.xlane.xlu1 %902 }
 0x1cd   : > { %7353 = vst [vmem:[#allocation50_spill] sm:$0xff] %v3928_v15 }
 0x1d0   : > { %v3930_v20 = vpop.xlane.xlu0 %905  ;;  %v3932_v1 = vpop.xlane.xlu1 %860 }
 0x1d1   : > { %7354 = vst [vmem:[#allocation51_spill] sm:$0xff] %v3930_v20 }
 0x1d4   : > { %v3934_v24 = vpop.xlane.xlu0 %863 }
 0x1d6   : > { %v3936_v59 = vpop.xlane.xlu1 %866 }
 0x1dc   : > { %v3938_v12 = vpop.xlane.xlu0 %869 }
 0x1de   : > { %v3940_v44 = vpop.xlane.xlu1 %872 }
 0x1e4   : > { %v3942_v6 = vpop.xlane.xlu0 %875 }
 0x1e6   : > { %v3944_v7 = vpop.xlane.xlu1 %878 }
 0x1e7   : > { %7355 = vst [vmem:[#allocation52_spill] sm:$0xff] %v3944_v7 }
 0x1e8   : > { %v3946_v40 = vpop.xlane.xlu0 %911 }
 0x1e9   : > { %7356 = vst [vmem:[#allocation53_spill] sm:$0xff] %v3946_v40  ;;  %v1584_v40 = vmul.f32 1.442695, %v3958_v25 }
 0x1ea   : > { %v3948_v15 = vpop.xlane.xlu1 %908 }
 0x1eb   : > { %7357 = vst [vmem:[#allocation54_spill] sm:$0xff] %v3948_v15  ;;  %v1024_v15 = vld [vmem:[%s3492_s10] sm:$0x3]  ;;  %2960 = vpow2.f32 %v1584_v40  ;;  %v1588_v40 = vmul.f32 1.442695, %v3991_v34  ;;  %v4096_v34 = vsub.f32 %v3682_v41, %v3918_v22 }
 0x1ec   : > { %v3950_v20 = vpop.xlane.xlu0 %917  ;;  %v3978_v0 = vrot.slane %v1024_v15, %v1188_v13  ;;  %2962 = vpow2.f32 %v1586_v45  ;;  %v3994_v13 = vsub.f32 %v3600_v53, %v840_v60  ;;  %v4025_v45 = vsub.f32 %v3642_v10, %v846_v2 }
 0x1ed   : > { %7358 = vst [vmem:[#allocation55_spill] sm:$0xff] %v3950_v20  ;;  %v3969_v20 = vsub.f32 %v3554_v30, %v834_v8  ;;  %v1582_v30 = vmul.f32 1.442695, %v3974_v38  ;;  %7377 = vst [vmem:[#allocation73_spill] sm:$0xff] %v4096_v34 }
 0x1ee   : > { %v3952_v42 = vpop.xlane.xlu1 %914  ;;  %7368 = vst [vmem:[#allocation64_spill] sm:$0xff] %v3994_v13  ;;  %v1590_v49 = vmul.f32 1.442695, %v3994_v13  ;;  %7371 = vst [vmem:[#allocation67_spill] sm:$0xff] %v4025_v45 }
 0x1ef   : > { %7359 = vst [vmem:[#allocation56_spill] sm:$0xff] %v3952_v42  ;;  %7364 = vst [vmem:[#allocation60_spill] sm:$0xff] %v3969_v20 }
 0x1f0   : > { %v3971_v42 = vpop.xlane.xlu0 %923 }
 0x1f1   : > { %7365 = vst [vmem:[#allocation61_spill] sm:$0xff] %v3971_v42  ;;  %v3986_v42 = vrot.slane %v1024_v15, %v1192_v46 }
 0x1f2   : > { %v3963_v55 = vpop.xlane.xlu1 %920 }
 0x1f3   : > { %7363 = vst [vmem:[#allocation59_spill] sm:$0xff] %v3963_v55  ;;  %v1580_v55 = vmul.f32 1.442695, %v3969_v20 }
 0x1f5   : > { %2964 = vpow2.f32 %v1580_v55  ;;  %v4012_v53 = vpop.eup %2960  ;;  %v4017_v55 = vsub.f32 %v3632_v5, %v846_v2 }
 0x1f6   : > { %v3981_v7 = vpop.xlane.xlu1 %926  ;;  %2966 = vpow2.f32 %v1582_v30  ;;  %v4022_v15 = vpop.eup %2962 }
 0x1f7   : > { %7370 = vst [vmem:[#allocation66_spill] sm:$0xff] %v4017_v55  ;;  %2968 = vpow2.f32 %v1588_v40  ;;  %v1596_v2 = vmul.f32 1.442695, %v4017_v55  ;;  %v4056_v55 = vsub.f32 %v3612_v61, %v3909_v19 }
 0x1f8   : > { %v3983_v25 = vpop.permute.xlu0 %1032  ;;  %2970 = vpow2.f32 %v1590_v49  ;;  %v1598_v49 = vmul.f32 1.442695, %v4025_v45 }
 0x1f9   : > { %vm1198_vm3 = vcmp.eq.f32.partialorder %v3983_v25, %v3978_v0  ;;  %vm1199_vm4 = vcmp.eq.f32.partialorder %v3983_v25, %v3986_v42  ;;  %2972 = vpow2.f32 %v1596_v2 }
 0x1fa   : > { %vm1454_vm6 = vmxor %vm1198_vm3, %vm7100_vm5  ;;  %v4002_v8 = vpop.permute.xlu1 %1027  ;;  %2974 = vpow2.f32 %v1598_v49 }
 0x1fb   : > { %7369 = vst [vmem:[#allocation65_spill] sm:$0xff] %v4002_v8  ;;  %vm1518_vm7 = vmand %vm1454_vm6, %vm3542_vm1  ;;  %vm7062_vm9 = vcmp.eq.f32.partialorder %v4002_v8, %v3978_v0  ;;  %vm7061_vm10 = vcmp.eq.f32.partialorder %v4002_v8, %v3986_v42 }
 0x1fc   : > { %vm1455_vm8 = vmxor %vm1199_vm4, %vm7100_vm5  ;;  %v1710_v60 = vsel %vm1518_vm7, %v4012_v53, 0.0  ;;  %v4034_v5 = vpop.permute.xlu0 %1037 }
 0x1fd   : > { %vm1519_vm11 = vmand %vm1455_vm8, %vm3548_vm2  ;;  %7372 = vst [vmem:[#allocation68_spill] sm:$0xff] %v4034_v5  ;;  %vm7058_vm0 = vcmp.eq.f32.partialorder %v4034_v5, %v3978_v0  ;;  %vm7053_vm6 = vcmp.eq.f32.partialorder %v4034_v5, %v3986_v42  ;;  %v7449_v5 = vmov 0 }
 0x1fe   : > { %v1711_v46 = vsel %vm1519_vm11, %v4022_v15, 0.0  ;;  %vm1452_vm12 = vmxor %vm7062_vm9, %vm7100_vm5  ;;  %v4102_v38 = vpop.permute.xlu1 %1042 }
 0x1ff   : > { %v1775_v30 = vadd.f32 %v1711_v46, %v1710_v60  ;;  %vm1453_vm13 = vmxor %vm7061_vm10, %vm7100_vm5  ;;  %v4040_v10 = vpop.eup %2964 }
 0x200   : > { %vm1516_vm14 = vmand %vm1452_vm12, %vm3542_vm1  ;;  %v4045_v40 = vpop.eup %2966  ;;  %v4068_v45 = vpop.permute.xlu0 %1047 }
 0x201   : > { %1776 = vadd.xlane.f32.xlu1 %v1775_v30  ;;  %vm1517_vm15 = vmand %vm1453_vm13, %vm3548_vm2  ;;  %v1708_v60 = vsel %vm1516_vm14, %v4040_v10, 0.0  ;;  %v4062_v30 = vsub.f32 %v3616_v62, %v3909_v19  ;;  %7373 = vst [vmem:[#allocation69_spill] sm:$0xff] %v4068_v45  ;;  %v4074_v61 = vpop.eup %2968  ;;  %v1592_v62 = vmul.f32 1.442695, %v4056_v55  ;;  %vm7048_vm13 = vcmp.eq.f32.partialorder %v4068_v45, %v3978_v0 }
 0x202   : > { %v1709_v46 = vsel %vm1517_vm15, %v4045_v40, 0.0  ;;  %vm1456_vm7 = vmxor %vm7058_vm0, %vm7100_vm5  ;;  %7374 = vst [vmem:[#allocation70_spill] sm:$0xff] %v4074_v61  ;;  %v4079_v19 = vpop.eup %2970  ;;  %vm7047_vm14 = vcmp.eq.f32.partialorder %v4068_v45, %v3986_v42  ;;  %v4164_v45 = vsub.f32 %v3722_v11, %v3926_v43  ;;  %v4170_v20 = vpop.permute.xlu1 %1052 }
 0x203   : > { %v1772_v13 = vadd.f32 %v1709_v46, %v1708_v60  ;;  %vm1457_vm8 = vmxor %vm7053_vm6, %vm7100_vm5  ;;  %7375 = vst [vmem:[#allocation71_spill] sm:$0xff] %v4079_v19  ;;  %v4090_v60 = vsub.f32 %v3672_v33, %v3918_v22  ;;  %2976 = vpow2.f32 %v1592_v62  ;;  %v4108_v33 = vpop.eup %2972  ;;  %v1606_v22 = vmul.f32 1.442695, %v4096_v34 }
 0x204   : > { %vm1520_vm11 = vmand %vm1456_vm7, %vm3542_vm1  ;;  %7378 = vst [vmem:[#allocation74_spill] sm:$0xff] %v4108_v33  ;;  %v4113_v41 = vpop.eup %2974  ;;  %v4136_v34 = vpop.permute.xlu0 %1057  ;;  %vm1206_vm6 = vcmp.eq.f32.partialorder %v4170_v20, %v3978_v0 }
 0x205   : > { %1773 = vadd.xlane.f32.xlu0 %v1772_v13  ;;  %v1594_v13 = vmul.f32 1.442695, %v4062_v30  ;;  %vm1521_vm12 = vmand %vm1457_vm8, %vm3548_vm2  ;;  %v1712_v2 = vsel %vm1520_vm11, %v4074_v61, 0.0  ;;  %7376 = vst [vmem:[#allocation72_spill] sm:$0xff] %v4090_v60  ;;  %v1604_v62 = vmul.f32 1.442695, %v4090_v60  ;;  %v4130_v60 = vsub.f32 %v3656_v18, %v3916_v39 }
 0x206   : > { %v1713_v49 = vsel %vm1521_vm12, %v4079_v19, 0.0  ;;  %vm1460_vm15 = vmxor %vm7048_vm13, %vm7100_vm5  ;;  %7379 = vst [vmem:[#allocation75_spill] sm:$0xff] %v4113_v41  ;;  %vm1202_vm12 = vcmp.eq.f32.partialorder %v4102_v38, %v3978_v0  ;;  %vm7052_vm13 = vcmp.eq.f32.partialorder %v4136_v34, %v3978_v0  ;;  %v7567_v61 = vmov 0 }
 0x207   : > { %v1778_v46 = vadd.f32 %v1713_v49, %v1712_v2  ;;  %2978 = vpow2.f32 %v1594_v13  ;;  %vm1461_vm7 = vmxor %vm7047_vm14, %vm7100_vm5  ;;  %v4124_v49 = vsub.f32 %v3652_v17, %v3916_v39  ;;  %7381 = vst [vmem:[#allocation77_spill] sm:$0xff] %v4130_v60 }
 0x208   : > { %vm1524_vm8 = vmand %vm1460_vm15, %vm3542_vm1  ;;  %vm1203_vm15 = vcmp.eq.f32.partialorder %v4102_v38, %v3986_v42  ;;  %2980 = vpow2.f32 %v1604_v62  ;;  %7382 = vst [vmem:[#allocation78_spill] sm:$0xff] %v4136_v34  ;;  %v1602_v62 = vmul.f32 1.442695, %v4130_v60  ;;  %v7470_v60 = vmov 0 }
 0x209   : > { %1779 = vadd.xlane.f32.xlu0 %v1778_v46  ;;  %vm1525_vm11 = vmand %vm1461_vm7, %vm3548_vm2  ;;  %v1716_v13 = vsel %vm1524_vm8, %v4108_v33, 0.0  ;;  %7380 = vst [vmem:[#allocation76_spill] sm:$0xff] %v4124_v49  ;;  %2982 = vpow2.f32 %v1606_v22  ;;  %v1600_v18 = vmul.f32 1.442695, %v4124_v49  ;;  %v4616_v33 = vadd.s32 88, %v3955_v28  ;;  %v7530_v49 = vld [vmem:[#allocation29_spill] sm:$0xff] }
 0x20a   : > { %v1717_v2 = vsel %vm1525_vm11, %v4113_v41, 0.0  ;;  %vm1458_vm7 = vmxor %vm1202_vm12, %vm7100_vm5  ;;  %7384 = vst [vmem:[#allocation80_spill] sm:$0xff] %v4164_v45  ;;  %v4491_v41 = vsub.f32 %v3558_v31, %v3903_v37  ;;  %v4512_v31 = vadd.s32 72, %v3955_v28 }
 0x20b   : > { %v1784_v46 = vadd.f32 %v1717_v2, %v1716_v13  ;;  %vm1459_vm8 = vmxor %vm1203_vm15, %vm7100_vm5  ;;  %v4158_v2 = vsub.f32 %v3712_v3, %v3926_v43  ;;  %2984 = vpow2.f32 %v1600_v18  ;;  %v1614_v43 = vmul.f32 1.442695, %v4164_v45  ;;  %7466 = vst [vmem:[#allocation119_spill] sm:$0xff] %v4616_v33 }
 0x20c   : > { %vm1522_vm11 = vmand %vm1458_vm7, %vm3542_vm1  ;;  %vm7057_vm7 = vcmp.eq.f32.partialorder %v4136_v34, %v3986_v42  ;;  %2986 = vpow2.f32 %v1602_v62  ;;  %v4198_v34 = vsub.f32 %v3696_v56, %v3924_v50  ;;  %7430 = vst [vmem:[#allocation108_spill] sm:$0xff] %v4491_v41 }
 0x20d   : > { %1785 = vadd.xlane.f32.xlu1 %v1784_v46  ;;  %v4142_v17 = vpop.eup %2976  ;;  %vm1523_vm14 = vmand %vm1459_vm8, %vm3548_vm2  ;;  %7383 = vst [vmem:[#allocation79_spill] sm:$0xff] %v4158_v2  ;;  %v1612_v18 = vmul.f32 1.442695, %v4158_v2 }
 0x20e   : > { %v1714_v22 = vsel %vm1522_vm11, %v4142_v17, 0.0  ;;  %vm1465_vm8 = vmxor %vm7057_vm7, %vm7100_vm5  ;;  %7388 = vst [vmem:[#allocation84_spill] sm:$0xff] %v4198_v34 }
 0x20f   : > { %2988 = vpow2.f32 %v1612_v18  ;;  %v1610_v18 = vmul.f32 1.442695, %v4198_v34  ;;  %v4232_v34 = vsub.f32 %v3748_v52, %v3934_v24  ;;  %7437 = vst [vmem:[#allocation110_spill] sm:$0xff] %v4512_v31 }
 0x210   : > { %2990 = vpow2.f32 %v1614_v43 }
 0x211   : > { %v4147_v39 = vpop.eup %2978  ;;  %7390 = vst [vmem:[#allocation86_spill] sm:$0xff] %v4232_v34 }
 0x212   : > { %v1715_v13 = vsel %vm1523_vm14, %v4147_v39, 0.0  ;;  %vm1464_vm14 = vmxor %vm7052_vm13, %vm7100_vm5  ;;  %v4176_v3 = vpop.eup %2980 }
 0x213   : > { %v1781_v46 = vadd.f32 %v1715_v13, %v1714_v22  ;;  %7385 = vst [vmem:[#allocation81_spill] sm:$0xff] %v4176_v3  ;;  %vm1528_vm11 = vmand %vm1464_vm14, %vm3542_vm1  ;;  %v4181_v11 = vpop.eup %2982  ;;  %v4192_v13 = vsub.f32 %v3692_v54, %v3924_v50  ;;  %vm1207_vm14 = vcmp.eq.f32.partialorder %v4170_v20, %v3986_v42 }
 0x214   : > { %7386 = vst [vmem:[#allocation82_spill] sm:$0xff] %v4181_v11  ;;  %vm1529_vm13 = vmand %vm1465_vm8, %vm3548_vm2  ;;  %v1720_v62 = vsel %vm1528_vm11, %v4176_v3, 0.0 }
 0x215   : > { %1782 = vadd.xlane.f32.xlu0 %v1781_v46  ;;  %v1721_v22 = vsel %vm1529_vm13, %v4181_v11, 0.0  ;;  %7387 = vst [vmem:[#allocation83_spill] sm:$0xff] %v4192_v13  ;;  %vm1462_vm13 = vmxor %vm1206_vm6, %vm7100_vm5  ;;  %v4204_v11 = vpop.permute.xlu0 %1067  ;;  %v4210_v54 = vpop.eup %2984  ;;  %v1608_v56 = vmul.f32 1.442695, %v4192_v13 }
 0x216   : > { %v1790_v46 = vadd.f32 %v1721_v22, %v1720_v62  ;;  %vm1463_vm8 = vmxor %vm1207_vm14, %vm7100_vm5  ;;  %v4215_v50 = vpop.eup %2986  ;;  %vm7066_vm0 = vcmp.eq.f32.partialorder %v4204_v11, %v3978_v0  ;;  %v4226_v22 = vsub.f32 %v3744_v47, %v3934_v24  ;;  %v4238_v13 = vpop.permute.xlu1 %1062  ;;  %v1622_v24 = vmul.f32 1.442695, %v4232_v34 }
 0x217   : > { %vm1526_vm11 = vmand %vm1462_vm13, %vm3542_vm1  ;;  %vm7065_vm13 = vcmp.eq.f32.partialorder %v4204_v11, %v3986_v42  ;;  %2992 = vpow2.f32 %v1608_v56  ;;  %vm1210_vm9 = vcmp.eq.f32.partialorder %v4238_v13, %v3978_v0  ;;  %v4266_v34 = vsub.f32 %v3736_v32, %v3932_v1 }
 0x218   : > { %1791 = vadd.xlane.f32.xlu1 %v1790_v46  ;;  %vm1527_vm7 = vmand %vm1463_vm8, %vm3548_vm2  ;;  %v1718_v43 = vsel %vm1526_vm11, %v4210_v54, 0.0  ;;  %7389 = vst [vmem:[#allocation85_spill] sm:$0xff] %v4226_v22  ;;  %2994 = vpow2.f32 %v1610_v18  ;;  %v1620_v56 = vmul.f32 1.442695, %v4226_v22 }
 0x219   : > { %v1719_v62 = vsel %vm1527_vm7, %v4215_v50, 0.0  ;;  %vm1468_vm7 = vmxor %vm7066_vm0, %vm7100_vm5  ;;  %v4244_v47 = vpop.eup %2988  ;;  %7392 = vst [vmem:[#allocation88_spill] sm:$0xff] %v4266_v34  ;;  %v4272_v22 = vpop.permute.xlu0 %1077 }
 0x21a   : > { %v1787_v46 = vadd.f32 %v1719_v62, %v1718_v43  ;;  %vm1469_vm8 = vmxor %vm7065_vm13, %vm7100_vm5  ;;  %v4249_v52 = vpop.eup %2990  ;;  %v4260_v62 = vsub.f32 %v3732_v29, %v3932_v1  ;;  %2996 = vpow2.f32 %v1620_v56  ;;  %v1618_v56 = vmul.f32 1.442695, %v4266_v34 }
 0x21b   : > { %vm1532_vm11 = vmand %vm1468_vm7, %vm3542_vm1  ;;  %vm7069_vm7 = vcmp.eq.f32.partialorder %v4238_v13, %v3986_v42  ;;  %2998 = vpow2.f32 %v1622_v24  ;;  %vm7074_vm0 = vcmp.eq.f32.partialorder %v4272_v22, %v3978_v0  ;;  %v4300_v34 = vsub.f32 %v3768_v48, %v3938_v12 }
 0x21c   : > { %1788 = vadd.xlane.f32.xlu0 %v1787_v46  ;;  %vm1533_vm10 = vmand %vm1469_vm8, %vm3548_vm2  ;;  %v1724_v18 = vsel %vm1532_vm11, %v4244_v47, 0.0  ;;  %7391 = vst [vmem:[#allocation87_spill] sm:$0xff] %v4260_v62  ;;  %v1616_v1 = vmul.f32 1.442695, %v4260_v62  ;;  %v4306_v62 = vpop.permute.xlu1 %1072 }
 0x21d   : > { %v1725_v43 = vsel %vm1533_vm10, %v4249_v52, 0.0  ;;  %vm1466_vm10 = vmxor %vm1210_vm9, %vm7100_vm5  ;;  %7396 = vst [vmem:[#allocation92_spill] sm:$0xff] %v4300_v34  ;;  %v1630_v48 = vmul.f32 1.442695, %v4300_v34 }
 0x21e   : > { %v1796_v46 = vadd.f32 %v1725_v43, %v1724_v18  ;;  %vm1467_vm8 = vmxor %vm7069_vm7, %vm7100_vm5  ;;  %v4294_v43 = vsub.f32 %v3764_v36, %v3938_v12  ;;  %3000 = vpow2.f32 %v1616_v1 }
 0x21f   : > { %vm1530_vm11 = vmand %vm1466_vm10, %vm3542_vm1  ;;  %vm7070_vm10 = vcmp.eq.f32.partialorder %v4272_v22, %v3986_v42  ;;  %3002 = vpow2.f32 %v1618_v56 }
 0x220   : > { %1797 = vadd.xlane.f32.xlu1 %v1796_v46  ;;  %vm1531_vm13 = vmand %vm1467_vm8, %vm3548_vm2  ;;  %7395 = vst [vmem:[#allocation91_spill] sm:$0xff] %v4294_v43  ;;  %v1628_v1 = vmul.f32 1.442695, %v4294_v43  ;;  %v4337_v43 = vsub.f32 %v3758_v9, %v3936_v59  ;;  %v4357_v9 = vpop.permute.xlu0 %1087 }
 0x221   : > { %v4278_v29 = vpop.eup %2992  ;;  %vm1473_vm8 = vmxor %vm7070_vm10, %vm7100_vm5  ;;  %vm7075_vm10 = vcmp.eq.f32.partialorder %v4306_v62, %v3978_v0 }
 0x222   : > { %7393 = vst [vmem:[#allocation89_spill] sm:$0xff] %v4278_v29  ;;  %v4283_v32 = vpop.eup %2994  ;;  %v1722_v24 = vsel %vm1530_vm11, %v4278_v29, 0.0  ;;  %vm1537_vm7 = vmand %vm1473_vm8, %vm3548_vm2  ;;  %3004 = vpow2.f32 %v1628_v1 }
 0x223   : > { %7394 = vst [vmem:[#allocation90_spill] sm:$0xff] %v4283_v32  ;;  %v1723_v18 = vsel %vm1531_vm13, %v4283_v32, 0.0  ;;  %vm1472_vm13 = vmxor %vm7074_vm0, %vm7100_vm5  ;;  %3006 = vpow2.f32 %v1630_v48  ;;  %v1626_v48 = vmul.f32 1.442695, %v4337_v43 }
 0x224   : > { %v1793_v46 = vadd.f32 %v1723_v18, %v1722_v24  ;;  %v4312_v36 = vpop.eup %2996  ;;  %vm1536_vm11 = vmand %vm1472_vm13, %vm3542_vm1  ;;  %v4324_v24 = vadd.s32 8, %v3955_v28  ;;  %vm7076_vm13 = vcmp.eq.f32.partialorder %v4306_v62, %v3986_v42  ;;  %7401 = vst [vmem:[#allocation97_spill] sm:$0xff] %v4337_v43  ;;  %v4400_v43 = vpop.permute.xlu1 %1082 }
 0x225   : > { %7397 = vst [vmem:[#allocation93_spill] sm:$0xff] %v4312_v36  ;;  %v4317_v12 = vpop.eup %2998  ;;  %v1728_v56 = vsel %vm1536_vm11, %v4312_v36, 0.0  ;;  %vm4344_vm8 = vmand %vm1198_vm3, %vm3542_vm1  ;;  %v4550_v36 = vsub.f32 %v3778_v16, %v3940_v44  ;;  %v1644_v16 = vmul.f32 1.442695, %v4491_v41  ;;  %v7463_v41 = vmov 0 }
 0x226   : > { %1794 = vadd.xlane.f32.xlu0 %v1793_v46  ;;  %7398 = vst [vmem:[#allocation94_spill] sm:$0xff] %v4317_v12  ;;  %7399 = vst [vmem:[#allocation95_spill] sm:$0xff] %v4324_v24  ;;  %v1729_v18 = vsel %vm1537_vm7, %v4317_v12, 0.0  ;;  %v4331_v46 = vsub.f32 %v3752_v63, %v3936_v59  ;;  %v4349_v63 = vadd.s32 24, %v3955_v28  ;;  %vm1326_vm11 = vcmp.ne.s32.totalorder %v3532_v23, %v4324_v24 }
 0x227   : > { %v1802_v34 = vadd.f32 %v1729_v18, %v1728_v56  ;;  %vm1470_vm7 = vmxor %vm7075_vm10, %vm7100_vm5  ;;  %v7407_v18 = vmov 0  ;;  %v7409_v24 = vmov 0  ;;  %v7439_v12 = vmov 0  ;;  %7447 = vst [vmem:[#allocation115_spill] sm:$0xff] %v4550_v36 }
 0x228   : > { %7400 = vst [vmem:[#allocation96_spill] sm:$0xff] %v4331_v46  ;;  %7404 = vst [vmem:[#allocation98_spill] sm:$0xff] %v4349_v63  ;;  %v4363_v59 = vpop.eup %3000  ;;  %v1624_v1 = vmul.f32 1.442695, %v4331_v46  ;;  %v4407_v46 = vsub.f32 %v3784_v57, %v3942_v6  ;;  %v4425_v57 = vsub.f32 %v3788_v21, %v3942_v6  ;;  %v7422_v21 = vmov 0 }
 0x229   : > { %1803 = vadd.xlane.f32.xlu1 %v1802_v34  ;;  %vm1471_vm3 = vmxor %vm7076_vm13, %vm7100_vm5  ;;  %7405 = vst [vmem:[#allocation99_spill] sm:$0xff] %v4363_v59  ;;  %v4368_v34 = vpop.eup %3002  ;;  %v1634_v8 = vmul.f32 1.442695, %v4550_v36 }
 0x22a   : > { %vm1534_vm0 = vmand %vm1470_vm7, %vm3542_vm1  ;;  %7406 = vst [vmem:[#allocation100_spill] sm:$0xff] %v4368_v34  ;;  %3008 = vpow2.f32 %v1624_v1  ;;  %v7420_v1 = vmov 0  ;;  %v1638_v25 = vmul.f32 1.442695, %v4425_v57 }
 0x22b   : > { %vm1535_vm10 = vmand %vm1471_vm3, %vm3548_vm2  ;;  %v1726_v56 = vsel %vm1534_vm0, %v4363_v59, 0.0  ;;  %vm1330_vm3 = vcmp.ne.s32.totalorder %v3532_v23, %v4349_v63  ;;  %7413 = vst [vmem:[#allocation101_spill] sm:$0xff] %v4407_v46  ;;  %v4410_v59 = vadd.s32 40, %v3955_v28  ;;  %3010 = vpow2.f32 %v1626_v48  ;;  %v4482_v63 = vpop.permute.xlu1 %1092 }
 0x22c   : > { %vm4379_vm13 = vmand %vm1199_vm4, %vm3548_vm2  ;;  %vm7084_vm4 = vcmp.eq.f32.partialorder %v4357_v9, %v3978_v0  ;;  %v1727_v3 = vsel %vm1535_vm10, %v4368_v34, 0.0  ;;  %7417 = vst [vmem:[#allocation103_spill] sm:$0xff] %v4425_v57  ;;  %v4466_v38 = vpop.eup %3004  ;;  %v4472_v48 = vadd.s32 56, %v3955_v28  ;;  %v7431_v57 = vmov 0 }
 0x22d   : > { %v7408_v18 = vsel %vm4379_vm13, 4294967295, %v7407_v18  ;;  %vm4385_vm7 = vmand %vm4344_vm8, %vm1326_vm11  ;;  %7414 = vst [vmem:[#allocation102_spill] sm:$0xff] %v4410_v59  ;;  %vm7089_vm8 = vcmp.eq.f32.partialorder %v4357_v9, %v3986_v42  ;;  %v1799_v34 = vadd.f32 %v1727_v3, %v1726_v56  ;;  %v4476_v56 = vpop.eup %3006  ;;  %v4480_v3 = vadd.s32 64, %v3955_v28 }
 0x22e   : > { %v7410_v24 = vsel %vm4385_vm7, 4294967295, %v7409_v24  ;;  %vm4396_vm0 = vmand %vm1202_vm12, %vm3542_vm1  ;;  %7426 = vst [vmem:[#allocation104_spill] sm:$0xff] %v4466_v38 }
 0x22f   : > { %vm4417_vm12 = vmand %vm1206_vm6, %vm3542_vm1  ;;  %1800 = vadd.xlane.f32.xlu0 %v1799_v34  ;;  %v1636_v34 = vmul.f32 1.442695, %v4407_v46  ;;  %7427 = vst [vmem:[#allocation105_spill] sm:$0xff] %v4472_v48 }
 0x230   : > { %vm4432_vm10 = vmand %vm1210_vm9, %vm3542_vm1  ;;  %7428 = vst [vmem:[#allocation106_spill] sm:$0xff] %v4476_v56 }
 0x231   : > { %vm4441_vm6 = vmand %vm1203_vm15, %vm3548_vm2  ;;  %7429 = vst [vmem:[#allocation107_spill] sm:$0xff] %v4480_v3  ;;  %3012 = vpow2.f32 %v1636_v34  ;;  %v7103_v34 = vmov 0.0  }
 0x232   : > { %v7421_v1 = vsel %vm4441_vm6, 4294967295, %v7420_v1  ;;  %vm1476_vm11 = vmxor %vm7084_vm4, %vm7100_vm5  ;;  %vm1334_vm4 = vcmp.ne.s32.totalorder %v3532_v23, %v4410_v59  ;;  %v4546_v59 = vsub.f32 %v3566_v35, %v3903_v37  ;;  %3014 = vpow2.f32 %v1638_v25  ;;  %v4585_v37 = vpop.permute.xlu0 %1097 }
 0x233   : > { %vm4454_vm9 = vmand %vm4396_vm0, %vm1330_vm3  ;;  %v2127_v25 = vsel %vm4379_vm13, 1.0, %v7103_v34  ;;  %vm7473_vm13 = vcmp.ne.s32.totalorder %v3532_v23, %v4480_v3  ;;  %3016 = vpow2.f32 %v1644_v16 }
 0x234   : > { %v7423_v21 = vsel %vm4454_vm9, 4294967295, %v7422_v21  ;;  %vm4462_vm15 = vmxor %vm7089_vm8, %vm7100_vm5  ;;  %7446 = vst [vmem:[#allocation114_spill] sm:$0xff] %v4546_v59 }
 0x235   : > { %vm1540_vm3 = vmand %vm1476_vm11, %vm3542_vm1 }
 0x236   : > { %vm1541_vm0 = vmand %vm4462_vm15, %vm3548_vm2  ;;  %v1732_v46 = vsel %vm1540_vm3, %v4466_v38, 0.0  ;;  %vm7434_vm15 = vcmp.eq.f32.partialorder %v4204_v11, %v3978_v0  ;;  %v4519_v38 = vsub.f32 %v3772_v4, %v3940_v44  ;;  %v4540_v4 = vadd.s32 80, %v3955_v28 }
 0x237   : > { %vm4498_vm11 = vmand %vm1207_vm14, %vm3548_vm2  ;;  %v1733_v20 = vsel %vm1541_vm0, %v4476_v56, 0.0  ;;  %v7455_v44 = vmov 0  ;;  %v7498_v56 = vmov 0 }
 0x238   : > { %v7432_v57 = vsel %vm4498_vm11, 4294967295, %v7431_v57  ;;  %vm4507_vm8 = vmand %vm7434_vm15, %vm3542_vm1  ;;  %7438 = vst [vmem:[#allocation111_spill] sm:$0xff] %v4519_v38  ;;  %vm7442_vm15 = vcmp.eq.f32.partialorder %v4306_v62, %v3978_v0  ;;  %v1808_v45 = vadd.f32 %v1733_v20, %v1732_v46  ;;  %v4601_v20 = vpop.eup %3008  ;;  %v4665_v46 = vadd.s32 96, %v3955_v28 }
 0x239   : > { %7433 = vst [vmem:[#allocation109_spill] sm:$0xff] %v7432_v57  ;;  %vm4526_vm14 = vmand %vm4417_vm12, %vm1334_vm4  ;;  %vm7448_vm12 = vcmp.eq.f32.partialorder %v4272_v22, %v3978_v0  ;;  %v4626_v2 = vpop.eup %3010 }
 0x23a   : > { %v7440_v12 = vsel %vm4526_vm14, 4294967295, %v7439_v12  ;;  %vm4535_vm3 = vmand %vm7442_vm15, %vm3542_vm1  ;;  %7445 = vst [vmem:[#allocation113_spill] sm:$0xff] %v4540_v4  ;;  %1809 = vadd.xlane.f32.xlu1 %v1808_v45  ;;  %vm7451_vm14 = vcmp.eq.f32.partialorder %v4400_v43, %v3978_v0  ;;  %v1632_v45 = vmul.f32 1.442695, %v4519_v38  ;;  %v1646_v38 = vmul.f32 1.442695, %v4546_v59 }
 0x23b   : > { %7441 = vst [vmem:[#allocation112_spill] sm:$0xff] %v7440_v12  ;;  %vm4559_vm15 = vmand %vm7448_vm12, %vm3542_vm1  ;;  %vm7454_vm12 = vcmp.eq.f32.partialorder %v4238_v13, %v3986_v42  ;;  %v2126_v13 = vsel %vm4385_vm7, 1.0, %v7103_v34  ;;  %v4618_v34 = vpop.permute.xlu1 %1102  ;;  %v7483_v59 = vmov 0 }
 0x23c   : > { %v7450_v5 = vsel %vm4559_vm15, 4294967295, %v7449_v5  ;;  %vm4569_vm11 = vmxor %vm7451_vm14, %vm7100_vm5  ;;  %vm7458_vm14 = vcmp.eq.f32.partialorder %v4400_v43, %v3986_v42  ;;  %7461 = vst [vmem:[#allocation117_spill] sm:$0xff] %v4601_v20  ;;  %3018 = vpow2.f32 %v1632_v45  ;;  %v4728_v45 = vadd.s32 104, %v3955_v28 }
 0x23d   : > { %vm4579_vm4 = vmand %vm7454_vm12, %vm3548_vm2  ;;  %vm7462_vm12 = vcmp.ne.s32.totalorder %v3532_v23, %v4472_v48  ;;  %v4624_v48 = vadd.f32 %v2127_v25, %v2126_v13  ;;  %7468 = vst [vmem:[#allocation121_spill] sm:$0xff] %v4626_v2  ;;  %v7481_v25 = vmov 0.0   ;;  %3020 = vpow2.f32 %v1634_v8 }
 0x23e   : > { %v7456_v44 = vsel %vm4579_vm4, 4294967295, %v7455_v44  ;;  %vm4591_vm15 = vmxor %vm7458_vm14, %vm7100_vm5  ;;  %7480 = vst [vmem:[#allocation124_spill] sm:$0xff] %v4665_v46  ;;  %v2131_v3 = vsel %vm4441_vm6, 1.0, %v7481_v25  ;;  %3022 = vpow2.f32 %v1646_v38  ;;  %vm7506_vm6 = vnez %v7450_v5 }
 0x23f   : > { %7457 = vst [vmem:[#allocation116_spill] sm:$0xff] %v7456_v44  ;;  %vm4609_vm14 = vmand %vm4432_vm10, %vm7462_vm12  ;;  %vm7469_vm10 = vcmp.eq.f32.partialorder %v4204_v11, %v3986_v42  ;;  %v7474_v11 = vmov 0  ;;  %v4817_v13 = vsub.f32 %v3596_v51, %v3907_v58  ;;  %v7533_v38 = vmov 0 }
 0x240   : > { %v7464_v41 = vsel %vm4609_vm14, 4294967295, %v7463_v41  ;;  %vm1538_vm0 = vmand %vm4569_vm11, %vm3542_vm1  ;;  %7467 = vst [vmem:[#allocation120_spill] sm:$0xff] %v4624_v48  ;;  %v2139_v36 = vsel %vm4579_vm4, 1.0, %v7481_v25  ;;  %v7557_v44 = vmov 0 }
 0x241   : > { %7465 = vst [vmem:[#allocation118_spill] sm:$0xff] %v7464_v41  ;;  %vm4635_vm12 = vmand %vm7469_vm10, %vm3548_vm2  ;;  %v1730_v35 = vsel %vm1538_vm0, %v4601_v20, 0.0  ;;  %vm7477_vm10 = vcmp.eq.f32.partialorder %v4400_v43, %v3978_v0  ;;  %v4779_v20 = vadd.s32 120, %v3955_v28 }
 0x242   : > { %v7471_v60 = vsel %vm4635_vm12, 4294967295, %v7470_v60  ;;  %vm1539_vm5 = vmand %vm4591_vm15, %vm3548_vm2  ;;  %vm7486_vm15 = vcmp.eq.f32.partialorder %v4357_v9, %v3978_v0  ;;  %7500 = vst [vmem:[#allocation128_spill] sm:$0xff] %v4728_v45  ;;  %v2141_v29 = vsel %vm4635_vm12, 1.0, %v7481_v25 }
 0x243   : > { %7472 = vst [vmem:[#allocation122_spill] sm:$0xff] %v7471_v60  ;;  %vm4651_vm7 = vmand %vm4507_vm8, %vm7473_vm13  ;;  %v1731_v6 = vsel %vm1539_vm5, %v4626_v2, 0.0  ;;  %vm7482_vm13 = vcmp.eq.f32.partialorder %v4306_v62, %v3986_v42  ;;  %v2130_v62 = vsel %vm4454_vm9, 1.0, %v7481_v25  ;;  %v7490_v2 = vmov 0 }
 0x244   : > { %v7475_v11 = vsel %vm4651_vm7, 4294967295, %v7474_v11  ;;  %vm4660_vm11 = vmand %vm7477_vm10, %vm3542_vm1  ;;  %v1805_v16 = vadd.f32 %v1731_v6, %v1730_v35  ;;  %v4714_v6 = vadd.f32 %v2131_v3, %v2130_v62  ;;  %vm7502_vm9 = vcmp.eq.f32.partialorder %v4585_v37, %v3978_v0  ;;  %v4767_v62 = vpop.eup %3012  ;;  %7519 = vst [vmem:[#allocation132_spill] sm:$0xff] %v4779_v20 }
 0x245   : > { %7476 = vst [vmem:[#allocation123_spill] sm:$0xff] %v7475_v11  ;;  %vm4678_vm8 = vmand %vm7482_vm13, %vm3548_vm2  ;;  %vm7489_vm13 = vcmp.ne.s32.totalorder %v3532_v23, %v4512_v31  ;;  %v4730_v31 = vpop.permute.xlu0 %1107  ;;  %v4752_v3 = vadd.s32 112, %v3955_v28  ;;  %v4793_v48 = vpop.eup %3014 }
 0x246   : > { %v7484_v59 = vsel %vm4678_vm8, 4294967295, %v7483_v59  ;;  %vm4687_vm5 = vmand %vm7486_vm15, %vm3542_vm1  ;;  %vm7493_vm15 = vcmp.eq.f32.partialorder %v4482_v63, %v3978_v0  ;;  %7496 = vst [vmem:[#allocation127_spill] sm:$0xff] %v4714_v6  ;;  %1806 = vadd.xlane.f32.xlu0 %v1805_v16  ;;  %v4754_v16 = vpop.permute.xlu1 %1112  ;;  %v4784_v6 = vadd.s32 128, %v3955_v28  ;;  %vm7553_vm4 = vcmp.eq.f32.partialorder %v4730_v31, %v3986_v42  ;;  %v4931_v19 = vpop.eup %3016 }
 0x247   : > { %7485 = vst [vmem:[#allocation125_spill] sm:$0xff] %v7484_v59  ;;  %vm4701_vm0 = vmand %vm4535_vm3, %vm7489_vm13  ;;  %vm7497_vm3 = vcmp.eq.f32.partialorder %v4272_v22, %v3986_v42  ;;  %v7507_v22 = vmov 0 }
 0x248   : > { %v7491_v2 = vsel %vm4701_vm0, 4294967295, %v7490_v2  ;;  %vm4710_vm10 = vmand %vm7493_vm15, %vm3542_vm1  ;;  %vm7501_vm15 = vmmov 1   ;;  %7509 = vst [vmem:[#allocation129_spill] sm:$0xff] %v4752_v3 }
 0x249   : > { %7492 = vst [vmem:[#allocation126_spill] sm:$0xff] %v7491_v2  ;;  %vm4721_vm13 = vmand %vm7497_vm3, %vm3548_vm2  ;;  %vm7505_vm3 = vcmp.ne.s32.totalorder %v3532_v23, %v4540_v4  ;;  %v7516_v4 = vmov 0 }
 0x24a   : > { %v7499_v56 = vsel %vm4721_vm13, 4294967295, %v7498_v56  ;;  %vm4736_vm0 = vmxor %vm7502_vm9, %vm7501_vm15  ;;  %vm7510_vm9 = vcmp.eq.f32.partialorder %v4585_v37, %v3986_v42  ;;  %7514 = vst [vmem:[#allocation130_spill] sm:$0xff] %v4767_v62  ;;  %v4924_v35 = vpop.permute.xlu1 %1122 }
 0x24b   : > { %vm4745_vm13 = vmand %vm7506_vm6, %vm7505_vm3  ;;  %vm7513_vm6 = vnez %v7432_v57  ;;  %vm7515_vm3 = vcmp.eq.f32.partialorder %v4400_v43, %v3986_v42  ;;  %7520 = vst [vmem:[#allocation133_spill] sm:$0xff] %v4784_v6  ;;  %v7524_v57 = vmov 0 }
 0x24c   : > { %v7508_v22 = vsel %vm4745_vm13, 4294967295, %v7507_v22  ;;  %vm4760_vm7 = vmxor %vm7510_vm9, %vm7501_vm15  ;;  %v2135_v5 = vsel %vm7513_vm6, 1.0, %v7481_v25  ;;  %7522 = vst [vmem:[#allocation134_spill] sm:$0xff] %v4793_v48 }
 0x24d   : > { %vm4774_vm8 = vmand %vm7515_vm3, %vm3548_vm2  ;;  %vm7521_vm3 = vnez %v7440_v12  ;;  %7528 = vst [vmem:[#allocation137_spill] sm:$0xff] %v4817_v13  ;;  %v7529_v12 = vld [vmem:[#allocation52_spill] sm:$0xff] }
 0x24e   : > { %v7517_v4 = vsel %vm4774_vm8, 4294967295, %v7516_v4  ;;  %vm1544_vm6 = vmand %vm4736_vm0, %vm3542_vm1  ;;  %v2134_v43 = vsel %vm7521_vm3, 1.0, %v7481_v25  ;;  %vm7523_vm8 = vcmp.ne.s32.totalorder %v3532_v23, %v4616_v33  ;;  %v4821_v32 = vsub.f32 %v7530_v49, %v7529_v12  ;;  %7565 = vst [vmem:[#allocation140_spill] sm:$0xff] %v4931_v19 }
 0x24f   : > { %7518 = vst [vmem:[#allocation131_spill] sm:$0xff] %v7517_v4  ;;  %vm4800_vm9 = vmand %vm4660_vm11, %vm7523_vm8  ;;  %v1736_v8 = vsel %vm1544_vm6, %v4767_v62, 0.0  ;;  %v4813_v33 = vadd.f32 %v2135_v5, %v2134_v43  ;;  %vm7532_vm11 = vcmp.eq.f32.partialorder %v4357_v9, %v3986_v42  ;;  %vm7535_vm6 = vcmp.eq.f32.partialorder %v4585_v37, %v3978_v0  ;;  %v7538_v9 = vld [vmem:[#allocation16_spill] sm:$0xff] }
 0x250   : > { %v7525_v57 = vsel %vm4800_vm9, 4294967295, %v7524_v57  ;;  %vm1545_vm3 = vmand %vm4760_vm7, %vm3548_vm2  ;;  %7531 = vst [vmem:[#allocation52_spill] sm:$0xff] %v4821_v32  ;;  %v4846_v5 = vsub.f32 %v7538_v9, %v3907_v58  ;;  %v7541_v43 = vmov 0  ;;  %v7549_v62 = vmov 0 }
 0x251   : > { %7526 = vst [vmem:[#allocation135_spill] sm:$0xff] %v7525_v57  ;;  %7527 = vst [vmem:[#allocation136_spill] sm:$0xff] %v4813_v33  ;;  %v1737_v49 = vsel %vm1545_vm3, %v4793_v48, 0.0  ;;  %vm7543_vm3 = vcmp.eq.f32.partialorder %v4618_v34, %v3978_v0  ;;  %v4914_v33 = vadd.s32 136, %v3955_v28 }
 0x252   : > { %vm4828_vm8 = vmand %vm7532_vm11, %vm3548_vm2  ;;  %7539 = vst [vmem:[#allocation29_spill] sm:$0xff] %v4846_v5  ;;  %vm7540_vm11 = vcmp.ne.s32.totalorder %v3532_v23, %v4665_v46  ;;  %v1814_v9 = vadd.f32 %v1737_v49, %v1736_v8  ;;  %v7546_v46 = vld [vmem:[#allocation32_spill] sm:$0xff]  ;;  %v7552_v8 = vld [vmem:[#allocation13_spill] sm:$0xff]  ;;  %v2138_v49 = vsel %vm4609_vm14, 1.0, %v7481_v25 }
 0x253   : > { %v7534_v38 = vsel %vm4828_vm8, 4294967295, %v7533_v38  ;;  %vm4839_vm0 = vmand %vm7535_vm6, %vm3542_vm1  ;;  %v4873_v48 = vsub.f32 %v7546_v46, %v7529_v12  ;;  %v4897_v46 = vpop.permute.xlu0 %1117  ;;  %7560 = vst [vmem:[#allocation138_spill] sm:$0xff] %v4914_v33 }
 0x254   : > { %vm4853_vm7 = vmand %vm4687_vm5, %vm7540_vm11  ;;  %vm7548_vm5 = vcmp.eq.f32.partialorder %v4482_v63, %v3986_v42  ;;  %1815 = vadd.xlane.f32.xlu1 %v1814_v9  ;;  %v1640_v9 = vmul.f32 1.442695, %v4821_v32  ;;  %v4959_v32 = vpop.eup %3018 }
 0x255   : > { %v7542_v43 = vsel %vm4853_vm7, 4294967295, %v7541_v43  ;;  %vm4864_vm13 = vmand %vm7543_vm3, %vm3542_vm1  ;;  %7547 = vst [vmem:[#allocation16_spill] sm:$0xff] %v4873_v48  ;;  %vm7561_vm3 = vcmp.eq.f32.partialorder %v4482_v63, %v3978_v0  ;;  %v1642_v60 = vmul.f32 1.442695, %v4873_v48  ;;  %v7588_v48 = vmov 0 }
 0x256   : > { %vm4880_vm11 = vmand %vm7548_vm5, %vm3548_vm2  ;;  %vm7556_vm5 = vcmp.ne.s32.totalorder %v3532_v23, %v4728_v45  ;;  %v4926_v45 = vadd.f32 %v2139_v36, %v2138_v49  ;;  %v4946_v36 = vadd.s32 144, %v3955_v28  ;;  %7575 = vst [vmem:[#allocation143_spill] sm:$0xff] %v4959_v32  ;;  %3024 = vpow2.f32 %v1640_v9 }
 0x257   : > { %v7550_v62 = vsel %vm4880_vm11, 4294967295, %v7549_v62  ;;  %vm4893_vm7 = vmand %vm7553_vm4, %vm3548_vm2  ;;  %vm7571_vm4 = vcmp.eq.f32.partialorder %v4482_v63, %v3986_v42  ;;  %vm7579_vm11 = vnez %v7484_v59  ;;  %v7597_v59 = vmov 0  ;;  %v5079_v9 = vpop.permute.xlu0 %1127 }
 0x258   : > { %7551 = vst [vmem:[#allocation32_spill] sm:$0xff] %v7550_v62  ;;  %vm4907_vm6 = vmand %vm4710_vm10, %vm7556_vm5  ;;  %vm7566_vm10 = vcmp.eq.f32.partialorder %v4585_v37, %v3986_v42  ;;  %vm7576_vm5 = vcmp.ne.s32.totalorder %v3532_v23, %v4752_v3  ;;  %v2143_v51 = vsel %vm7579_vm11, 1.0, %v7481_v25  ;;  %v4983_v3 = vpop.eup %3020  ;;  %3026 = vpow2.f32 %v1642_v60 }
 0x259   : > { %v7558_v44 = vsel %vm4907_vm6, 4294967295, %v7557_v44  ;;  %vm4920_vm14 = vmxor %vm7561_vm3, %vm7501_vm15  ;;  %7564 = vst [vmem:[#allocation139_spill] sm:$0xff] %v4926_v45  ;;  %v7577_v45 = vmov 0  ;;  %v5106_v60 = vadd.s32 160, %v3955_v28  ;;  %v2149_v49 = vsel %vm4828_vm8, 1.0, %v7481_v25 }
 0x25a   : > { %7559 = vst [vmem:[#allocation13_spill] sm:$0xff] %v7558_v44  ;;  %vm4939_vm3 = vmand %vm7566_vm10, %vm3548_vm2  ;;  %vm7574_vm10 = vnez %v7475_v11  ;;  %v7582_v11 = vmov 0  ;;  %vm7633_vm8 = vnez %v7542_v43 }
 0x25b   : > { %v7568_v61 = vsel %vm4939_vm3, 4294967295, %v7567_v61  ;;  %7570 = vst [vmem:[#allocation142_spill] sm:$0xff] %v4946_v36  ;;  %vm4952_vm12 = vmxor %vm7571_vm4, %vm7501_vm15  ;;  %v2140_v37 = vsel %vm7574_vm10, 1.0, %v7481_v25  ;;  %vm7585_vm4 = vnez %v7491_v2  ;;  %v7606_v2 = vmov 0 }
 0x25c   : > { %7569 = vst [vmem:[#allocation141_spill] sm:$0xff] %v7568_v61  ;;  %vm4966_vm3 = vmand %vm4839_vm0, %vm7576_vm5  ;;  %v4978_v63 = vadd.f32 %v2141_v29, %v2140_v37  ;;  %vm7581_vm0 = vcmp.eq.f32.partialorder %v4618_v34, %v3986_v42  ;;  %v2142_v29 = vsel %vm7585_vm4, 1.0, %v7481_v25  ;;  %v5005_v37 = vpop.eup %3022 }
 0x25d   : > { %v7578_v45 = vsel %vm4966_vm3, 4294967295, %v7577_v45  ;;  %vm1542_vm10 = vmand %vm4920_vm14, %vm3542_vm1  ;;  %7580 = vst [vmem:[#allocation144_spill] sm:$0xff] %v4983_v3 }
 0x25e   : > { %vm4991_vm5 = vmand %vm7581_vm0, %vm3548_vm2  ;;  %v1734_v41 = vsel %vm1542_vm10, %v4959_v32, 0.0  ;;  %7586 = vst [vmem:[#allocation146_spill] sm:$0xff] %v5005_v37  ;;  %vm7587_vm0 = vcmp.ne.s32.totalorder %v3532_v23, %v4779_v20  ;;  %vm7591_vm10 = vcmp.eq.f32.partialorder %v4754_v16, %v3986_v42  ;;  %v5028_v32 = vadd.f32 %v2143_v51, %v2142_v29 }
 0x25f   : > { %v7583_v11 = vsel %vm4991_vm5, 4294967295, %v7582_v11  ;;  %vm1543_vm14 = vmand %vm4952_vm12, %vm3548_vm2  ;;  %7621 = vst [vmem:[#allocation154_spill] sm:$0xff] %v5106_v60 }
 0x260   : > { %7584 = vst [vmem:[#allocation145_spill] sm:$0xff] %v7583_v11  ;;  %vm5012_vm11 = vmand %vm4864_vm13, %vm7587_vm0  ;;  %v1735_v20 = vsel %vm1543_vm14, %v4983_v3, 0.0  ;;  %vm7595_vm13 = vnez %v7499_v56  ;;  %vm7596_vm0 = vcmp.eq.f32.partialorder %v4730_v31, %v3978_v0  ;;  %vm7600_vm14 = vcmp.eq.f32.partialorder %v4897_v46, %v3986_v42 }
 0x261   : > { %v7589_v48 = vsel %vm5012_vm11, 4294967295, %v7588_v48  ;;  %vm5023_vm6 = vmand %vm7591_vm10, %vm3548_vm2  ;;  %7594 = vst [vmem:[#allocation148_spill] sm:$0xff] %v5028_v32  ;;  %v2145_v58 = vsel %vm7595_vm13, 1.0, %v7481_v25  ;;  %v1811_v29 = vadd.f32 %v1735_v20, %v1734_v41  ;;  %v5054_v3 = vadd.s32 152, %v3955_v28  ;;  %v7654_v20 = vld [vmem:[#allocation15_spill] sm:$0xff] }
 0x262   : > { %7590 = vst [vmem:[#allocation147_spill] sm:$0xff] %v7589_v48  ;;  %vm5038_vm12 = vmand %vm7596_vm0, %vm3542_vm1  ;;  %vm7604_vm0 = vnez %v7508_v22  ;;  %vm7605_vm10 = vcmp.ne.s32.totalorder %v7552_v8, %v4784_v6  ;;  %v7615_v6 = vmov 0 }
 0x263   : > { %v7598_v59 = vsel %vm5038_vm12, 4294967295, %v7597_v59  ;;  %vm5049_vm4 = vmand %vm7600_vm14, %vm3548_vm2  ;;  %7603 = vst [vmem:[#allocation150_spill] sm:$0xff] %v5054_v3  ;;  %v2144_v32 = vsel %vm7604_vm0, 1.0, %v7481_v25  ;;  %vm7609_vm12 = vcmp.eq.f32.partialorder %v4924_v35, %v3986_v42  ;;  %1812 = vadd.xlane.f32.xlu0 %v1811_v29  ;;  %vm7618_vm0 = vcmp.eq.f32.partialorder %v4730_v31, %v3978_v0 }
 0x264   : > { %7599 = vst [vmem:[#allocation149_spill] sm:$0xff] %v7598_v59  ;;  %vm5064_vm13 = vmand %vm4893_vm7, %vm7605_vm10  ;;  %v5081_v41 = vadd.f32 %v2145_v58, %v2144_v32  ;;  %vm7613_vm7 = vnez %v7517_v4  ;;  %vm7614_vm10 = vcmp.eq.f32.partialorder %v4754_v16, %v3978_v0  ;;  %v2146_v58 = vsel %vm4800_vm9, 1.0, %v7481_v25 }
 0x265   : > { %v7607_v2 = vsel %vm5064_vm13, 4294967295, %v7606_v2  ;;  %vm5075_vm11 = vmand %vm7609_vm12, %vm3548_vm2  ;;  %v2147_v12 = vsel %vm7613_vm7, 1.0, %v7481_v25  ;;  %v1652_v4 = vmul.f32 1.442695, %v4817_v13  ;;  %v7623_v29 = vmov 0 }
 0x266   : > { %7608 = vst [vmem:[#allocation151_spill] sm:$0xff] %v7607_v2  ;;  %7612 = vst [vmem:[#allocation152_spill] sm:$0xff] %v5081_v41  ;;  %vm7626_vm7 = vcmp.eq.f32.partialorder %v4730_v31, %v3986_v42  ;;  %v5131_v13 = vadd.f32 %v2147_v12, %v2146_v58  ;;  %v7630_v41 = vmov 0  ;;  %v2148_v31 = vsel %vm7633_vm8, 1.0, %v7481_v25 }
 0x267   : > { %vm5091_vm14 = vmand %vm7614_vm10, %vm3542_vm1  ;;  %vm7622_vm10 = vcmp.ne.s32.totalorder %v7552_v8, %v4914_v33  ;;  %v1654_v33 = vmul.f32 1.442695, %v4846_v5  ;;  %v7635_v12 = vmov 0  ;;  %v5173_v58 = vadd.f32 %v2149_v49, %v2148_v31  ;;  %v7645_v31 = vld [vmem:[#allocation45_spill] sm:$0xff]  ;;  %v7646_v5 = vld [vmem:[#allocation14_spill] sm:$0xff] }
 0x268   : > { %v7616_v6 = vsel %vm5091_vm14, 4294967295, %v7615_v6  ;;  %vm5101_vm13 = vmxor %vm7618_vm0, %vm7501_vm15  ;;  %vm7648_vm9 = vcmp.ne.s32.totalorder %v7552_v8, %v5054_v3  ;;  %3028 = vpow2.f32 %v1652_v4  ;;  %v7662_v4 = vmov 0 }
 0x269   : > { %7617 = vst [vmem:[#allocation153_spill] sm:$0xff] %v7616_v6  ;;  %vm5117_vm12 = vmand %vm5023_vm6, %vm7622_vm10  ;;  %vm7629_vm6 = vcmp.eq.f32.partialorder %v4897_v46, %v3978_v0  ;;  %3030 = vpow2.f32 %v1654_v33  ;;  %v2155_v33 = vsel %vm4991_vm5, 1.0, %v7481_v25 }
 0x26a   : > { %v7624_v29 = vsel %vm5117_vm12, 4294967295, %v7623_v29  ;;  %vm5127_vm14 = vmxor %vm7626_vm7, %vm7501_vm15  ;;  %7638 = vst [vmem:[#allocation158_spill] sm:$0xff] %v5173_v58  ;;  %vm7639_vm7 = vnez %v7550_v62  ;;  %v5195_v62 = vsub.f32 %v7646_v5, %v7645_v31  ;;  %v5220_v58 = vsub.f32 %v7654_v20, %v7645_v31  ;;  %v5270_v20 = vpop.eup %3024 }
 0x26b   : > { %7625 = vst [vmem:[#allocation155_spill] sm:$0xff] %v7624_v29  ;;  %vm5142_vm10 = vmand %vm7629_vm6, %vm3542_vm1  ;;  %vm7634_vm6 = vcmp.ne.s32.totalorder %v7552_v8, %v4946_v36  ;;  %v2151_v51 = vsel %vm7639_vm7, 1.0, %v7481_v25  ;;  %v7641_v36 = vmov 0  ;;  %vm7653_vm7 = vnez %v7568_v61  ;;  %v5284_v11 = vpop.eup %3026 }
 0x26c   : > { %v7631_v41 = vsel %vm5142_vm10, 4294967295, %v7630_v41  ;;  %vm1548_vm0 = vmand %vm5101_vm13, %vm3542_vm1  ;;  %7647 = vst [vmem:[#allocation45_spill] sm:$0xff] %v5195_v62  ;;  %v2153_v3 = vsel %vm7653_vm7, 1.0, %v7481_v25 }
 0x26d   : > { %7632 = vst [vmem:[#allocation156_spill] sm:$0xff] %v7631_v41  ;;  %vm5162_vm10 = vmand %vm5049_vm4, %vm7634_vm6  ;;  %v1740_v32 = vsel %vm1548_vm0, %v4931_v19, 0.0  ;;  %vm7640_vm4 = vcmp.eq.f32.partialorder %v4924_v35, %v3978_v0  ;;  %vm7644_vm0 = vnez %v7558_v44  ;;  %v7649_v19 = vmov 0  ;;  %v5211_v44 = vpop.permute.xlu1 %1132 }
 0x26e   : > { %v7636_v12 = vsel %vm5162_vm10, 4294967295, %v7635_v12  ;;  %vm1549_vm13 = vmand %vm5127_vm14, %vm3548_vm2  ;;  %v2150_v49 = vsel %vm7644_vm0, 1.0, %v7481_v25  ;;  %7655 = vst [vmem:[#allocation15_spill] sm:$0xff] %v5220_v58 }
 0x26f   : > { %7637 = vst [vmem:[#allocation157_spill] sm:$0xff] %v7636_v12  ;;  %vm5183_vm6 = vmand %vm7640_vm4, %vm3542_vm1  ;;  %v1741_v57 = vsel %vm1549_vm13, %v5005_v37, 0.0  ;;  %vm7652_vm13 = vcmp.eq.f32.partialorder %v5079_v9, %v3986_v42  ;;  %v5213_v5 = vadd.f32 %v2151_v51, %v2150_v49  ;;  %v5232_v51 = vadd.s32 168, %v3955_v28 }
 0x270   : > { %v7642_v36 = vsel %vm5183_vm6, 4294967295, %v7641_v36  ;;  %vm5202_vm4 = vmand %vm5075_vm11, %vm7648_vm9  ;;  %v1820_v37 = vadd.f32 %v1741_v57, %v1740_v32  ;;  %vm7656_vm9 = vcmp.eq.f32.partialorder %v5079_v9, %v3978_v0  ;;  %v7657_v32 = vmov 0  ;;  %7672 = vst [vmem:[#allocation163_spill] sm:$0xff] %v5270_v20 }
 0x271   : > { %7643 = vst [vmem:[#allocation159_spill] sm:$0xff] %v7642_v36  ;;  %v7650_v19 = vsel %vm5202_vm4, 4294967295, %v7649_v19  ;;  %vm1301_vm14 = vmand %vm7652_vm13, %vm3548_vm2  ;;  %v2152_v57 = vsel %vm4966_vm3, 1.0, %v7481_v25  ;;  %vm7661_vm13 = vcmp.ne.s32.totalorder %v7552_v8, %v5106_v60  ;;  %vm7671_vm3 = vnez %v7589_v48 }
 0x272   : > { %7651 = vst [vmem:[#allocation14_spill] sm:$0xff] %v7650_v19  ;;  %vm5227_vm11 = vmand %vm7656_vm9, %vm3542_vm1  ;;  %1821 = vadd.xlane.f32.xlu1 %v1820_v37  ;;  %vm7665_vm9 = vcmp.eq.f32.partialorder %v4618_v34, %v3978_v0  ;;  %v5252_v31 = vadd.f32 %v2153_v3, %v2152_v57  ;;  %v2154_v3 = vsel %vm7671_vm3, 1.0, %v7481_v25  ;;  %v1648_v57 = vmul.f32 1.442695, %v5195_v62  ;;  %v7683_v62 = vld [vmem:[#allocation47_spill] sm:$0xff] }
 0x273   : > { %v7658_v32 = vsel %vm5227_vm11, 4294967295, %v7657_v32  ;;  %7660 = vst [vmem:[#allocation161_spill] sm:$0xff] %v5232_v51  ;;  %vm5240_vm0 = vmand %vm1301_vm14, %vm7661_vm13  ;;  %vm7668_vm14 = vcmp.eq.f32.partialorder %v4618_v34, %v3986_v42  ;;  %v5279_v34 = vadd.f32 %v2155_v33, %v2154_v3  ;;  %v1650_v48 = vmul.f32 1.442695, %v5220_v58 }
 0x274   : > { %7659 = vst [vmem:[#allocation160_spill] sm:$0xff] %v7658_v32  ;;  %v7663_v4 = vsel %vm5240_vm0, 4294967295, %v7662_v4  ;;  %vm5248_vm7 = vmxor %vm7665_vm9, %vm7501_vm15  ;;  %vm7674_vm9 = vnez %v7598_v59  ;;  %v7678_v58 = vmov 0  ;;  %3032 = vpow2.f32 %v1648_v57 }
 0x275   : > { %7664 = vst [vmem:[#allocation162_spill] sm:$0xff] %v7663_v4  ;;  %vm5261_vm13 = vmxor %vm7668_vm14, %vm7501_vm15  ;;  %v2156_v60 = vsel %vm7674_vm9, 1.0, %v7481_v25  ;;  %vm7676_vm14 = vnez %v7607_v2  ;;  %vm7677_vm9 = vcmp.eq.f32.partialorder %v5211_v44, %v3978_v0  ;;  %v7684_v2 = vld [vmem:[#allocation19_spill] sm:$0xff]  ;;  %3034 = vpow2.f32 %v1650_v48 }
 0x276   : > { %vm1546_vm5 = vmand %vm5248_vm7, %vm3542_vm1  ;;  %7673 = vst [vmem:[#allocation164_spill] sm:$0xff] %v5279_v34  ;;  %vm1367_vm7 = vcmp.ne.s32.totalorder %v7552_v8, %v5232_v51  ;;  %v2157_v33 = vsel %vm7676_vm14, 1.0, %v7481_v25  ;;  %v5314_v59 = vsub.f32 %v7684_v2, %v7683_v62  ;;  %v7686_v34 = vld [vmem:[#allocation20_spill] sm:$0xff]  ;;  %v7689_v2 = vmov 0 }
 0x277   : > { %7675 = vst [vmem:[#allocation165_spill] sm:$0xff] %v5284_v11  ;;  %vm1547_vm3 = vmand %vm5261_vm13, %vm3548_vm2  ;;  %v1738_v49 = vsel %vm1546_vm5, %v5270_v20, 0.0  ;;  %v5307_v37 = vadd.f32 %v2157_v33, %v2156_v60  ;;  %vm7682_vm5 = vnez %v7616_v6  ;;  %v5325_v60 = vpop.permute.xlu0 %1137  ;;  %v2159_v33 = vsel %vm5117_vm12, 1.0, %v7481_v25  ;;  %v5411_v6 = vpop.permute.xlu1 %1147 }
 0x278   : > { %v1739_v3 = vsel %vm1547_vm3, %v5284_v11, 0.0  ;;  %vm5303_vm8 = vmand %vm7677_vm9, %vm3542_vm1  ;;  %v2158_v51 = vsel %vm7682_vm5, 1.0, %v7481_v25  ;;  %7685 = vst [vmem:[#allocation47_spill] sm:$0xff] %v5314_v59  ;;  %v5318_v11 = vsub.f32 %v7686_v34, %v7683_v62  ;;  %vm7688_vm3 = vcmp.eq.f32.partialorder %v5211_v44, %v3986_v42 }
 0x279   : > { %v7679_v58 = vsel %vm5303_vm8, 4294967295, %v7678_v58  ;;  %7681 = vst [vmem:[#allocation167_spill] sm:$0xff] %v5307_v37  ;;  %v1817_v20 = vadd.f32 %v1739_v3, %v1738_v49  ;;  %vm1303_vm13 = vmand %vm7688_vm3, %vm3548_vm2  ;;  %v5335_v62 = vadd.s32 176, %v3955_v28  ;;  %v5337_v34 = vadd.f32 %v2159_v33, %v2158_v51  ;;  %v5364_v3 = vpop.eup %3028  ;;  %v7822_v37 = vld [vmem:[#allocation58_spill] sm:$0xff] }
 0x27a   : > { %7680 = vst [vmem:[#allocation166_spill] sm:$0xff] %v7679_v58  ;;  %7687 = vst [vmem:[#allocation19_spill] sm:$0xff] %v5318_v11  ;;  %vm7694_vm5 = vnez %v7631_v41  ;;  %vm7695_vm3 = vcmp.eq.f32.partialorder %v4897_v46, %v3978_v0  ;;  %v2161_v57 = vsel %vm5162_vm10, 1.0, %v7481_v25  ;;  %v1660_v33 = vmul.f32 1.442695, %v5314_v59  ;;  %v7712_v41 = vld [vmem:[#allocation18_spill] sm:$0xff] }
 0x27b   : > { %vm5330_vm9 = vmand %vm1303_vm13, %vm1367_vm7  ;;  %7692 = vst [vmem:[#allocation168_spill] sm:$0xff] %v5335_v62  ;;  %v2160_v49 = vsel %vm7694_vm5, 1.0, %v7481_v25  ;;  %1818 = vadd.xlane.f32.xlu0 %v1817_v20  ;;  %vm7696_vm7 = vcmp.eq.f32.partialorder %v4897_v46, %v3986_v42  ;;  %v2162_v20 = vsel %vm5183_vm6, 1.0, %v7481_v25  ;;  %v1662_v29 = vmul.f32 1.442695, %v5318_v11 }
 0x27c   : > { %v7690_v2 = vsel %vm5330_vm9, 4294967295, %v7689_v2  ;;  %7693 = vst [vmem:[#allocation169_spill] sm:$0xff] %v5337_v34  ;;  %vm1488_vm12 = vmxor %vm7695_vm3, %vm7501_vm15  ;;  %v5359_v48 = vadd.f32 %v2161_v57, %v2160_v49  ;;  %v2163_v46 = vsel %vm5202_vm4, 1.0, %v7481_v25  ;;  %v5375_v49 = vpop.eup %3030  ;;  %vm1369_vm6 = vcmp.ne.s32.totalorder %v7552_v8, %v5335_v62  ;;  %v7708_v62 = vld [vmem:[#allocation17_spill] sm:$0xff] }
 0x27d   : > { %7691 = vst [vmem:[#allocation20_spill] sm:$0xff] %v7690_v2  ;;  %vm5353_vm13 = vmxor %vm7696_vm7, %vm7501_vm15  ;;  %v5384_v36 = vadd.f32 %v2163_v46, %v2162_v20  ;;  %v2164_v11 = vsel %vm5227_vm11, 1.0, %v7481_v25  ;;  %v7704_v51 = vmov 0  ;;  %v2165_v20 = vsel %vm5240_vm0, 1.0, %v7481_v25  ;;  %v7707_v46 = vld [vmem:[#allocation46_spill] sm:$0xff] }
 0x27e   : > { %7699 = vst [vmem:[#allocation170_spill] sm:$0xff] %v5359_v48  ;;  %7700 = vst [vmem:[#allocation171_spill] sm:$0xff] %v5364_v3  ;;  %v5404_v59 = vsub.f32 %v7708_v62, %v7707_v46  ;;  %v5413_v12 = vadd.f32 %v2165_v20, %v2164_v11  ;;  %v2166_v4 = vsel %vm5303_vm8, 1.0, %v7481_v25  ;;  %3036 = vpow2.f32 %v1660_v33 }
 0x27f   : > { %vm1552_vm3 = vmand %vm1488_vm12, %vm3542_vm1  ;;  %7701 = vst [vmem:[#allocation172_spill] sm:$0xff] %v5375_v49  ;;  %vm7703_vm12 = vcmp.eq.f32.partialorder %v5325_v60, %v3978_v0  ;;  %v5427_v62 = vadd.s32 192, %v3955_v28  ;;  %v2167_v11 = vsel %vm5330_vm9, 1.0, %v7481_v25  ;;  %3038 = vpow2.f32 %v1662_v29 }
 0x280   : > { %vm1553_vm5 = vmand %vm5353_vm13, %vm3548_vm2  ;;  %v1744_v57 = vsel %vm1552_vm3, %v5364_v3, 0.0  ;;  %7702 = vst [vmem:[#allocation173_spill] sm:$0xff] %v5384_v36  ;;  %v5420_v36 = vsub.f32 %v7712_v41, %v7707_v46  ;;  %v5436_v41 = vadd.f32 %v2167_v11, %v2166_v4  ;;  %v1656_v4 = vmul.f32 1.442695, %v5404_v59  ;;  %v7820_v3 = vld [vmem:[#allocation33_spill] sm:$0xff] }
 0x281   : > { %v1745_v19 = vsel %vm1553_vm5, %v5375_v49, 0.0  ;;  %vm5395_vm7 = vmand %vm7703_vm12, %vm3542_vm1  ;;  %7709 = vst [vmem:[#allocation46_spill] sm:$0xff] %v5404_v59  ;;  %vm7710_vm5 = vcmp.eq.f32.partialorder %v5325_v60, %v3986_v42  ;;  %vm7718_vm12 = vcmp.eq.f32.partialorder %v4754_v16, %v3978_v0  ;;  %vm1373_vm9 = vcmp.ne.s32.totalorder %v7552_v8, %v5427_v62  ;;  %v7819_v49 = vld [vmem:[#allocation54_spill] sm:$0xff] }
 0x282   : > { %v7705_v51 = vsel %vm5395_vm7, 4294967295, %v7704_v51  ;;  %v1826_v32 = vadd.f32 %v1745_v19, %v1744_v57  ;;  %vm1305_vm13 = vmand %vm7710_vm5, %vm3548_vm2  ;;  %7711 = vst [vmem:[#allocation17_spill] sm:$0xff] %v5413_v12  ;;  %v7714_v19 = vmov 0  ;;  %v2168_v33 = vsel %vm5395_vm7, 1.0, %v7481_v25 }
 0x283   : > { %7706 = vst [vmem:[#allocation174_spill] sm:$0xff] %v7705_v51  ;;  %7713 = vst [vmem:[#allocation18_spill] sm:$0xff] %v5420_v36  ;;  %v1658_v20 = vmul.f32 1.442695, %v5420_v36  ;;  %3040 = vpow2.f32 %v1656_v4  ;;  %v7729_v58 = vmov 0 }
 0x284   : > { %vm5422_vm3 = vmand %vm1305_vm13, %vm1369_vm6  ;;  %7717 = vst [vmem:[#allocation176_spill] sm:$0xff] %v5427_v62  ;;  %1827 = vadd.xlane.f32.xlu1 %v1826_v32  ;;  %vm7720_vm6 = vcmp.eq.f32.partialorder %v4754_v16, %v3986_v42  ;;  %v5450_v32 = vpop.eup %3032 }
 0x285   : > { %v7715_v19 = vsel %vm5422_vm3, 4294967295, %v7714_v19  ;;  %vm1486_vm5 = vmxor %vm7718_vm12, %vm7501_vm15  ;;  %7719 = vst [vmem:[#allocation177_spill] sm:$0xff] %v5436_v41  ;;  %v2169_v29 = vsel %vm5422_vm3, 1.0, %v7481_v25  ;;  %v5459_v16 = vpop.eup %3034  ;;  %3042 = vpow2.f32 %v1658_v20  ;;  %v7737_v20 = vld [vmem:[#allocation49_spill] sm:$0xff] }
 0x286   : > { %7716 = vst [vmem:[#allocation175_spill] sm:$0xff] %v7715_v19  ;;  %vm1487_vm13 = vmxor %vm7720_vm6, %vm7501_vm15  ;;  %v5457_v57 = vadd.f32 %v2169_v29, %v2168_v33  ;;  %v7725_v33 = vmov 0  ;;  %v5477_v29 = vpop.permute.xlu0 %1142  ;;  %v5492_v19 = vadd.s32 184, %v3955_v28  ;;  %v7759_v41 = vld [vmem:[#allocation21_spill] sm:$0xff] }
 0x287   : > { %7721 = vst [vmem:[#allocation178_spill] sm:$0xff] %v5450_v32  ;;  %vm1550_vm12 = vmand %vm1486_vm5, %vm3542_vm1  ;;  %vm7724_vm5 = vcmp.eq.f32.partialorder %v5411_v6, %v3978_v0 }
 0x288   : > { %7722 = vst [vmem:[#allocation179_spill] sm:$0xff] %v5457_v57  ;;  %7723 = vst [vmem:[#allocation180_spill] sm:$0xff] %v5459_v16  ;;  %v1742_v46 = vsel %vm1550_vm12, %v5450_v32, 0.0  ;;  %v7758_v57 = vld [vmem:[#allocation48_spill] sm:$0xff] }
 0x289   : > { %vm1551_vm6 = vmand %vm1487_vm13, %vm3548_vm2  ;;  %vm7728_vm13 = vcmp.eq.f32.partialorder %v5411_v6, %v3986_v42  ;;  %7732 = vst [vmem:[#allocation183_spill] sm:$0xff] %v5492_v19 }
 0x28a   : > { %v1743_v11 = vsel %vm1551_vm6, %v5459_v16, 0.0  ;;  %vm5473_vm8 = vmand %vm7724_vm5, %vm3542_vm1  ;;  %vm7733_vm5 = vcmp.eq.f32.partialorder %v5079_v9, %v3978_v0 }
 0x28b   : > { %v7726_v33 = vsel %vm5473_vm8, 4294967295, %v7725_v33  ;;  %v1823_v2 = vadd.f32 %v1743_v11, %v1742_v46  ;;  %vm1309_vm12 = vmand %vm7728_vm13, %vm3548_vm2  ;;  %v2172_v62 = vsel %vm5473_vm8, 1.0, %v7481_v25  ;;  %v7738_v11 = vld [vmem:[#allocation23_spill] sm:$0xff] }
 0x28c   : > { %7727 = vst [vmem:[#allocation181_spill] sm:$0xff] %v7726_v33  ;;  %vm5487_vm6 = vmand %vm1309_vm12, %vm1373_vm9  ;;  %vm7734_vm9 = vcmp.eq.f32.partialorder %v5079_v9, %v3986_v42  ;;  %v5513_v33 = vsub.f32 %v7738_v11, %v7737_v20  ;;  %v7741_v9 = vld [vmem:[#allocation24_spill] sm:$0xff]  ;;  %vm1371_vm12 = vcmp.ne.s32.totalorder %v7552_v8, %v5492_v19  ;;  %v5547_v19 = vpop.permute.xlu1 %1172 }
 0x28d   : > { %v7730_v58 = vsel %vm5487_vm6, 4294967295, %v7729_v58  ;;  %1824 = vadd.xlane.f32.xlu0 %v1823_v2  ;;  %vm1492_vm3 = vmxor %vm7733_vm5, %vm7501_vm15  ;;  %v2173_v46 = vsel %vm5487_vm6, 1.0, %v7481_v25  ;;  %v5509_v2 = vpop.eup %3036  ;;  %v5523_v51 = vsub.f32 %v7741_v9, %v7737_v20  ;;  %v7744_v20 = vmov 0 }
 0x28e   : > { %7731 = vst [vmem:[#allocation182_spill] sm:$0xff] %v7730_v58  ;;  %vm1493_vm13 = vmxor %vm7734_vm9, %vm7501_vm15  ;;  %v5507_v4 = vadd.f32 %v2173_v46, %v2172_v62  ;;  %v5519_v58 = vpop.eup %3038  ;;  %v5530_v46 = vpop.permute.xlu0 %1152  ;;  %v1668_v59 = vmul.f32 1.442695, %v5513_v33 }
 0x28f   : > { %7736 = vst [vmem:[#allocation185_spill] sm:$0xff] %v5509_v2  ;;  %7739 = vst [vmem:[#allocation49_spill] sm:$0xff] %v5513_v33 }
 0x290   : > { %7735 = vst [vmem:[#allocation184_spill] sm:$0xff] %v5507_v4  ;;  %vm1556_vm5 = vmand %vm1492_vm3, %vm3542_vm1  ;;  %vm7743_vm3 = vcmp.eq.f32.partialorder %v5477_v29, %v3978_v0  ;;  %v7748_v4 = vmov 0  ;;  %3044 = vpow2.f32 %v1668_v59  ;;  %v7765_v59 = vmov 0 }
 0x291   : > { %7740 = vst [vmem:[#allocation23_spill] sm:$0xff] %v5519_v58  ;;  %7742 = vst [vmem:[#allocation24_spill] sm:$0xff] %v5523_v51  ;;  %v1748_v62 = vsel %vm1556_vm5, %v5509_v2, 0.0  ;;  %v7762_v2 = vld [vmem:[#allocation22_spill] sm:$0xff] }
 0x292   : > { %vm1557_vm9 = vmand %vm1493_vm13, %vm3548_vm2  ;;  %vm7747_vm13 = vcmp.eq.f32.partialorder %v5477_v29, %v3986_v42 }
 0x293   : > { %v1749_v11 = vsel %vm1557_vm9, %v5519_v58, 0.0  ;;  %vm5538_vm6 = vmand %vm7743_vm3, %vm3542_vm1  ;;  %vm7752_vm3 = vcmp.eq.f32.partialorder %v4924_v35, %v3978_v0  ;;  %v5584_v58 = vsub.f32 %v7759_v41, %v7758_v57 }
 0x294   : > { %v7745_v20 = vsel %vm5538_vm6, 4294967295, %v7744_v20  ;;  %v1832_v9 = vadd.f32 %v1749_v11, %v1748_v62  ;;  %vm1307_vm5 = vmand %vm7747_vm13, %vm3548_vm2  ;;  %v2170_v36 = vsel %vm5538_vm6, 1.0, %v7481_v25  ;;  %v5558_v62 = vadd.s32 232, %v3955_v28 }
 0x295   : > { %7746 = vst [vmem:[#allocation186_spill] sm:$0xff] %v7745_v20  ;;  %vm5553_vm9 = vmand %vm1307_vm5, %vm1371_vm12  ;;  %v1670_v11 = vmul.f32 1.442695, %v5523_v51  ;;  %vm7753_vm12 = vcmp.eq.f32.partialorder %v4924_v35, %v3986_v42  ;;  %v5580_v51 = vpop.eup %3040  ;;  %v5590_v35 = vpop.permute.xlu0 %1157 }
 0x296   : > { %v7749_v4 = vsel %vm5553_vm9, 4294967295, %v7748_v4  ;;  %7751 = vst [vmem:[#allocation188_spill] sm:$0xff] %v5558_v62  ;;  %1833 = vadd.xlane.f32.xlu1 %v1832_v9  ;;  %vm1490_vm13 = vmxor %vm7752_vm3, %vm7501_vm15  ;;  %v2171_v20 = vsel %vm5553_vm9, 1.0, %v7481_v25 }
 0x297   : > { %7750 = vst [vmem:[#allocation187_spill] sm:$0xff] %v7749_v4  ;;  %vm5572_vm5 = vmxor %vm7753_vm12, %vm7501_vm15  ;;  %v5578_v9 = vadd.f32 %v2171_v20, %v2170_v36  ;;  %v5592_v4 = vpop.eup %3042  ;;  %v5596_v36 = vsub.f32 %v7762_v2, %v7758_v57  ;;  %3046 = vpow2.f32 %v1670_v11  ;;  %vm7764_vm12 = vcmp.eq.f32.partialorder %v5547_v19, %v3978_v0 }
 0x298   : > { %7757 = vst [vmem:[#allocation190_spill] sm:$0xff] %v5580_v51  ;;  %7760 = vst [vmem:[#allocation48_spill] sm:$0xff] %v5584_v58  ;;  %v1664_v2 = vmul.f32 1.442695, %v5584_v58  ;;  %v7769_v11 = vmov 0 }
 0x299   : > { %7756 = vst [vmem:[#allocation189_spill] sm:$0xff] %v5578_v9  ;;  %vm1554_vm3 = vmand %vm1490_vm13, %vm3542_vm1  ;;  %vm1383_vm13 = vcmp.ne.s32.totalorder %v7552_v8, %v5558_v62  ;;  %v1666_v62 = vmul.f32 1.442695, %v5596_v36  ;;  %v5634_v9 = vpop.permute.xlu0 %1162 }
 0x29a   : > { %7761 = vst [vmem:[#allocation21_spill] sm:$0xff] %v5592_v4  ;;  %7763 = vst [vmem:[#allocation22_spill] sm:$0xff] %v5596_v36  ;;  %v1746_v41 = vsel %vm1554_vm3, %v5580_v51, 0.0  ;;  %3048 = vpow2.f32 %v1664_v2  ;;  %v5657_v2 = vpop.eup %3044  ;;  %v7780_v36 = vld [vmem:[#allocation27_spill] sm:$0xff]  ;;  %vm7270_vm7 = vcmp.eq.f32.partialorder %v5634_v9, %v3986_v42 }
 0x29b   : > { %vm1555_vm6 = vmand %vm5572_vm5, %vm3548_vm2  ;;  %vm7768_vm5 = vcmp.eq.f32.partialorder %v5547_v19, %v3986_v42  ;;  %3050 = vpow2.f32 %v1666_v62  ;;  %7778 = vst [vmem:[#allocation195_spill] sm:$0xff] %v5657_v2 }
 0x29c   : > { %v1747_v20 = vsel %vm1555_vm6, %v5592_v4, 0.0  ;;  %vm5611_vm9 = vmand %vm7764_vm12, %vm3542_vm1  ;;  %vm7774_vm12 = vcmp.eq.f32.partialorder %v5325_v60, %v3978_v0 }
 0x29d   : > { %v7766_v59 = vsel %vm5611_vm9, 4294967295, %v7765_v59  ;;  %v1829_v57 = vadd.f32 %v1747_v20, %v1746_v41  ;;  %vm1319_vm3 = vmand %vm7768_vm5, %vm3548_vm2  ;;  %v2182_v33 = vsel %vm5611_vm9, 1.0, %v7481_v25  ;;  %v5629_v41 = vpop.permute.xlu1 %1182  ;;  %vm7775_vm5 = vcmp.eq.f32.partialorder %v5325_v60, %v3986_v42 }
 0x29e   : > { %7767 = vst [vmem:[#allocation191_spill] sm:$0xff] %v7766_v59  ;;  %vm5624_vm6 = vmand %vm1319_vm3, %vm1383_vm13  ;;  %v5639_v59 = vadd.s32 200, %v3955_v28 }
 0x29f   : > { %v7770_v11 = vsel %vm5624_vm6, 4294967295, %v7769_v11  ;;  %1830 = vadd.xlane.f32.xlu0 %v1829_v57  ;;  %v2183_v20 = vsel %vm5624_vm6, 1.0, %v7481_v25  ;;  %vm1496_vm13 = vmxor %vm7774_vm12, %vm7501_vm15 }
 0x2a0   : > { %7771 = vst [vmem:[#allocation192_spill] sm:$0xff] %v7770_v11  ;;  %v5636_v4 = vadd.f32 %v2183_v20, %v2182_v33  ;;  %7773 = vst [vmem:[#allocation194_spill] sm:$0xff] %v5639_v59  ;;  %v7779_v20 = vld [vmem:[#allocation51_spill] sm:$0xff]  ;;  %vm1375_vm9 = vcmp.ne.s32.totalorder %v7552_v8, %v5639_v59  ;;  %v5706_v59 = vadd.s32 248, %v3955_v28 }
 0x2a1   : > { %v1777_v57 = vpop.xlane.xlu1 %1776  ;;  %vm5649_vm3 = vmxor %vm7775_vm5, %vm7501_vm15  ;;  %v5661_v58 = vsub.f32 %v7780_v36, %v7779_v20  ;;  %v5667_v60 = vpop.eup %3046 }
 0x2a2   : > { %7772 = vst [vmem:[#allocation193_spill] sm:$0xff] %v5636_v4  ;;  %v1870_v33 = vadd.f32 %v4012_v53, %v1777_v57  ;;  %v1871_v62 = vadd.f32 %v4022_v15, %v1777_v57  ;;  %vm1560_vm12 = vmand %vm1496_vm13, %vm3542_vm1  ;;  %v7783_v4 = vld [vmem:[#allocation28_spill] sm:$0xff]  ;;  %v5680_v15 = vpop.permute.xlu0 %1167  ;;  %vm7785_vm13 = vcmp.eq.f32.partialorder %v5530_v46, %v3978_v0 }
 0x2a3   : > { %7781 = vst [vmem:[#allocation51_spill] sm:$0xff] %v5661_v58  ;;  %7782 = vst [vmem:[#allocation27_spill] sm:$0xff] %v5667_v60  ;;  %v5671_v51 = vsub.f32 %v7783_v4, %v7779_v20  ;;  %v1752_v53 = vsel %vm1560_vm12, %v5657_v2, 0.0  ;;  %v7786_v4 = vmov 0  ;;  %v7790_v20 = vmov 0  ;;  %v7804_v2 = vld [vmem:[#allocation26_spill] sm:$0xff] }
 0x2a4   : > { %vm1561_vm6 = vmand %vm5649_vm3, %vm3548_vm2  ;;  %3052 = vlog2.f32 %v1870_v33  ;;  %vm7789_vm3 = vcmp.eq.f32.partialorder %v5530_v46, %v3986_v42  ;;  %v1676_v33 = vmul.f32 1.442695, %v5661_v58  ;;  %7793 = vst [vmem:[#allocation198_spill] sm:$0xff] %v5706_v59  ;;  %v7801_v58 = vld [vmem:[#allocation25_spill] sm:$0xff] }
 0x2a5   : > { %7784 = vst [vmem:[#allocation28_spill] sm:$0xff] %v5671_v51  ;;  %v1753_v36 = vsel %vm1561_vm6, %v5667_v60, 0.0  ;;  %vm5688_vm5 = vmand %vm7785_vm13, %vm3542_vm1  ;;  %3054 = vlog2.f32 %v1871_v62  ;;  %v1678_v62 = vmul.f32 1.442695, %v5671_v51  ;;  %vm7794_vm13 = vcmp.eq.f32.partialorder %v5211_v44, %v3978_v0  ;;  %v7800_v51 = vld [vmem:[#allocation50_spill] sm:$0xff] }
 0x2a6   : > { %v7787_v4 = vsel %vm5688_vm5, 4294967295, %v7786_v4  ;;  %v1838_v11 = vadd.f32 %v1753_v36, %v1752_v53  ;;  %vm1311_vm12 = vmand %vm7789_vm3, %vm3548_vm2  ;;  %v2174_v57 = vsel %vm5688_vm5, 1.0, %v7481_v25  ;;  %v5732_v60 = vsub.f32 %v7801_v58, %v7800_v51 }
 0x2a7   : > { %7788 = vst [vmem:[#allocation196_spill] sm:$0xff] %v7787_v4  ;;  %vm5701_vm6 = vmand %vm1311_vm12, %vm1375_vm9  ;;  %vm7795_vm9 = vcmp.eq.f32.partialorder %v5211_v44, %v3986_v42  ;;  %v5728_v4 = vpop.eup %3048  ;;  %v5738_v44 = vpop.permute.xlu0 %1177  ;;  %3056 = vpow2.f32 %v1676_v33 }
 0x2a8   : > { %v7791_v20 = vsel %vm5701_vm6, 4294967295, %v7790_v20  ;;  %1839 = vadd.xlane.f32.xlu1 %v1838_v11  ;;  %vm1494_vm3 = vmxor %vm7794_vm13, %vm7501_vm15  ;;  %v2175_v53 = vsel %vm5701_vm6, 1.0, %v7481_v25  ;;  %7799 = vst [vmem:[#allocation200_spill] sm:$0xff] %v5728_v4  ;;  %3058 = vpow2.f32 %v1678_v62  ;;  %v1672_v36 = vmul.f32 1.442695, %v5732_v60 }
 0x2a9   : > { %7792 = vst [vmem:[#allocation197_spill] sm:$0xff] %v7791_v20  ;;  %vm5720_vm12 = vmxor %vm7795_vm9, %vm7501_vm15  ;;  %v5726_v11 = vadd.f32 %v2175_v53, %v2174_v57  ;;  %v5740_v20 = vpop.eup %3050  ;;  %v5744_v57 = vsub.f32 %v7804_v2, %v7800_v51  ;;  %vm7806_vm9 = vcmp.eq.f32.partialorder %v5629_v41, %v3978_v0  ;;  %v7807_v51 = vmov 0 }
 0x2aa   : > { %7802 = vst [vmem:[#allocation50_spill] sm:$0xff] %v5732_v60  ;;  %vm1558_vm13 = vmand %vm1494_vm3, %vm3542_vm1  ;;  %vm1387_vm3 = vcmp.ne.s32.totalorder %v7552_v8, %v5706_v59  ;;  %v7811_v59 = vmov 0  ;;  %v7817_v60 = vld [vmem:[#allocation31_spill] sm:$0xff]  ;;  %3060 = vpow2.f32 %v1672_v36 }
 0x2ab   : > { %7798 = vst [vmem:[#allocation199_spill] sm:$0xff] %v5726_v11  ;;  %7803 = vst [vmem:[#allocation25_spill] sm:$0xff] %v5740_v20  ;;  %v1750_v58 = vsel %vm1558_vm13, %v5728_v4, 0.0  ;;  %v7814_v4 = vld [vmem:[#allocation53_spill] sm:$0xff]  ;;  %v7815_v11 = vld [vmem:[#allocation30_spill] sm:$0xff] }
 0x2ac   : > { %7805 = vst [vmem:[#allocation26_spill] sm:$0xff] %v5744_v57  ;;  %vm1559_vm5 = vmand %vm5720_vm12, %vm3548_vm2  ;;  %vm7810_vm12 = vcmp.eq.f32.partialorder %v5629_v41, %v3986_v42  ;;  %v5781_v12 = vsub.f32 %v7815_v11, %v7814_v4  ;;  %v5788_v32 = vsub.f32 %v7817_v60, %v7814_v4 }
 0x2ad   : > { %v1751_v53 = vsel %vm1559_vm5, %v5740_v20, 0.0  ;;  %vm5759_vm6 = vmand %vm7806_vm9, %vm3542_vm1  ;;  %v5776_v20 = vpop.xlane.xlu0 %1773  ;;  %vm7826_vm9 = vcmp.eq.f32.partialorder %v5411_v6, %v3978_v0 }
 0x2ae   : > { %v7808_v51 = vsel %vm5759_vm6, 4294967295, %v7807_v51  ;;  %v1835_v2 = vadd.f32 %v1751_v53, %v1750_v58  ;;  %vm1323_vm13 = vmand %vm7810_vm12, %vm3548_vm2  ;;  %v2186_v33 = vsel %vm5759_vm6, 1.0, %v7481_v25  ;;  %v3053_v62 = vpop.eup %3052  ;;  %v1674_v53 = vmul.f32 1.442695, %v5744_v57  ;;  %7816 = vst [vmem:[#allocation53_spill] sm:$0xff] %v5781_v12 }
 0x2af   : > { %7809 = vst [vmem:[#allocation201_spill] sm:$0xff] %v7808_v51  ;;  %vm5772_vm5 = vmand %vm1323_vm13, %vm1387_vm3  ;;  %v3055_v58 = vpop.eup %3054  ;;  %v1937_v16 = vmul.f32 0.6931472, %v3053_v62  ;;  %v5794_v57 = vsub.f32 %v7820_v3, %v7819_v49  ;;  %v5802_v62 = vadd.s32 208, %v3955_v28  ;;  %v1684_v4 = vmul.f32 1.442695, %v5781_v12 }
 0x2b0   : > { %v7812_v59 = vsel %vm5772_vm5, 4294967295, %v7811_v59  ;;  %1836 = vadd.xlane.f32.xlu0 %v1835_v2  ;;  %v2187_v51 = vsel %vm5772_vm5, 1.0, %v7481_v25  ;;  %7818 = vst [vmem:[#allocation30_spill] sm:$0xff] %v5788_v32  ;;  %v1939_v48 = vmul.f32 0.6931472, %v3055_v58  ;;  %v7823_v2 = vld [vmem:[#allocation34_spill] sm:$0xff]  ;;  %3062 = vpow2.f32 %v1674_v53  ;;  %vm1500_vm3 = vmxor %vm7826_vm9, %vm7501_vm15 }
 0x2b1   : > { %7813 = vst [vmem:[#allocation202_spill] sm:$0xff] %v7812_v59  ;;  %v5790_v34 = vadd.f32 %v2187_v51, %v2186_v33  ;;  %7821 = vst [vmem:[#allocation31_spill] sm:$0xff] %v5794_v57  ;;  %v2062_v11 = vsub.f32 %v7822_v37, %v1937_v16  ;;  %v5799_v61 = vsub.f32 %v7823_v2, %v7819_v49  ;;  %vm7827_vm12 = vnez %v7410_v24  ;;  %v7832_v58 = vld [vmem:[#allocation55_spill] sm:$0xff] }
 0x2b2   : > { %7825 = vst [vmem:[#allocation33_spill] sm:$0xff] %v5802_v62  ;;  %v2063_v60 = vsub.f32 %v3961_v14, %v1939_v48  ;;  %v1686_v3 = vmul.f32 1.442695, %v5788_v32  ;;  %vm7828_vm13 = vcmp.eq.f32.partialorder %v5411_v6, %v3986_v42  ;;  %v5823_v14 = vpop.xlane.xlu0 %1779  ;;  %v5825_v48 = vpop.eup %3056  ;;  %v1680_v24 = vmul.f32 1.442695, %v5794_v57  ;;  %vm1564_vm9 = vmand %vm1500_vm3, %vm3542_vm1  ;;  %v7857_v32 = vld [vmem:[#allocation41_spill] sm:$0xff] }
 0x2b3   : > { %7824 = vst [vmem:[#allocation54_spill] sm:$0xff] %v5799_v61  ;;  %v2286_v37 = vsel %vm7827_vm12, %v2062_v11, 0.0  ;;  %vm5817_vm5 = vmxor %vm7828_vm13, %vm7501_vm15  ;;  %vm7257_vm12 = vcmp.eq.f32.partialorder %v5590_v35, %v3986_v42  ;;  %vm7831_vm13 = vnez %v7408_v18  ;;  %v5834_v16 = vpop.eup %3058  ;;  %v1682_v51 = vmul.f32 1.442695, %v5799_v61  ;;  %v7833_v18 = vld [vmem:[#allocation35_spill] sm:$0xff]  ;;  %v7901_v61 = vld [vmem:[#allocation40_spill] sm:$0xff] }
 0x2b4   : > { %v2287_v6 = vsel %vm7831_vm13, %v2063_v60, 0.0  ;;  %vm1565_vm6 = vmand %vm5817_vm5, %vm3548_vm2  ;;  %v1756_v33 = vsel %vm1564_vm9, %v5825_v48, 0.0  ;;  %vm1377_vm3 = vcmp.ne.s32.totalorder %v7552_v8, %v5802_v62  ;;  %3064 = vpow2.f32 %v1684_v4  ;;  %v7839_v60 = vld [vmem:[#allocation36_spill] sm:$0xff]  ;;  %v5912_v59 = vpop.eup %3060 }
 0x2b5   : > { %v5844_v36 = vadd.f32 %v2287_v6, %v2286_v37  ;;  %v5848_v53 = vsub.f32 %v7833_v18, %v7832_v58  ;;  %v1757_v11 = vsel %vm1565_vm6, %v5834_v16, 0.0  ;;  %vm7835_vm13 = vcmp.eq.f32.partialorder %v5590_v35, %v3978_v0  ;;  %vm1313_vm6 = vmand %vm7257_vm12, %vm3548_vm2 }
 0x2b6   : > { %vm5856_vm5 = vmand %vm7835_vm13, %vm3542_vm1  ;;  %v7836_v2 = vmov 0  ;;  %3066 = vpow2.f32 %v1686_v3  ;;  %v5862_v37 = vsub.f32 %v7839_v60, %v7832_v58  ;;  %v1844_v4 = vadd.f32 %v1757_v11, %v1756_v33  ;;  %v7845_v33 = vld [vmem:[#allocation56_spill] sm:$0xff]  ;;  %v7846_v58 = vld [vmem:[#allocation37_spill] sm:$0xff]  ;;  %v1783_v62 = vpop.xlane.xlu0 %1782 }
 0x2b7   : > { %7834 = vst [vmem:[#allocation58_spill] sm:$0xff] %v5848_v53  ;;  %v7837_v2 = vsel %vm5856_vm5, 4294967295, %v7836_v2  ;;  %v2176_v49 = vsel %vm5856_vm5, 1.0, %v7481_v25  ;;  %3068 = vpow2.f32 %v1680_v24  ;;  %vm5872_vm9 = vmand %vm1313_vm6, %vm1377_vm3  ;;  %v7841_v6 = vmov 0  ;;  %v7848_v11 = vld [vmem:[#allocation38_spill] sm:$0xff] }
 0x2b8   : > { %7838 = vst [vmem:[#allocation34_spill] sm:$0xff] %v7837_v2  ;;  %7840 = vst [vmem:[#allocation55_spill] sm:$0xff] %v5862_v37  ;;  %v7842_v6 = vsel %vm5872_vm9, 4294967295, %v7841_v6  ;;  %v5877_v3 = vadd.s32 216, %v3955_v28  ;;  %3070 = vpow2.f32 %v1682_v51  ;;  %v5881_v18 = vsub.f32 %v7846_v58, %v7845_v33  ;;  %1845 = vadd.xlane.f32.xlu1 %v1844_v4 }
 0x2b9   : > { %7843 = vst [vmem:[#allocation35_spill] sm:$0xff] %v7842_v6  ;;  %v5885_v60 = vsub.f32 %v7848_v11, %v7845_v33  ;;  %vm7850_vm3 = vcmp.eq.f32.partialorder %v5477_v29, %v3978_v0  ;;  %v2177_v51 = vsel %vm5872_vm9, 1.0, %v7481_v25  ;;  %vm7853_vm6 = vcmp.eq.f32.partialorder %v5477_v29, %v3986_v42  ;;  %v7856_v29 = vld [vmem:[#allocation59_spill] sm:$0xff] }
 0x2ba   : > { %7844 = vst [vmem:[#allocation36_spill] sm:$0xff] %v5877_v3  ;;  %7847 = vst [vmem:[#allocation56_spill] sm:$0xff] %v5881_v18  ;;  %v1874_v4 = vadd.f32 %v4142_v17, %v1783_v62  ;;  %v1875_v58 = vadd.f32 %v4147_v39, %v1783_v62  ;;  %v5910_v11 = vadd.f32 %v2177_v51, %v2176_v49  ;;  %v1692_v6 = vmul.f32 1.442695, %v5848_v53  ;;  %v7865_v62 = vld [vmem:[#allocation42_spill] sm:$0xff]  ;;  %v7867_v51 = vld [vmem:[#allocation43_spill] sm:$0xff] }
 0x2bb   : > { %7849 = vst [vmem:[#allocation37_spill] sm:$0xff] %v5885_v60  ;;  %vm5891_vm13 = vmxor %vm7850_vm3, %vm7501_vm15  ;;  %v1694_v2 = vmul.f32 1.442695, %v5862_v37  ;;  %v5918_v12 = vsub.f32 %v7857_v32, %v7856_v29  ;;  %vm7859_vm3 = vcmp.eq.f32.partialorder %v5547_v19, %v3978_v0  ;;  %vm7862_vm5 = vcmp.eq.f32.partialorder %v5547_v19, %v3986_v42  ;;  %v5942_v32 = vpop.eup %3062 }
 0x2bc   : > { %vm5902_vm12 = vmxor %vm7853_vm6, %vm7501_vm15  ;;  %v5946_v49 = vsub.f32 %v7865_v62, %v7856_v29  ;;  %3072 = vlog2.f32 %v1874_v4  ;;  %v1688_v24 = vmul.f32 1.442695, %v5881_v18  ;;  %v5958_v37 = vsub.f32 %v7867_v51, %v3981_v7  ;;  %v7873_v62 = vld [vmem:[#allocation44_spill] sm:$0xff] }
 0x2bd   : > { %7858 = vst [vmem:[#allocation38_spill] sm:$0xff] %v5918_v12  ;;  %vm5924_vm6 = vmxor %vm7859_vm3, %vm7501_vm15  ;;  %v7870_v33 = vmov 0  ;;  %3074 = vlog2.f32 %v1875_v58  ;;  %v1690_v4 = vmul.f32 1.442695, %v5885_v60  ;;  %v5973_v53 = vsub.f32 %v7873_v62, %v3981_v7 }
 0x2be   : > { %vm5932_vm9 = vmxor %vm7862_vm5, %vm7501_vm15  ;;  %7866 = vst [vmem:[#allocation59_spill] sm:$0xff] %v5946_v49  ;;  %3076 = vpow2.f32 %v1692_v6  ;;  %v1696_v58 = vmul.f32 1.442695, %v5918_v12  ;;  %vm7878_vm3 = vcmp.eq.f32.partialorder %v5629_v41, %v3986_v42  ;;  %v7882_v6 = vmov 0 }
 0x2bf   : > { %vm1562_vm8 = vmand %vm5891_vm13, %vm3542_vm1  ;;  %7868 = vst [vmem:[#allocation41_spill] sm:$0xff] %v5958_v37  ;;  %vm7869_vm13 = vcmp.eq.f32.partialorder %v5634_v9, %v3978_v0  ;;  %3078 = vpow2.f32 %v1694_v2  ;;  %v1698_v62 = vmul.f32 1.442695, %v5946_v49  ;;  %v1704_v2 = vmul.f32 1.442695, %v5958_v37 }
 0x2c0   : > { %vm1563_vm5 = vmand %vm5902_vm12, %vm3548_vm2  ;;  %v1754_v19 = vsel %vm1562_vm8, %v5912_v59, 0.0  ;;  %7874 = vst [vmem:[#allocation43_spill] sm:$0xff] %v5973_v53  ;;  %3080 = vpow2.f32 %v1688_v24  ;;  %v6037_v24 = vpop.xlane.xlu1 %1785 }
 0x2c1   : > { %v1755_v29 = vsel %vm1563_vm5, %v5942_v32, 0.0  ;;  %vm5966_vm12 = vmand %vm7869_vm13, %vm3542_vm1  ;;  %vm7875_vm5 = vcmp.eq.f32.partialorder %v5629_v41, %v3978_v0  ;;  %3082 = vpow2.f32 %v1690_v4 }
 0x2c2   : > { %v7871_v33 = vsel %vm5966_vm12, 4294967295, %v7870_v33  ;;  %v1841_v51 = vadd.f32 %v1755_v29, %v1754_v19  ;;  %vm1315_vm8 = vmand %vm7270_vm7, %vm3548_vm2  ;;  %v2178_v18 = vsel %vm5966_vm12, 1.0, %v7481_v25  ;;  %vm7881_vm12 = vcmp.ne.s32.totalorder %v7552_v8, %v5877_v3  ;;  %v6007_v29 = vpop.eup %3064 }
 0x2c3   : > { %7872 = vst [vmem:[#allocation42_spill] sm:$0xff] %v7871_v33  ;;  %vm5988_vm13 = vmxor %vm7875_vm5, %vm7501_vm15  ;;  %v6021_v12 = vpop.eup %3066  ;;  %v1706_v33 = vmul.f32 1.442695, %v5973_v53  ;;  %3084 = vpow2.f32 %v1696_v58  ;;  %v7898_v53 = vld [vmem:[#allocation61_spill] sm:$0xff] }
 0x2c4   : > { %vm5996_vm7 = vmxor %vm7878_vm3, %vm7501_vm15  ;;  %7885 = vst [vmem:[#allocation203_spill] sm:$0xff] %v6007_v29  ;;  %1842 = vadd.xlane.f32.xlu0 %v1841_v51  ;;  %vm7886_vm3 = vcmp.eq.f32.partialorder %v5530_v46, %v3978_v0  ;;  %v6030_v49 = vpop.eup %3068  ;;  %3086 = vpow2.f32 %v1698_v62 }
 0x2c5   : > { %vm6003_vm4 = vmand %vm1315_vm8, %vm7881_vm12  ;;  %7889 = vst [vmem:[#allocation204_spill] sm:$0xff] %v6021_v12  ;;  %vm7890_vm12 = vcmp.eq.f32.partialorder %v5530_v46, %v3986_v42  ;;  %v6039_v37 = vpop.eup %3070  ;;  %3088 = vpow2.f32 %v1704_v2  ;;  %v6072_v2 = vsub.f32 %v7901_v61, %v7898_v53 }
 0x2c6   : > { %v7883_v6 = vsel %vm6003_vm4, 4294967295, %v7882_v6  ;;  %vm6014_vm5 = vmxor %vm7886_vm3, %vm7501_vm15  ;;  %v2179_v3 = vsel %vm6003_vm4, 1.0, %v7481_v25  ;;  %v3073_v62 = vpop.eup %3072  ;;  %3090 = vpow2.f32 %v1706_v33 }
 0x2c7   : > { %7884 = vst [vmem:[#allocation44_spill] sm:$0xff] %v7883_v6  ;;  %vm1503_vm8 = vmxor %vm7890_vm12, %vm7501_vm15  ;;  %v6028_v51 = vadd.f32 %v2179_v3, %v2178_v18  ;;  %v6045_v3 = vadd.s32 224, %v3955_v28  ;;  %v7899_v6 = vld [vmem:[#allocation39_spill] sm:$0xff]  ;;  %v3075_v61 = vpop.eup %3074  ;;  %v1945_v33 = vmul.f32 0.6931472, %v3073_v62 }
 0x2c8   : > { %vm1566_vm3 = vmand %vm6014_vm5, %vm3542_vm1  ;;  %vm7892_vm5 = vcmp.eq.f32.partialorder %v5590_v35, %v3978_v0  ;;  %v6068_v60 = vsub.f32 %v7899_v6, %v7898_v53  ;;  %7902 = vst [vmem:[#allocation39_spill] sm:$0xff] %v6072_v2  ;;  %v1868_v53 = vadd.f32 %v4040_v10, %v5776_v20  ;;  %v1789_v6 = vpop.xlane.xlu0 %1788  ;;  %v1947_v4 = vmul.f32 0.6931472, %v3075_v61  ;;  %v6111_v62 = vpop.eup %3076 }
 0x2c9   : > { %vm1567_vm12 = vmand %vm1503_vm8, %vm3548_vm2  ;;  %v1758_v46 = vsel %vm1566_vm3, %v6030_v49, 0.0  ;;  %7891 = vst [vmem:[#allocation205_spill] sm:$0xff] %v6045_v3  ;;  %vm7895_vm8 = vcmp.eq.f32.partialorder %v5590_v35, %v3986_v42  ;;  %v1878_v41 = vadd.f32 %v4210_v54, %v1789_v6  ;;  %v1879_v10 = vadd.f32 %v4215_v50, %v1789_v6 }
 0x2ca   : > { %v1759_v18 = vsel %vm1567_vm12, %v6039_v37, 0.0  ;;  %vm6052_vm4 = vmxor %vm7892_vm5, %vm7501_vm15  ;;  %7900 = vst [vmem:[#allocation61_spill] sm:$0xff] %v6068_v60  ;;  %v2066_v61 = vsub.f32 %v4056_v55, %v1945_v33  ;;  %v1700_v50 = vmul.f32 1.442695, %v6068_v60  ;;  %v7908_v55 = vmov 0  ;;  %v7968_v60 = vld [vmem:[#allocation94_spill] sm:$0xff] }
 0x2cb   : > { %v1847_v58 = vadd.f32 %v1759_v18, %v1758_v46  ;;  %vm6060_vm3 = vmxor %vm7895_vm8, %vm7501_vm15  ;;  %vm1381_vm8 = vcmp.ne.s32.totalorder %v7552_v8, %v6045_v3  ;;  %v7904_v18 = vmov 0  ;;  %3092 = vlog2.f32 %v1878_v41 }
 0x2cc   : > { %vm1568_vm12 = vmand %vm6052_vm4, %vm3542_vm1  ;;  %vm7903_vm4 = vcmp.eq.f32.partialorder %v5680_v15, %v3978_v0  ;;  %v1702_v33 = vmul.f32 1.442695, %v6072_v2  ;;  %3094 = vlog2.f32 %v1879_v10  ;;  %v1795_v7 = vpop.xlane.xlu0 %1794 }
 0x2cd   : > { %1848 = vadd.xlane.f32.xlu0 %v1847_v58  ;;  %vm1569_vm5 = vmand %vm6060_vm3, %vm3548_vm2  ;;  %v1760_v35 = vsel %vm1568_vm12, %v6007_v29, 0.0  ;;  %v6107_v58 = vpop.xlane.xlu1 %1791  ;;  %vm7907_vm3 = vcmp.eq.f32.partialorder %v5680_v15, %v3986_v42  ;;  %v6124_v29 = vpop.eup %3078  ;;  %3096 = vlog2.f32 %v1868_v53 }
 0x2ce   : > { %v1761_v46 = vsel %vm1569_vm5, %v6021_v12, 0.0  ;;  %vm6103_vm0 = vmand %vm7903_vm4, %vm3542_vm1  ;;  %v1869_v12 = vadd.f32 %v4045_v40, %v5776_v20  ;;  %v6143_v40 = vadd.s32 240, %v3955_v28  ;;  %v2067_v20 = vsub.f32 %v4062_v30, %v1947_v4 }
 0x2cf   : > { %v7905_v18 = vsel %vm6103_vm0, 4294967295, %v7904_v18  ;;  %v1850_v57 = vadd.f32 %v1761_v46, %v1760_v35  ;;  %vm1317_vm12 = vmand %vm7907_vm3, %vm3548_vm2  ;;  %v2180_v54 = vsel %vm6103_vm0, 1.0, %v7481_v25  ;;  %v6146_v35 = vpop.eup %3080  ;;  %vm7912_vm4 = vcmp.eq.f32.partialorder %v5634_v9, %v3978_v0 }
 0x2d0   : > { %7906 = vst [vmem:[#allocation40_spill] sm:$0xff] %v7905_v18  ;;  %vm6138_vm3 = vmand %vm1317_vm12, %vm1381_vm8  ;;  %vm7915_vm8 = vnez %v7423_v21  ;;  %v6162_v4 = vpop.eup %3082  ;;  %vm7916_vm12 = vcmp.eq.f32.partialorder %v5634_v9, %v3986_v42  ;;  %3098 = vlog2.f32 %v1869_v12 }
 0x2d1   : > { %v7909_v55 = vsel %vm6138_vm3, 4294967295, %v7908_v55  ;;  %7911 = vst [vmem:[#allocation207_spill] sm:$0xff] %v6143_v40  ;;  %1851 = vadd.xlane.f32.xlu1 %v1850_v57  ;;  %vm6153_vm5 = vmxor %vm7912_vm4, %vm7501_vm15  ;;  %v2290_v46 = vsel %vm7915_vm8, %v2066_v61, 0.0  ;;  %v2181_v30 = vsel %vm6138_vm3, 1.0, %v7481_v25  ;;  %vm7919_vm8 = vnez %v7421_v1  ;;  %v6178_v10 = vpop.eup %3084  ;;  %v1798_v53 = vpop.xlane.xlu1 %1797 }
 0x2d2   : > { %7910 = vst [vmem:[#allocation206_spill] sm:$0xff] %v7909_v55  ;;  %vm6168_vm0 = vmxor %vm7916_vm12, %vm7501_vm15  ;;  %v2291_v21 = vsel %vm7919_vm8, %v2067_v20, 0.0  ;;  %v6176_v41 = vadd.f32 %v2181_v30, %v2180_v54  ;;  %v6188_v61 = vpop.eup %3086  ;;  %3100 = vpow2.f32 %v1700_v50  ;;  %vm1385_vm4 = vcmp.ne.s32.totalorder %v7552_v8, %v6143_v40 }
 0x2d3   : > { %vm1570_vm3 = vmand %vm6153_vm5, %vm3542_vm1  ;;  %v6186_v9 = vadd.f32 %v2291_v21, %v2290_v46  ;;  %v6197_v54 = vpop.eup %3088  ;;  %3102 = vpow2.f32 %v1702_v33  ;;  %vm7921_vm5 = vcmp.eq.f32.partialorder %v5738_v44, %v3978_v0  ;;  %v7922_v50 = vmov 0  ;;  %v7927_v33 = vld [vmem:[#allocation70_spill] sm:$0xff] }
 0x2d4   : > { %vm1571_vm8 = vmand %vm6168_vm0, %vm3548_vm2  ;;  %v1762_v1 = vsel %vm1570_vm3, %v6146_v35, 0.0  ;;  %7920 = vst [vmem:[#allocation208_spill] sm:$0xff] %v6197_v54  ;;  %v1884_v20 = vadd.f32 %v4244_v47, %v1798_v53  ;;  %v1885_v6 = vadd.f32 %v4249_v52, %v1798_v53  ;;  %v6211_v8 = vpop.eup %3090  ;;  %vm7926_vm0 = vcmp.eq.f32.partialorder %v5738_v44, %v3986_v42 }
 0x2d5   : > { %v1763_v12 = vsel %vm1571_vm8, %v6162_v4, 0.0  ;;  %vm6205_vm12 = vmand %vm7921_vm5, %vm3542_vm1  ;;  %7925 = vst [vmem:[#allocation210_spill] sm:$0xff] %v6211_v8  ;;  %v1872_v30 = vadd.f32 %v7927_v33, %v5823_v14  ;;  %v7928_v47 = vmov 0 }
 0x2d6   : > { %v7923_v50 = vsel %vm6205_vm12, 4294967295, %v7922_v50  ;;  %v1853_v46 = vadd.f32 %v1763_v12, %v1762_v1  ;;  %vm1321_vm3 = vmand %vm7926_vm0, %vm3548_vm2  ;;  %v2184_v57 = vsel %vm6205_vm12, 1.0, %v7481_v25  ;;  %3104 = vlog2.f32 %v1884_v20  ;;  %v7937_v1 = vld [vmem:[#allocation71_spill] sm:$0xff]  ;;  %v3093_v20 = vpop.eup %3092 }
 0x2d7   : > { %7924 = vst [vmem:[#allocation209_spill] sm:$0xff] %v7923_v50  ;;  %vm6223_vm8 = vmand %vm1321_vm3, %vm1385_vm4  ;;  %vm7933_vm4 = vcmp.eq.f32.partialorder %v5680_v15, %v3978_v0  ;;  %3106 = vlog2.f32 %v1885_v6  ;;  %v1873_v53 = vadd.f32 %v7937_v1, %v5823_v14  ;;  %v7944_v1 = vld [vmem:[#allocation90_spill] sm:$0xff]  ;;  %v7948_v50 = vld [vmem:[#allocation76_spill] sm:$0xff] }
 0x2d8   : > { %v7929_v47 = vsel %vm6223_vm8, 4294967295, %v7928_v47  ;;  %vm7931_vm5 = vmand %vm5924_vm6, %vm3542_vm1  ;;  %1854 = vadd.xlane.f32.xlu0 %v1853_v46  ;;  %v2185_v17 = vsel %vm6223_vm8, 1.0, %v7481_v25  ;;  %vm7934_vm6 = vcmp.eq.f32.partialorder %v5680_v15, %v3986_v42  ;;  %3108 = vlog2.f32 %v1872_v30  ;;  %v3095_v46 = vpop.eup %3094 }
 0x2d9   : > { %7930 = vst [vmem:[#allocation70_spill] sm:$0xff] %v7929_v47  ;;  %v1766_v52 = vsel %vm7931_vm5, %v6178_v10, 0.0  ;;  %vm7932_vm0 = vmand %vm5932_vm9, %vm3548_vm2  ;;  %v6256_v12 = vadd.f32 %v2185_v17, %v2184_v57  ;;  %v1953_v30 = vmul.f32 0.6931472, %v3093_v20  ;;  %v3097_v57 = vpop.eup %3096  ;;  %v7943_v17 = vld [vmem:[#allocation89_spill] sm:$0xff]  ;;  %v1883_v40 = vadd.f32 %v7944_v1, %v1795_v7 }
 0x2da   : > { %v1767_v21 = vsel %vm7932_vm0, %v6188_v61, 0.0  ;;  %vm1508_vm3 = vmxor %vm7933_vm4, %vm7501_vm15  ;;  %v1882_v39 = vadd.f32 %v7943_v17, %v1795_v7  ;;  %v3099_v3 = vpop.eup %3098  ;;  %v6297_v47 = vadd.s32 16, %v3955_v28  ;;  %3110 = vlog2.f32 %v1873_v53  ;;  %v7952_v53 = vld [vmem:[#allocation112_spill] sm:$0xff]  ;;  %v7956_v17 = vld [vmem:[#allocation109_spill] sm:$0xff] }
 0x2db   : > { %vm6250_vm5 = vmxor %vm7934_vm6, %vm7501_vm15  ;;  %v1859_v6 = vadd.f32 %v1767_v21, %v1766_v52  ;;  %v1955_v21 = vmul.f32 0.6931472, %v3095_v46  ;;  %v2070_v46 = vsub.f32 %v7948_v50, %v1953_v30  ;;  %v7954_v30 = vld [vmem:[#allocation65_spill] sm:$0xff]  ;;  %v1933_v19 = vmul.f32 0.6931472, %v3097_v57 }
 0x2dc   : > { %vm1572_vm9 = vmand %vm1508_vm3, %vm3542_vm1  ;;  %v6300_v2 = vpop.eup %3100  ;;  %3112 = vlog2.f32 %v1882_v39  ;;  %v6338_v57 = vadd.s32 32, %v3955_v28 }
 0x2dd   : > { %vm7938_vm0 = vmand %vm5988_vm13, %vm3542_vm1  ;;  %v1764_v33 = vsel %vm1572_vm9, %v6111_v62, 0.0  ;;  %1860 = vadd.xlane.f32.xlu0 %v1859_v6  ;;  %vm7940_vm13 = vcmp.eq.f32.partialorder %v5738_v44, %v3978_v0  ;;  %7949 = vst [vmem:[#allocation71_spill] sm:$0xff] %v6300_v2  ;;  %3114 = vlog2.f32 %v1883_v40 }
 0x2de   : > { %v1770_v15 = vsel %vm7938_vm0, %v6197_v54, 0.0  ;;  %vm7939_vm4 = vmand %vm5996_vm7, %vm3548_vm2  ;;  %vm7945_vm7 = vcmp.eq.f32.partialorder %v5738_v44, %v3986_v42  ;;  %v7950_v44 = vld [vmem:[#allocation77_spill] sm:$0xff]  ;;  %vm1324_vm0 = vcmp.ne.s32.totalorder %v3532_v23, %v3955_v28  ;;  %vm7988_vm8 = vcmp.ne.s32.totalorder %v3532_v23, %v6338_v57 }
 0x2df   : > { %v1771_v14 = vsel %vm7939_vm4, %v6211_v8, 0.0  ;;  %vm1573_vm3 = vmand %vm6250_vm5, %vm3548_vm2  ;;  %v2071_v7 = vsub.f32 %v7950_v44, %v1955_v21  ;;  %vm7953_vm4 = vnez %v7952_v53  ;;  %v1935_v21 = vmul.f32 0.6931472, %v3099_v3 }
 0x2e0   : > { %v1765_v52 = vsel %vm1573_vm3, %v6124_v29, 0.0  ;;  %vm6282_vm6 = vmxor %vm7940_vm13, %vm7501_vm15  ;;  %vm7955_vm3 = vcmp.eq.f32.partialorder %v7954_v30, %v3978_v0  ;;  %v6353_v44 = vadd.s32 48, %v3955_v28 }
 0x2e1   : > { %v1856_v20 = vadd.f32 %v1765_v52, %v1764_v33  ;;  %vm6292_vm5 = vmxor %vm7945_vm7, %vm7501_vm15  ;;  %v1865_v33 = vadd.f32 %v1771_v14, %v1770_v15  ;;  %v6307_v52 = vpop.eup %3102  ;;  %v2294_v15 = vsel %vm7953_vm4, %v2070_v46, 0.0  ;;  %vm7958_vm7 = vcmp.eq.f32.partialorder %v7954_v30, %v3986_v42  ;;  %v7965_v30 = vld [vmem:[#allocation68_spill] sm:$0xff] }
 0x2e2   : > { %vm1576_vm9 = vmand %vm6282_vm6, %vm3542_vm1  ;;  %7951 = vst [vmem:[#allocation89_spill] sm:$0xff] %v6307_v52  ;;  %vm7957_vm6 = vnez %v7956_v17  ;;  %v3105_v1 = vpop.eup %3104 }
 0x2e3   : > { %1857 = vadd.xlane.f32.xlu1 %v1856_v20  ;;  %vm1577_vm15 = vmand %vm6292_vm5, %vm3548_vm2  ;;  %v1768_v50 = vsel %vm1576_vm9, %v6300_v2, 0.0  ;;  %1866 = vadd.xlane.f32.xlu0 %v1865_v33  ;;  %v2295_v39 = vsel %vm7957_vm6, %v2071_v7, 0.0  ;;  %vm1328_vm9 = vcmp.ne.s32.totalorder %v3532_v23, %v6297_v47  ;;  %v3107_v6 = vpop.eup %3106  ;;  %7963 = vst [vmem:[#allocation90_spill] sm:$0xff] %v6353_v44  ;;  %v7964_v7 = vld [vmem:[#allocation74_spill] sm:$0xff]  ;;  %v1965_v53 = vmul.f32 0.6931472, %v3105_v1 }
 0x2e4   : > { %v1769_v14 = vsel %vm1577_vm15, %v6307_v52, 0.0  ;;  %vm1260_vm13 = vmand %vm7955_vm3, %vm3542_vm1  ;;  %v6340_v3 = vadd.f32 %v2295_v39, %v2294_v15  ;;  %v1804_v15 = vpop.xlane.xlu1 %1803  ;;  %v1967_v17 = vmul.f32 0.6931472, %v3107_v6  ;;  %v7967_v39 = vld [vmem:[#allocation93_spill] sm:$0xff]  ;;  %v3109_v18 = vpop.eup %3108  ;;  %vm7970_vm3 = vcmp.eq.f32.partialorder %v7965_v30, %v3986_v42  ;;  %v7974_v6 = vld [vmem:[#allocation60_spill] sm:$0xff] }
 0x2e5   : > { %v1862_v20 = vadd.f32 %v1769_v14, %v1768_v50  ;;  %vm6331_vm5 = vmand %vm7958_vm7, %vm3548_vm2  ;;  %v1876_v50 = vadd.f32 %v7964_v7, %v6037_v24  ;;  %v1888_v28 = vadd.f32 %v7967_v39, %v1804_v15  ;;  %v1889_v55 = vadd.f32 %v7968_v60, %v1804_v15  ;;  %v7969_v7 = vld [vmem:[#allocation120_spill] sm:$0xff]  ;;  %v7975_v39 = vld [vmem:[#allocation62_spill] sm:$0xff] }
 0x2e6   : > { %vm6345_vm15 = vmand %vm1260_vm13, %vm1324_vm0  ;;  %v2125_v33 = vsel %vm6331_vm5, 1.0, %v7481_v25  ;;  %vm7966_vm0 = vcmp.eq.f32.partialorder %v7965_v30, %v3978_v0  ;;  %v2060_v2 = vsub.f32 %v7974_v6, %v1933_v19  ;;  %v2061_v8 = vsub.f32 %v7975_v39, %v1935_v21  ;;  %v7976_v60 = vld [vmem:[#allocation79_spill] sm:$0xff]  ;;  %v7979_v21 = vld [vmem:[#allocation69_spill] sm:$0xff] }
 0x2e7   : > { %1863 = vadd.xlane.f32.xlu1 %v1862_v20  ;;  %v2124_v14 = vsel %vm6345_vm15, 1.0, %v7481_v25  ;;  %vm1264_vm4 = vmand %vm7966_vm0, %vm3542_vm1  ;;  %2192 = vadd.xlane.f32.xlu0 %v7969_v7  ;;  %v7973_v20 = vld [vmem:[#allocation75_spill] sm:$0xff]  ;;  %v2076_v15 = vsub.f32 %v7976_v60, %v1965_v53  ;;  %3116 = vlog2.f32 %v1888_v28  ;;  %vm1336_vm7 = vcmp.ne.s32.totalorder %v3532_v23, %v6353_v44  ;;  %v7991_v39 = vld [vmem:[#allocation122_spill] sm:$0xff] }
 0x2e8   : > { %vm6373_vm13 = vmand %vm7970_vm3, %vm3548_vm2  ;;  %v1877_v52 = vadd.f32 %v7973_v20, %v6037_v24  ;;  %v2188_v54 = vadd.f32 %v2125_v33, %v2124_v14  ;;  %3118 = vlog2.f32 %v1889_v55  ;;  %v7981_v33 = vld [vmem:[#allocation80_spill] sm:$0xff]  ;;  %v3111_v14 = vpop.eup %3110  ;;  %v7985_v30 = vld [vmem:[#allocation123_spill] sm:$0xff]  ;;  %v2284_v6 = vsel %vm6345_vm15, %v2060_v2, 0.0  ;;  %v1801_v2 = vpop.xlane.xlu0 %1800 }
 0x2e9   : > { %vm6385_vm6 = vmand %vm1264_vm4, %vm1328_vm9  ;;  %v2129_v19 = vsel %vm6373_vm13, 1.0, %v7481_v25  ;;  %vm7980_vm9 = vcmp.eq.f32.partialorder %v7979_v21, %v3978_v0  ;;  %v2077_v53 = vsub.f32 %v7981_v33, %v1967_v17  ;;  %vm7982_vm4 = vcmp.eq.f32.partialorder %v7979_v21, %v3986_v42  ;;  %v3113_v20 = vpop.eup %3112  ;;  %v7987_v17 = vld [vmem:[#allocation127_spill] sm:$0xff]  ;;  %v8007_v44 = vld [vmem:[#allocation118_spill] sm:$0xff] }
 0x2ea   : > { %v2128_v24 = vsel %vm6385_vm6, 1.0, %v7481_v25  ;;  %vm1268_vm0 = vmand %vm7980_vm9, %vm3542_vm1  ;;  %3120 = vlog2.f32 %v1876_v50  ;;  %vm7986_vm9 = vnez %v7985_v30  ;;  %v2285_v50 = vsel %vm6331_vm5, %v2061_v8, 0.0  ;;  %v7993_v30 = vld [vmem:[#allocation78_spill] sm:$0xff]  ;;  %v8020_v1 = vld [vmem:[#allocation117_spill] sm:$0xff] }
 0x2eb   : > { %2189 = vadd.xlane.f32.xlu1 %v2188_v54  ;;  %vm6408_vm3 = vmand %vm7982_vm4, %vm3548_vm2  ;;  %v2300_v55 = vsel %vm7986_vm9, %v2076_v15, 0.0  ;;  %2198 = vadd.xlane.f32.xlu0 %v7987_v17  ;;  %3122 = vlog2.f32 %v1877_v52  ;;  %vm7992_vm4 = vnez %v7991_v39  ;;  %v3115_v15 = vpop.eup %3114  ;;  %v2194_v21 = vadd.f32 %v2129_v19, %v2128_v24  ;;  %v7999_v19 = vld [vmem:[#allocation100_spill] sm:$0xff]  ;;  %v8003_v39 = vld [vmem:[#allocation83_spill] sm:$0xff] }
 0x2ec   : > { %vm6420_vm12 = vmand %vm1268_vm0, %vm7988_vm8  ;;  %v2301_v60 = vsel %vm7992_vm4, %v2077_v53, 0.0  ;;  %v2133_v33 = vsel %vm6408_vm3, 1.0, %v7481_v25  ;;  %vm7994_vm8 = vcmp.eq.f32.partialorder %v7993_v30, %v3978_v0  ;;  %v1961_v52 = vmul.f32 0.6931472, %v3113_v20  ;;  %v7998_v0 = vld [vmem:[#allocation99_spill] sm:$0xff]  ;;  %v1807_v7 = vpop.xlane.xlu0 %1806  ;;  %v8036_v54 = vld [vmem:[#allocation92_spill] sm:$0xff] }
 0x2ed   : > { %vm1272_vm0 = vmand %vm7994_vm8, %vm3542_vm1  ;;  %v6438_v46 = vadd.f32 %v2301_v60, %v2300_v55  ;;  %v2132_v8 = vsel %vm6420_vm12, 1.0, %v7481_v25  ;;  %vm7995_vm5 = vcmp.eq.f32.partialorder %v7993_v30, %v3986_v42  ;;  %v1963_v26 = vmul.f32 0.6931472, %v3115_v15  ;;  %v8002_v42 = vld [vmem:[#allocation81_spill] sm:$0xff]  ;;  %v8004_v15 = vld [vmem:[#allocation136_spill] sm:$0xff] }
 0x2ee   : > { %vm6448_vm15 = vmand %vm7995_vm5, %vm3548_vm2  ;;  %v1886_v24 = vadd.f32 %v7998_v0, %v1801_v2  ;;  %v1887_v53 = vadd.f32 %v7999_v19, %v1801_v2  ;;  %v1941_v27 = vmul.f32 0.6931472, %v3109_v18  ;;  %v1943_v20 = vmul.f32 0.6931472, %v3111_v14  ;;  %v8005_v30 = vld [vmem:[#allocation82_spill] sm:$0xff]  ;;  %v8006_v0 = vld [vmem:[#allocation84_spill] sm:$0xff] }
 0x2ef   : > { %2195 = vadd.xlane.f32.xlu1 %v2194_v21  ;;  %vm6457_vm1 = vmand %vm1272_vm0, %vm1336_vm7  ;;  %v1880_v17 = vadd.f32 %v8002_v42, %v6107_v58  ;;  %v2074_v60 = vsub.f32 %v8003_v39, %v1961_v52  ;;  %2204 = vadd.xlane.f32.xlu0 %v8004_v15  ;;  %v1881_v2 = vadd.f32 %v8005_v30, %v6107_v58  ;;  %v2137_v52 = vsel %vm6448_vm15, 1.0, %v7481_v25  ;;  %v8009_v42 = vld [vmem:[#allocation116_spill] sm:$0xff] }
 0x2f0   : > { %3124 = vlog2.f32 %v1886_v24  ;;  %v2348_v21 = vadd.f32 %v2285_v50, %v2284_v6  ;;  %v2075_v23 = vsub.f32 %v8006_v0, %v1963_v26  ;;  %v2200_v19 = vadd.f32 %v2133_v33, %v2132_v8  ;;  %v1810_v33 = vpop.xlane.xlu1 %1809  ;;  %v8011_v8 = vld [vmem:[#allocation63_spill] sm:$0xff]  ;;  %v8013_v30 = vld [vmem:[#allocation104_spill] sm:$0xff] }
 0x2f1   : > { %3126 = vlog2.f32 %v1887_v53  ;;  %vm8008_vm2 = vnez %v8007_v44  ;;  %v2136_v14 = vsel %vm6457_vm1, 1.0, %v7481_v25  ;;  %vm8010_vm7 = vnez %v8009_v42  ;;  %v3117_v24 = vpop.eup %3116  ;;  %v8012_v53 = vld [vmem:[#allocation64_spill] sm:$0xff] }
 0x2f2   : > { %v2298_v18 = vsel %vm8008_vm2, %v2074_v60, 0.0  ;;  %v2299_v58 = vsel %vm8010_vm7, %v2075_v23, 0.0  ;;  %3128 = vlog2.f32 %v1880_v17  ;;  %v3119_v50 = vpop.eup %3118  ;;  %v1973_v44 = vmul.f32 0.6931472, %v3117_v24  ;;  %v8014_v23 = vld [vmem:[#allocation106_spill] sm:$0xff]  ;;  %v8015_v17 = vld [vmem:[#allocation85_spill] sm:$0xff] }
 0x2f3   : > { %2201 = vadd.xlane.f32.xlu1 %v2200_v19  ;;  %v6478_v6 = vadd.f32 %v2299_v58, %v2298_v18  ;;  %3130 = vlog2.f32 %v1881_v2  ;;  %2349 = vadd.xlane.f32.xlu0 %v2348_v21  ;;  %v2064_v26 = vsub.f32 %v8011_v8, %v1941_v27  ;;  %v2065_v39 = vsub.f32 %v8012_v53, %v1943_v20  ;;  %v8016_v2 = vld [vmem:[#allocation86_spill] sm:$0xff]  ;;  %v8017_v21 = vld [vmem:[#allocation139_spill] sm:$0xff]  ;;  %v8037_v28 = vld [vmem:[#allocation72_spill] sm:$0xff] }
 0x2f4   : > { %v3121_v60 = vpop.eup %3120  ;;  %v2206_v15 = vadd.f32 %v2137_v52, %v2136_v14  ;;  %v1975_v25 = vmul.f32 0.6931472, %v3119_v50  ;;  %v1892_v0 = vadd.f32 %v8013_v30, %v1810_v33  ;;  %v1893_v42 = vadd.f32 %v8014_v23, %v1810_v33  ;;  %v8022_v30 = vld [vmem:[#allocation87_spill] sm:$0xff]  ;;  %v8023_v23 = vld [vmem:[#allocation66_spill] sm:$0xff] }
 0x2f5   : > { %v3123_v19 = vpop.eup %3122  ;;  %v2080_v18 = vsub.f32 %v8015_v17, %v1973_v44  ;;  %v2288_v27 = vsel %vm6385_vm6, %v2064_v26, 0.0  ;;  %v2289_v20 = vsel %vm6373_vm13, %v2065_v39, 0.0  ;;  %vm8018_vm9 = vnez %v7508_v22 }
 0x2f6   : > { %3132 = vlog2.f32 %v1892_v0  ;;  %v2081_v58 = vsub.f32 %v8016_v2, %v1975_v25  ;;  %vm8019_vm4 = vnez %v7499_v56  ;;  %v1949_v50 = vmul.f32 0.6931472, %v3121_v60  ;;  %v8021_v25 = vld [vmem:[#allocation121_spill] sm:$0xff]  ;;  %v8026_v2 = vld [vmem:[#allocation126_spill] sm:$0xff] }
 0x2f7   : > { %2207 = vadd.xlane.f32.xlu1 %v2206_v15  ;;  %3134 = vlog2.f32 %v1893_v42  ;;  %2210 = vadd.xlane.f32.xlu0 %v8017_v21  ;;  %v2304_v14 = vsel %vm8018_vm9, %v2080_v18, 0.0  ;;  %v1951_v44 = vmul.f32 0.6931472, %v3123_v19  ;;  %v2354_v26 = vadd.f32 %v2289_v20, %v2288_v27  ;;  %v8024_v19 = vld [vmem:[#allocation67_spill] sm:$0xff]  ;;  %v8028_v21 = vld [vmem:[#allocation148_spill] sm:$0xff]  ;;  %v8029_v27 = vld [vmem:[#allocation125_spill] sm:$0xff] }
 0x2f8   : > { %v2305_v52 = vsel %vm8019_vm4, %v2081_v58, 0.0  ;;  %v1890_v39 = vadd.f32 %v8020_v1, %v1807_v7  ;;  %v1891_v22 = vadd.f32 %v8021_v25, %v1807_v7  ;;  %v2068_v42 = vsub.f32 %v8023_v23, %v1949_v50 }
 0x2f9   : > { %v6495_v33 = vadd.f32 %v2305_v52, %v2304_v14  ;;  %v2069_v17 = vsub.f32 %v8024_v19, %v1951_v44  ;;  %vm8027_vm13 = vnez %v8026_v2  ;;  %vm8030_vm6 = vnez %v8029_v27  ;;  %v1816_v44 = vpop.xlane.xlu1 %1815 }
 0x2fa   : > { %v3125_v24 = vpop.eup %3124  ;;  %3136 = vlog2.f32 %v1890_v39  ;;  %v8032_v39 = vld [vmem:[#allocation134_spill] sm:$0xff]  ;;  %vm8053_vm5 = vnez %v7578_v45 }
 0x2fb   : > { %v3127_v8 = vpop.eup %3126  ;;  %2352 = vadd.xlane.f32.xlu1 %v5844_v36  ;;  %v1969_v53 = vmul.f32 0.6931472, %v3125_v24  ;;  %2213 = vadd.xlane.f32.xlu0 %v4978_v63  ;;  %v8025_v36 = vld [vmem:[#allocation88_spill] sm:$0xff]  ;;  %3138 = vlog2.f32 %v1891_v22  ;;  %v2293_v7 = vsel %vm6408_vm3, %v2069_v17, 0.0  ;;  %v1897_v25 = vadd.f32 %v8032_v39, %v1816_v44 }
 0x2fc   : > { %v1971_v15 = vmul.f32 0.6931472, %v3127_v8  ;;  %v3129_v56 = vpop.eup %3128  ;;  %v8033_v22 = vld [vmem:[#allocation152_spill] sm:$0xff]  ;;  %vm8039_vm3 = vnez %v7534_v38 }
 0x2fd   : > { %v2078_v0 = vsub.f32 %v8022_v30, %v1969_v53  ;;  %v3131_v60 = vpop.eup %3130  ;;  %v1957_v50 = vmul.f32 0.6931472, %v3129_v56  ;;  %v2292_v53 = vsel %vm6420_vm12, %v2068_v42, 0.0  ;;  %v8034_v30 = vld [vmem:[#allocation91_spill] sm:$0xff]  ;;  %vm8038_vm12 = vnez %v7542_v43  ;;  %v8041_v43 = vld [vmem:[#allocation144_spill] sm:$0xff] }
 0x2fe   : > { %v2079_v18 = vsub.f32 %v8025_v36, %v1971_v15  ;;  %v1959_v14 = vmul.f32 0.6931472, %v3131_v60  ;;  %v8031_v15 = vld [vmem:[#allocation130_spill] sm:$0xff]  ;;  %v2360_v56 = vadd.f32 %v2293_v7, %v2292_v53  ;;  %v8035_v60 = vld [vmem:[#allocation73_spill] sm:$0xff]  ;;  %v8045_v7 = vld [vmem:[#allocation135_spill] sm:$0xff] }
 0x2ff   : > { %2355 = vadd.xlane.f32.xlu1 %v2354_v26  ;;  %v2302_v58 = vsel %vm8027_vm13, %v2078_v0, 0.0  ;;  %2216 = vadd.xlane.f32.xlu0 %v8028_v21  ;;  %v1896_v1 = vadd.f32 %v8031_v15, %v1816_v44  ;;  %v2072_v19 = vsub.f32 %v8037_v28, %v1957_v50  ;;  %v1813_v21 = vpop.xlane.xlu0 %1812  ;;  %v8042_v50 = vld [vmem:[#allocation96_spill] sm:$0xff]  ;;  %v8044_v44 = vld [vmem:[#allocation97_spill] sm:$0xff]  ;;  %vm8046_vm8 = vnez %v8045_v7  ;;  %v8047_v15 = vld [vmem:[#allocation131_spill] sm:$0xff] }
 0x300   : > { %v2303_v63 = vsel %vm8030_vm6, %v2079_v18, 0.0  ;;  %v3133_v20 = vpop.eup %3132  ;;  %v2073_v23 = vsub.f32 %v8035_v60, %v1959_v14  ;;  %vm8048_vm0 = vnez %v8047_v15  ;;  %v8050_v60 = vld [vmem:[#allocation146_spill] sm:$0xff]  ;;  %v8052_v28 = vld [vmem:[#allocation103_spill] sm:$0xff] }
 0x301   : > { %v6510_v52 = vadd.f32 %v2303_v63, %v2302_v58  ;;  %v3135_v24 = vpop.eup %3134  ;;  %v1981_v8 = vmul.f32 0.6931472, %v3133_v20  ;;  %3140 = vlog2.f32 %v1896_v1  ;;  %v8040_v20 = vld [vmem:[#allocation143_spill] sm:$0xff]  ;;  %v2296_v38 = vsel %vm6457_vm1, %v2072_v19, 0.0 }
 0x302   : > { %v1983_v26 = vmul.f32 0.6931472, %v3135_v24  ;;  %3142 = vlog2.f32 %v1897_v25  ;;  %v2297_v27 = vsel %vm6448_vm15, %v2073_v23, 0.0  ;;  %v1894_v14 = vadd.f32 %v8040_v20, %v1813_v21 }
 0x303   : > { %2358 = vadd.xlane.f32.xlu1 %v6186_v9  ;;  %2219 = vadd.xlane.f32.xlu0 %v8033_v22  ;;  %v2084_v0 = vsub.f32 %v8034_v30, %v1981_v8  ;;  %v1895_v24 = vadd.f32 %v8041_v43, %v1813_v21  ;;  %v8043_v8 = vld [vmem:[#allocation158_spill] sm:$0xff]  ;;  %v2366_v40 = vadd.f32 %v2297_v27, %v2296_v38  ;;  %v1822_v22 = vpop.xlane.xlu1 %1821  ;;  %v8060_v38 = vld [vmem:[#allocation115_spill] sm:$0xff] }
 0x304   : > { %v2085_v42 = vsub.f32 %v8036_v54, %v1983_v26  ;;  %v3137_v36 = vpop.eup %3136  ;;  %3144 = vlog2.f32 %v1894_v14  ;;  %v1901_v23 = vadd.f32 %v8050_v60, %v1822_v22  ;;  %v8051_v54 = vld [vmem:[#allocation101_spill] sm:$0xff]  ;;  %v8070_v60 = vld [vmem:[#allocation114_spill] sm:$0xff] }
 0x305   : > { %v2308_v17 = vsel %vm8038_vm12, %v2084_v0, 0.0  ;;  %v3139_v2 = vpop.eup %3138  ;;  %v1977_v58 = vmul.f32 0.6931472, %v3137_v36  ;;  %3146 = vlog2.f32 %v1895_v24  ;;  %v8049_v0 = vld [vmem:[#allocation140_spill] sm:$0xff]  ;;  %v8057_v14 = vld [vmem:[#allocation165_spill] sm:$0xff] }
 0x306   : > { %v2309_v9 = vsel %vm8039_vm3, %v2085_v42, 0.0  ;;  %v1979_v63 = vmul.f32 0.6931472, %v3139_v2  ;;  %v8058_v24 = vld [vmem:[#allocation164_spill] sm:$0xff] }
 0x307   : > { %2361 = vadd.xlane.f32.xlu1 %v2360_v56  ;;  %2222 = vadd.xlane.f32.xlu0 %v5131_v13  ;;  %v6529_v18 = vadd.f32 %v2309_v9, %v2308_v17  ;;  %v2082_v13 = vsub.f32 %v8042_v50, %v1977_v58  ;;  %v1900_v56 = vadd.f32 %v8049_v0, %v1822_v22  ;;  %v8054_v9 = vld [vmem:[#allocation141_spill] sm:$0xff]  ;;  %v8067_v22 = vld [vmem:[#allocation172_spill] sm:$0xff] }
 0x308   : > { %v2083_v53 = vsub.f32 %v8044_v44, %v1979_v63  ;;  %vm8055_vm15 = vnez %v8054_v9  ;;  %v1819_v27 = vpop.xlane.xlu0 %1818  ;;  %v8063_v44 = vld [vmem:[#allocation167_spill] sm:$0xff]  ;;  %v8069_v0 = vld [vmem:[#allocation108_spill] sm:$0xff]  ;;  %v8074_v9 = vld [vmem:[#allocation170_spill] sm:$0xff] }
 0x309   : > { %v2306_v26 = vsel %vm8046_vm8, %v2082_v13, 0.0  ;;  %3148 = vlog2.f32 %v1900_v56  ;;  %v1899_v43 = vadd.f32 %v8057_v14, %v1819_v27  ;;  %v8061_v13 = vld [vmem:[#allocation13_spill] sm:$0xff]  ;;  %v8077_v14 = vld [vmem:[#allocation52_spill] sm:$0xff] }
 0x30a   : > { %v2307_v1 = vsel %vm8048_vm0, %v2083_v53, 0.0  ;;  %3150 = vlog2.f32 %v1901_v23  ;;  %vm8062_vm1 = vnez %v8061_v13 }
 0x30b   : > { %2364 = vadd.xlane.f32.xlu1 %v6340_v3  ;;  %2225 = vadd.xlane.f32.xlu0 %v8043_v8  ;;  %v3141_v39 = vpop.eup %3140  ;;  %v2381_v55 = vadd.f32 %v2307_v1, %v2306_v26 }
 0x30c   : > { %v3143_v25 = vpop.eup %3142  ;;  %v1989_v3 = vmul.f32 0.6931472, %v3141_v39 }
 0x30d   : > { %v1991_v30 = vmul.f32 0.6931472, %v3143_v25  ;;  %v8066_v25 = vld [vmem:[#allocation171_spill] sm:$0xff] }
 0x30e   : > { %v2088_v42 = vsub.f32 %v8051_v54, %v1989_v3  ;;  %v3145_v36 = vpop.eup %3144  ;;  %v8071_v54 = vld [vmem:[#allocation149_spill] sm:$0xff] }
 0x30f   : > { %2367 = vadd.xlane.f32.xlu1 %v2366_v40  ;;  %2228 = vadd.xlane.f32.xlu0 %v5213_v5  ;;  %v2089_v19 = vsub.f32 %v8052_v28, %v1991_v30  ;;  %v3147_v58 = vpop.eup %3146  ;;  %v1985_v21 = vmul.f32 0.6931472, %v3145_v36  ;;  %vm8072_vm7 = vnez %v8071_v54 }
 0x310   : > { %v2312_v17 = vsel %vm8053_vm5, %v2088_v42, 0.0  ;;  %v1987_v63 = vmul.f32 0.6931472, %v3147_v58 }
 0x311   : > { %v2313_v5 = vsel %vm8055_vm15, %v2089_v19, 0.0  ;;  %v1828_v1 = vpop.xlane.xlu1 %1827 }
 0x312   : > { %v2390_v2 = vadd.f32 %v2313_v5, %v2312_v17  ;;  %v2087_v50 = vsub.f32 %v8060_v38, %v1987_v63  ;;  %v1904_v3 = vadd.f32 %v8066_v25, %v1828_v1  ;;  %v1905_v30 = vadd.f32 %v8067_v22, %v1828_v1 }
 0x313   : > { %2370 = vadd.xlane.f32.xlu1 %v6478_v6  ;;  %2231 = vadd.xlane.f32.xlu0 %v5252_v31  ;;  %v8056_v6 = vld [vmem:[#allocation163_spill] sm:$0xff]  ;;  %v3149_v40 = vpop.eup %3148 }
 0x314   : > { %v1898_v20 = vadd.f32 %v8056_v6, %v1819_v27  ;;  %v8059_v31 = vld [vmem:[#allocation111_spill] sm:$0xff]  ;;  %v3151_v26 = vpop.eup %3150  ;;  %v1997_v15 = vmul.f32 0.6931472, %v3149_v40  ;;  %v8075_v27 = vld [vmem:[#allocation178_spill] sm:$0xff]  ;;  %v8076_v6 = vld [vmem:[#allocation180_spill] sm:$0xff] }
 0x315   : > { %v2086_v45 = vsub.f32 %v8059_v31, %v1985_v21  ;;  %v1999_v39 = vmul.f32 0.6931472, %v3151_v26  ;;  %v8084_v40 = vld [vmem:[#allocation17_spill] sm:$0xff] }
 0x316   : > { %3152 = vlog2.f32 %v1898_v20  ;;  %v2092_v56 = vsub.f32 %v8069_v0, %v1997_v15  ;;  %v8085_v15 = vld [vmem:[#allocation185_spill] sm:$0xff] }
 0x317   : > { %2373 = vadd.xlane.f32.xlu1 %v6438_v46  ;;  %2234 = vadd.xlane.f32.xlu0 %v8058_v24  ;;  %3154 = vlog2.f32 %v1899_v43  ;;  %v2310_v8 = vsel %vm8062_vm1, %v2086_v45, 0.0  ;;  %v8064_v46 = vld [vmem:[#allocation32_spill] sm:$0xff]  ;;  %v2093_v23 = vsub.f32 %v8070_v60, %v1999_v39  ;;  %v8080_v45 = vld [vmem:[#allocation147_spill] sm:$0xff]  ;;  %v8089_v0 = vld [vmem:[#allocation177_spill] sm:$0xff] }
 0x318   : > { %vm8065_vm2 = vnez %v8064_v46  ;;  %3156 = vlog2.f32 %v1904_v3  ;;  %v2316_v42 = vsel %vm8072_vm7, %v2092_v56, 0.0  ;;  %v8079_v24 = vld [vmem:[#allocation16_spill] sm:$0xff]  ;;  %v8086_v39 = vld [vmem:[#allocation23_spill] sm:$0xff]  ;;  %v8087_v3 = vld [vmem:[#allocation137_spill] sm:$0xff] }
 0x319   : > { %v2311_v53 = vsel %vm8065_vm2, %v2087_v50, 0.0  ;;  %3158 = vlog2.f32 %v1905_v30  ;;  %v2317_v19 = vsel %vm7676_vm14, %v2093_v23, 0.0  ;;  %vm8081_vm14 = vnez %v8080_v45  ;;  %v8082_v50 = vld [vmem:[#allocation145_spill] sm:$0xff] }
 0x31a   : > { %v2387_v7 = vadd.f32 %v2311_v53, %v2310_v8  ;;  %v2396_v5 = vadd.f32 %v2317_v19, %v2316_v42  ;;  %v1825_v58 = vpop.xlane.xlu0 %1824  ;;  %vm8083_vm9 = vnez %v8082_v50  ;;  %v8088_v30 = vld [vmem:[#allocation29_spill] sm:$0xff] }
 0x31b   : > { %2376 = vadd.xlane.f32.xlu1 %v6510_v52  ;;  %2237 = vadd.xlane.f32.xlu0 %v8063_v44  ;;  %v8068_v52 = vld [vmem:[#allocation169_spill] sm:$0xff]  ;;  %v1902_v63 = vadd.f32 %v8075_v27, %v1825_v58  ;;  %v1903_v20 = vadd.f32 %v8076_v6, %v1825_v58  ;;  %v8097_v6 = vld [vmem:[#allocation15_spill] sm:$0xff] }
 0x31c   : > { %v8096_v27 = vld [vmem:[#allocation45_spill] sm:$0xff] }
 0x31d   : > { %3160 = vlog2.f32 %v1902_v63 }
 0x31e   : > { %3162 = vlog2.f32 %v1903_v20 }
 0x31f   : > { %2379 = vadd.xlane.f32.xlu1 %v6495_v33  ;;  %2240 = vadd.xlane.f32.xlu0 %v8068_v52 }
 0x320   : > { %v3153_v17 = vpop.eup %3152 }
 0x321   : > { %v3155_v33 = vpop.eup %3154  ;;  %v1993_v36 = vmul.f32 0.6931472, %v3153_v17 }
 0x322   : > { %v1995_v21 = vmul.f32 0.6931472, %v3155_v33  ;;  %v3157_v8 = vpop.eup %3156  ;;  %v8093_v33 = vld [vmem:[#allocation190_spill] sm:$0xff] }
 0x323   : > { %2382 = vadd.xlane.f32.xlu1 %v2381_v55  ;;  %2243 = vadd.xlane.f32.xlu0 %v8074_v9  ;;  %v2090_v43 = vsub.f32 %v8077_v14, %v1993_v36  ;;  %v8078_v55 = vld [vmem:[#allocation173_spill] sm:$0xff]  ;;  %v3159_v46 = vpop.eup %3158  ;;  %v2005_v53 = vmul.f32 0.6931472, %v3157_v8 }
 0x324   : > { %v2091_v31 = vsub.f32 %v8079_v24, %v1995_v21  ;;  %v2007_v26 = vmul.f32 0.6931472, %v3159_v46  ;;  %v8094_v36 = vld [vmem:[#allocation21_spill] sm:$0xff]  ;;  %v8095_v21 = vld [vmem:[#allocation179_spill] sm:$0xff] }
 0x325   : > { %v2314_v38 = vsel %vm8081_vm14, %v2090_v43, 0.0  ;;  %v2096_v22 = vsub.f32 %v8087_v3, %v2005_v53  ;;  %v8098_v14 = vld [vmem:[#allocation153_spill] sm:$0xff]  ;;  %v8104_v46 = vld [vmem:[#allocation47_spill] sm:$0xff] }
 0x326   : > { %v2315_v13 = vsel %vm8083_vm9, %v2091_v31, 0.0  ;;  %v2097_v52 = vsub.f32 %v8088_v30, %v2007_v26  ;;  %v8102_v31 = vld [vmem:[#allocation189_spill] sm:$0xff] }
 0x327   : > { %2385 = vadd.xlane.f32.xlu1 %v6529_v18  ;;  %2246 = vadd.xlane.f32.xlu0 %v8078_v55  ;;  %v2393_v44 = vadd.f32 %v2315_v13, %v2314_v38  ;;  %v1834_v18 = vpop.xlane.xlu1 %1833  ;;  %v3161_v54 = vpop.eup %3160  ;;  %v8100_v55 = vld [vmem:[#allocation155_spill] sm:$0xff] }
 0x328   : > { %v1908_v1 = vadd.f32 %v8085_v15, %v1834_v18  ;;  %v1909_v25 = vadd.f32 %v8086_v39, %v1834_v18  ;;  %v2321_v23 = vsel %vm5162_vm10, %v2097_v52, 0.0  ;;  %v3163_v28 = vpop.eup %3162  ;;  %v2001_v19 = vmul.f32 0.6931472, %v3161_v54  ;;  %v8105_v18 = vld [vmem:[#allocation19_spill] sm:$0xff]  ;;  %v8112_v54 = vld [vmem:[#allocation46_spill] sm:$0xff] }
 0x329   : > { %v2003_v9 = vmul.f32 0.6931472, %v3163_v28  ;;  %vm8099_vm10 = vnez %v8098_v14  ;;  %vm8101_vm13 = vnez %v8100_v55  ;;  %v8120_v55 = vld [vmem:[#allocation49_spill] sm:$0xff] }
 0x32a   : > { %3164 = vlog2.f32 %v1908_v1  ;;  %v2094_v63 = vsub.f32 %v8096_v27, %v2001_v19  ;;  %v8107_v1 = vld [vmem:[#allocation195_spill] sm:$0xff]  ;;  %v8113_v19 = vld [vmem:[#allocation18_spill] sm:$0xff] }
 0x32b   : > { %2388 = vadd.xlane.f32.xlu1 %v2387_v7  ;;  %2249 = vadd.xlane.f32.xlu0 %v8084_v40  ;;  %3166 = vlog2.f32 %v1909_v25  ;;  %v8090_v7 = vld [vmem:[#allocation156_spill] sm:$0xff]  ;;  %v2095_v20 = vsub.f32 %v8097_v6, %v2003_v9  ;;  %v8108_v25 = vld [vmem:[#allocation27_spill] sm:$0xff]  ;;  %v8118_v27 = vld [vmem:[#allocation14_spill] sm:$0xff] }
 0x32c   : > { %vm8091_vm4 = vnez %v8090_v7  ;;  %v1831_v17 = vpop.xlane.xlu0 %1830  ;;  %v2318_v43 = vsel %vm8099_vm10, %v2094_v63, 0.0  ;;  %vm8119_vm12 = vnez %v8118_v27  ;;  %v8139_v27 = vld [vmem:[#allocation182_spill] sm:$0xff] }
 0x32d   : > { %v2320_v56 = vsel %vm8091_vm4, %v2096_v22, 0.0  ;;  %v1907_v58 = vadd.f32 %v8094_v36, %v1831_v17  ;;  %v2319_v24 = vsel %vm8101_vm13, %v2095_v20, 0.0  ;;  %v8109_v22 = vld [vmem:[#allocation162_spill] sm:$0xff]  ;;  %vm8140_vm1 = vnez %v8139_v27 }
 0x32e   : > { %v2402_v42 = vadd.f32 %v2321_v23, %v2320_v56  ;;  %v2399_v38 = vadd.f32 %v2319_v24, %v2318_v43  ;;  %vm8110_vm6 = vnez %v8109_v22 }
 0x32f   : > { %2391 = vadd.xlane.f32.xlu1 %v2390_v2  ;;  %2252 = vadd.xlane.f32.xlu0 %v8089_v0  ;;  %v1906_v2 = vadd.f32 %v8093_v33, %v1831_v17  ;;  %v8111_v0 = vld [vmem:[#allocation199_spill] sm:$0xff] }
 0x331   : > { %3168 = vlog2.f32 %v1906_v2  ;;  %v8116_v2 = vld [vmem:[#allocation200_spill] sm:$0xff] }
 0x332   : > { %3170 = vlog2.f32 %v1907_v58  ;;  %v8117_v58 = vld [vmem:[#allocation25_spill] sm:$0xff] }
 0x333   : > { %2394 = vadd.xlane.f32.xlu1 %v2393_v44  ;;  %2255 = vadd.xlane.f32.xlu0 %v8095_v21  ;;  %v8103_v44 = vld [vmem:[#allocation184_spill] sm:$0xff] }
 0x334   : > { %v3165_v45 = vpop.eup %3164 }
 0x335   : > { %v3167_v50 = vpop.eup %3166  ;;  %v2013_v13 = vmul.f32 0.6931472, %v3165_v45  ;;  %v1840_v40 = vpop.xlane.xlu1 %1839 }
 0x336   : > { %v2015_v8 = vmul.f32 0.6931472, %v3167_v50  ;;  %v1912_v39 = vadd.f32 %v8107_v1, %v1840_v40  ;;  %v1913_v3 = vadd.f32 %v8108_v25, %v1840_v40  ;;  %v8122_v50 = vld [vmem:[#allocation174_spill] sm:$0xff] }
 0x337   : > { %2397 = vadd.xlane.f32.xlu1 %v2396_v5  ;;  %2258 = vadd.xlane.f32.xlu0 %v8102_v31  ;;  %v2100_v53 = vsub.f32 %v8104_v46, %v2013_v13  ;;  %v8121_v31 = vld [vmem:[#allocation24_spill] sm:$0xff]  ;;  %vm8123_vm3 = vnez %v8122_v50  ;;  %v8125_v46 = vld [vmem:[#allocation175_spill] sm:$0xff] }
 0x338   : > { %v2101_v5 = vsub.f32 %v8105_v18, %v2015_v8  ;;  %3172 = vlog2.f32 %v1912_v39  ;;  %v8124_v8 = vld [vmem:[#allocation193_spill] sm:$0xff]  ;;  %vm8126_vm8 = vnez %v8125_v46  ;;  %v8128_v39 = vld [vmem:[#allocation22_spill] sm:$0xff] }
 0x339   : > { %v2324_v15 = vsel %vm5227_vm11, %v2100_v53, 0.0  ;;  %3174 = vlog2.f32 %v1913_v3 }
 0x33a   : > { %v2325_v30 = vsel %vm8110_vm6, %v2101_v5, 0.0 }
 0x33b   : > { %2400 = vadd.xlane.f32.xlu1 %v2399_v38  ;;  %2261 = vadd.xlane.f32.xlu0 %v8103_v44  ;;  %v3169_v52 = vpop.eup %3168  ;;  %v2408_v7 = vadd.f32 %v2325_v30, %v2324_v15  ;;  %v8127_v15 = vld [vmem:[#allocation48_spill] sm:$0xff] }
 0x33c   : > { %v3171_v56 = vpop.eup %3170  ;;  %v2009_v60 = vmul.f32 0.6931472, %v3169_v52  ;;  %v8131_v52 = vld [vmem:[#allocation20_spill] sm:$0xff] }
 0x33d   : > { %v2011_v23 = vmul.f32 0.6931472, %v3171_v56  ;;  %v1837_v9 = vpop.xlane.xlu0 %1836  ;;  %vm8132_vm5 = vnez %v8131_v52 }
 0x33e   : > { %v2098_v28 = vsub.f32 %v8112_v54, %v2009_v60  ;;  %v1910_v36 = vadd.f32 %v8116_v2, %v1837_v9  ;;  %v1911_v21 = vadd.f32 %v8117_v58, %v1837_v9  ;;  %v8137_v2 = vld [vmem:[#allocation203_spill] sm:$0xff]  ;;  %v8138_v58 = vld [vmem:[#allocation204_spill] sm:$0xff] }
 0x33f   : > { %2403 = vadd.xlane.f32.xlu1 %v2402_v42  ;;  %2264 = vadd.xlane.f32.xlu0 %v8111_v0  ;;  %v2099_v17 = vsub.f32 %v8113_v19, %v2011_v23  ;;  %v8114_v42 = vld [vmem:[#allocation159_spill] sm:$0xff] }
 0x340   : > { %vm8115_vm11 = vnez %v8114_v42  ;;  %3176 = vlog2.f32 %v1910_v36  ;;  %v8135_v42 = vld [vmem:[#allocation181_spill] sm:$0xff] }
 0x341   : > { %v2322_v33 = vsel %vm8115_vm11, %v2098_v28, 0.0  ;;  %v2323_v63 = vsel %vm8119_vm12, %v2099_v17, 0.0  ;;  %3178 = vlog2.f32 %v1911_v21  ;;  %v8134_v17 = vld [vmem:[#allocation28_spill] sm:$0xff]  ;;  %vm8136_vm15 = vnez %v8135_v42  ;;  %v8160_v42 = vld [vmem:[#allocation89_spill] sm:$0xff] }
 0x342   : > { %v2405_v6 = vadd.f32 %v2323_v63, %v2322_v33  ;;  %v3173_v20 = vpop.eup %3172 }
 0x343   : > { %2267 = vadd.xlane.f32.xlu0 %v5910_v11  ;;  %v3175_v14 = vpop.eup %3174  ;;  %v2021_v11 = vmul.f32 0.6931472, %v3173_v20 }
 0x344   : > { %2406 = vadd.xlane.f32.xlu1 %v2405_v6  ;;  %v2023_v43 = vmul.f32 0.6931472, %v3175_v14 }
 0x345   : > { %v2104_v24 = vsub.f32 %v8120_v55, %v2021_v11  ;;  %v1846_v38 = vpop.xlane.xlu1 %1845  ;;  %v8141_v11 = vld [vmem:[#allocation50_spill] sm:$0xff] }
 0x346   : > { %v2105_v45 = vsub.f32 %v8121_v31, %v2023_v43  ;;  %v1917_v44 = vadd.f32 %v5834_v16, %v1846_v38  ;;  %v8142_v55 = vld [vmem:[#allocation26_spill] sm:$0xff] }
 0x347   : > { %2270 = vadd.xlane.f32.xlu0 %v6028_v51  ;;  %v2328_v13 = vsel %vm8123_vm3, %v2104_v24, 0.0  ;;  %v1916_v51 = vadd.f32 %v5825_v48, %v1846_v38  ;;  %v8129_v48 = vld [vmem:[#allocation166_spill] sm:$0xff] }
 0x348   : > { %2409 = vadd.xlane.f32.xlu1 %v2408_v7  ;;  %v2329_v53 = vsel %vm8126_vm8, %v2105_v45, 0.0  ;;  %vm8130_vm0 = vnez %v8129_v48  ;;  %v8143_v45 = vld [vmem:[#allocation186_spill] sm:$0xff] }
 0x349   : > { %v2414_v18 = vadd.f32 %v2329_v53, %v2328_v13  ;;  %3180 = vlog2.f32 %v1916_v51  ;;  %vm8144_vm2 = vnez %v8143_v45 }
 0x34a   : > { %3182 = vlog2.f32 %v1917_v44 }
 0x34b   : > { %2273 = vadd.xlane.f32.xlu0 %v6176_v41  ;;  %v3177_v41 = vpop.eup %3176 }
 0x34c   : > { %v3179_v5 = vpop.eup %3178  ;;  %v2017_v40 = vmul.f32 0.6931472, %v3177_v41 }
 0x34d   : > { %v2019_v26 = vmul.f32 0.6931472, %v3179_v5 }
 0x34e   : > { %v2102_v1 = vsub.f32 %v8127_v15, %v2017_v40  ;;  %v8147_v15 = vld [vmem:[#allocation31_spill] sm:$0xff] }
 0x34f   : > { %2276 = vadd.xlane.f32.xlu0 %v8124_v8  ;;  %v2103_v25 = vsub.f32 %v8128_v39, %v2019_v26  ;;  %v8145_v8 = vld [vmem:[#allocation187_spill] sm:$0xff] }
 0x350   : > { %v2326_v16 = vsel %vm8130_vm0, %v2102_v1, 0.0  ;;  %vm8146_vm7 = vnez %v8145_v8 }
 0x351   : > { %v1843_v3 = vpop.xlane.xlu0 %1842  ;;  %v2327_v0 = vsel %vm8132_vm5, %v2103_v25, 0.0 }
 0x352   : > { %v1914_v22 = vadd.f32 %v5912_v59, %v1843_v3  ;;  %v1915_v30 = vadd.f32 %v5942_v32, %v1843_v3  ;;  %v2411_v7 = vadd.f32 %v2327_v0, %v2326_v16  ;;  %v8133_v32 = vld [vmem:[#allocation51_spill] sm:$0xff]  ;;  %v8149_v16 = vld [vmem:[#allocation196_spill] sm:$0xff] }
 0x353   : > { %2279 = vadd.xlane.f32.xlu0 %v6256_v12  ;;  %v3181_v12 = vpop.eup %3180  ;;  %vm8150_vm14 = vnez %v8149_v16 }
 0x354   : > { %3184 = vlog2.f32 %v1914_v22  ;;  %2412 = vadd.xlane.f32.xlu1 %v2411_v7  ;;  %v3183_v56 = vpop.eup %3182  ;;  %v2029_v60 = vmul.f32 0.6931472, %v3181_v12  ;;  %v8152_v12 = vld [vmem:[#allocation210_spill] sm:$0xff] }
 0x355   : > { %3186 = vlog2.f32 %v1915_v30  ;;  %v2031_v54 = vmul.f32 0.6931472, %v3183_v56 }
 0x356   : > { %v2108_v19 = vsub.f32 %v8133_v32, %v2029_v60  ;;  %v8153_v60 = vld [vmem:[#allocation197_spill] sm:$0xff]  ;;  %v8156_v32 = vld [vmem:[#allocation30_spill] sm:$0xff] }
 0x357   : > { %2282 = vadd.xlane.f32.xlu0 %v5790_v34  ;;  %v2109_v9 = vsub.f32 %v8134_v17, %v2031_v54  ;;  %vm8154_vm9 = vnez %v8153_v60  ;;  %v8155_v54 = vld [vmem:[#allocation53_spill] sm:$0xff] }
 0x358   : > { %2415 = vadd.xlane.f32.xlu1 %v2414_v18  ;;  %v2332_v33 = vsel %vm8136_vm15, %v2108_v19, 0.0 }
 0x35a   : > { %v1849_v23 = vpop.xlane.xlu0 %1848 }
 0x35b   : > { %v1918_v28 = vadd.f32 %v6030_v49, %v1849_v23  ;;  %v1919_v59 = vadd.f32 %v6039_v37, %v1849_v23  ;;  %v2333_v49 = vsel %vm8140_vm1, %v2109_v9, 0.0  ;;  %v8159_v9 = vld [vmem:[#allocation71_spill] sm:$0xff] }
 0x35c   : > { %v2420_v37 = vadd.f32 %v2333_v49, %v2332_v33 }
 0x35d   : > { %3188 = vlog2.f32 %v1918_v28 }
 0x35e   : > { %3190 = vlog2.f32 %v1919_v59  ;;  %v1852_v34 = vpop.xlane.xlu1 %1851  ;;  %v3185_v63 = vpop.eup %3184 }
 0x35f   : > { %v1920_v36 = vadd.f32 %v8137_v2, %v1852_v34  ;;  %v1921_v21 = vadd.f32 %v8138_v58, %v1852_v34  ;;  %v3187_v6 = vpop.eup %3186  ;;  %v2025_v20 = vmul.f32 0.6931472, %v3185_v63 }
 0x360   : > { %v2027_v14 = vmul.f32 0.6931472, %v3187_v6 }
 0x361   : > { %3192 = vlog2.f32 %v1920_v36  ;;  %v2106_v43 = vsub.f32 %v8141_v11, %v2025_v20  ;;  %v8161_v36 = vld [vmem:[#allocation35_spill] sm:$0xff] }
 0x362   : > { %3194 = vlog2.f32 %v1921_v21  ;;  %v2107_v24 = vsub.f32 %v8142_v55, %v2027_v14  ;;  %vm8162_vm10 = vnez %v8161_v36  ;;  %v8163_v14 = vld [vmem:[#allocation56_spill] sm:$0xff]  ;;  %v8164_v55 = vld [vmem:[#allocation37_spill] sm:$0xff] }
 0x363   : > { %v2330_v38 = vsel %vm8144_vm2, %v2106_v43, 0.0  ;;  %v8183_v36 = vld [vmem:[#allocation61_spill] sm:$0xff] }
 0x364   : > { %v2331_v51 = vsel %vm8146_vm7, %v2107_v24, 0.0 }
 0x365   : > { %v1855_v31 = vpop.xlane.xlu0 %1854  ;;  %v2417_v46 = vadd.f32 %v2331_v51, %v2330_v38  ;;  %v8165_v38 = vld [vmem:[#allocation42_spill] sm:$0xff]  ;;  %v8167_v51 = vld [vmem:[#allocation44_spill] sm:$0xff] }
 0x366   : > { %v1922_v50 = vadd.f32 %v6146_v35, %v1855_v31  ;;  %v1923_v13 = vadd.f32 %v6162_v4, %v1855_v31  ;;  %v8148_v4 = vld [vmem:[#allocation54_spill] sm:$0xff]  ;;  %vm8166_vm13 = vnez %v8165_v38  ;;  %vm8168_vm6 = vnez %v8167_v51 }
 0x367   : > { %v3189_v44 = vpop.eup %3188  ;;  %2418 = vadd.xlane.f32.xlu1 %v2417_v46 }
 0x368   : > { %v3191_v53 = vpop.eup %3190  ;;  %v2033_v41 = vmul.f32 0.6931472, %v3189_v44  ;;  %3196 = vlog2.f32 %v1922_v50 }
 0x369   : > { %v2035_v18 = vmul.f32 0.6931472, %v3191_v53  ;;  %3198 = vlog2.f32 %v1923_v13 }
 0x36a   : > { %v1861_v5 = vpop.xlane.xlu0 %1860  ;;  %v2110_v35 = vsub.f32 %v8147_v15, %v2033_v41  ;;  %v8170_v15 = vld [vmem:[#allocation59_spill] sm:$0xff] }
 0x36b   : > { %v1926_v40 = vadd.f32 %v6178_v10, %v1861_v5  ;;  %v1927_v26 = vadd.f32 %v6188_v61, %v1861_v5  ;;  %v3193_v1 = vpop.eup %3192  ;;  %v2111_v39 = vsub.f32 %v8148_v4, %v2035_v18  ;;  %2421 = vadd.xlane.f32.xlu1 %v2420_v37  ;;  %v8151_v61 = vld [vmem:[#allocation208_spill] sm:$0xff]  ;;  %v8169_v18 = vld [vmem:[#allocation38_spill] sm:$0xff] }
 0x36c   : > { %v3195_v25 = vpop.eup %3194  ;;  %v2037_v3 = vmul.f32 0.6931472, %v3193_v1  ;;  %v2334_v22 = vsel %vm8150_vm14, %v2110_v35, 0.0 }
 0x36d   : > { %3200 = vlog2.f32 %v1926_v40  ;;  %v2039_v30 = vmul.f32 0.6931472, %v3195_v25  ;;  %v2335_v23 = vsel %vm8154_vm9, %v2111_v39, 0.0  ;;  %v8171_v39 = vld [vmem:[#allocation191_spill] sm:$0xff]  ;;  %vm2604_vm9 = vcmask 7168  }
 0x36e   : > { %3202 = vlog2.f32 %v1927_v26  ;;  %v2112_v28 = vsub.f32 %v8155_v54, %v2037_v3  ;;  %v2423_v59 = vadd.f32 %v2335_v23, %v2334_v22  ;;  %vm8172_vm11 = vnez %v8171_v39  ;;  %v8173_v22 = vld [vmem:[#allocation58_spill] sm:$0xff] }
 0x36f   : > { %v2113_v19 = vsub.f32 %v8156_v32, %v2039_v30  ;;  %v8179_v32 = vld [vmem:[#allocation41_spill] sm:$0xff] }
 0x370   : > { %v1858_v48 = vpop.xlane.xlu1 %1857  ;;  %v1867_v0 = vpop.xlane.xlu0 %1866  ;;  %2424 = vadd.xlane.f32.xlu1 %v2423_v59 }
 0x371   : > { %v1924_v52 = vadd.f32 %v6111_v62, %v1858_v48  ;;  %v1925_v10 = vadd.f32 %v6124_v29, %v1858_v48  ;;  %v1930_v7 = vadd.f32 %v8151_v61, %v1867_v0  ;;  %v1931_v56 = vadd.f32 %v8152_v12, %v1867_v0  ;;  %v8157_v62 = vld [vmem:[#allocation34_spill] sm:$0xff] }
 0x372   : > { %vm8158_vm4 = vnez %v8157_v62  ;;  %v2337_v58 = vsel %vm8162_vm10, %v2113_v19, 0.0  ;;  %v3197_v21 = vpop.eup %3196  ;;  %v8180_v62 = vld [vmem:[#allocation206_spill] sm:$0xff] }
 0x373   : > { %3204 = vlog2.f32 %v1924_v52  ;;  %v2336_v29 = vsel %vm8158_vm4, %v2112_v28, 0.0  ;;  %v3199_v49 = vpop.eup %3198  ;;  %v2041_v63 = vmul.f32 0.6931472, %v3197_v21  ;;  %v8174_v52 = vld [vmem:[#allocation192_spill] sm:$0xff]  ;;  %vm8181_vm8 = vnez %v8180_v62  ;;  %v8184_v21 = vld [vmem:[#allocation201_spill] sm:$0xff] }
 0x374   : > { %3206 = vlog2.f32 %v1925_v10  ;;  %v1864_v17 = vpop.xlane.xlu1 %1863  ;;  %v6685_v2 = vpop.xlane.xlu0 %2192  ;;  %v2426_v27 = vadd.f32 %v2337_v58, %v2336_v29  ;;  %v2043_v37 = vmul.f32 0.6931472, %v3199_v49  ;;  %vm8175_vm12 = vnez %v8174_v52  ;;  %v8177_v28 = vld [vmem:[#allocation40_spill] sm:$0xff]  ;;  %v8186_v49 = vld [vmem:[#allocation39_spill] sm:$0xff] }
 0x375   : > { %3208 = vlog2.f32 %v1930_v7  ;;  %v1928_v34 = vadd.f32 %v8159_v9, %v1864_v17  ;;  %v1929_v33 = vadd.f32 %v8160_v42, %v1864_v17  ;;  %v2114_v11 = vsub.f32 %v8163_v14, %v2041_v63  ;;  %v8176_v7 = vld [vmem:[#allocation55_spill] sm:$0xff] }
 0x376   : > { %3210 = vlog2.f32 %v1931_v56  ;;  %2427 = vadd.xlane.f32.xlu1 %v2426_v27  ;;  %v2115_v24 = vsub.f32 %v8164_v55, %v2043_v37  ;;  %vm8178_vm3 = vnez %v8177_v28  ;;  %v8182_v9 = vld [vmem:[#allocation43_spill] sm:$0xff]  ;;  %vm8185_vm0 = vnez %v8184_v21  ;;  %v8187_v37 = vld [vmem:[#allocation202_spill] sm:$0xff] }
 0x377   : > { %3212 = vlog2.f32 %v1928_v34  ;;  %v3201_v43 = vpop.eup %3200  ;;  %v2338_v50 = vsel %vm8166_vm13, %v2114_v11, 0.0  ;;  %vm8188_vm5 = vnez %v8187_v37 }
 0x378   : > { %3214 = vlog2.f32 %v1929_v33  ;;  %v6689_v6 = vpop.xlane.xlu1 %2189  ;;  %v6691_v20 = vpop.xlane.xlu0 %2198  ;;  %v2049_v45 = vmul.f32 0.6931472, %v3201_v43  ;;  %v2339_v44 = vsel %vm8168_vm6, %v2115_v24, 0.0  ;;  %v8189_v43 = vld [vmem:[#allocation209_spill] sm:$0xff] }
 0x379   : > { %v3203_v31 = vpop.eup %3202  ;;  %v2429_v41 = vadd.f32 %v2339_v44, %v2338_v50  ;;  %vm8190_vm15 = vnez %v8189_v43  ;;  %3216 = vrcp.f32 %v6685_v2  ;;  %v8196_v43 = vld [vmem:[#allocation98_spill] sm:$0xff] }
 0x37a   : > { %v2051_v13 = vmul.f32 0.6931472, %v3203_v31  ;;  %v2118_v5 = vsub.f32 %v8169_v18, %v2049_v45  ;;  %v8191_v31 = vld [vmem:[#allocation70_spill] sm:$0xff]  ;;  %3218 = vrcp.f32 %v6689_v6 }
 0x37b   : > { %2430 = vadd.xlane.f32.xlu0 %v2429_v41  ;;  %vm8192_vm1 = vnez %v8191_v31 }
 0x37c   : > { %v6697_v8 = vpop.xlane.xlu1 %2195  ;;  %v6701_v53 = vpop.xlane.xlu0 %2204  ;;  %v2119_v35 = vsub.f32 %v8170_v15, %v2051_v13  ;;  %v2342_v25 = vsel %vm8172_vm11, %v2118_v5, 0.0 }
 0x37d   : > { %v3205_v46 = vpop.eup %3204  ;;  %3220 = vrcp.f32 %v6697_v8 }
 0x37e   : > { %v3207_v40 = vpop.eup %3206  ;;  %v2045_v26 = vmul.f32 0.6931472, %v3205_v46  ;;  %v2343_v10 = vsel %vm8175_vm12, %v2119_v35, 0.0  ;;  %3222 = vrcp.f32 %v6691_v20 }
 0x37f   : > { %v3209_v1 = vpop.eup %3208  ;;  %v2047_v4 = vmul.f32 0.6931472, %v3207_v40  ;;  %v2435_v56 = vadd.f32 %v2343_v10, %v2342_v25 }
 0x380   : > { %v3211_v3 = vpop.eup %3210  ;;  %v2057_v48 = vmul.f32 0.6931472, %v3209_v1  ;;  %v2202_v16 = vpop.xlane.xlu1 %2201  ;;  %v2116_v30 = vsub.f32 %v8173_v22, %v2045_v26 }
 0x381   : > { %v3213_v0 = vpop.eup %3212  ;;  %v2059_v61 = vmul.f32 0.6931472, %v3211_v3  ;;  %v2117_v12 = vsub.f32 %v8176_v7, %v2047_v4  ;;  %v6711_v60 = vpop.xlane.xlu0 %2349  ;;  %2436 = vadd.xlane.f32.xlu0 %v2435_v56  ;;  %3224 = vrcp.f32 %v2202_v16  ;;  %v8193_v16 = vld [vmem:[#allocation12_spill] sm:$0xff] }
 0x382   : > { %v3215_v23 = vpop.eup %3214  ;;  %v2053_v54 = vmul.f32 0.6931472, %v3213_v0  ;;  %v2340_v59 = vsel %vm8178_vm3, %v2116_v30, 0.0  ;;  %v2122_v19 = vsub.f32 %v8179_v32, %v2057_v48  ;;  %3226 = vrcp.f32 %v6701_v53 }
 0x383   : > { %v2055_v17 = vmul.f32 0.6931472, %v3215_v23  ;;  %v2341_v29 = vsel %vm8181_vm8, %v2117_v12, 0.0  ;;  %v2123_v34 = vsub.f32 %v8182_v9, %v2059_v61  ;;  %v3217_v28 = vpop.eup %3216  ;;  %v8194_v9 = vld [vmem:[#allocation57_spill] sm:$0xff]  ;;  %vm2542_vm14 = vcmp.lt.s32.totalorder %v6297_v47, %v8193_v16 }
 0x384   : > { %v2208_v42 = vpop.xlane.xlu1 %2207  ;;  %v2432_v33 = vadd.f32 %v2341_v29, %v2340_v59  ;;  %v2120_v58 = vsub.f32 %v8183_v36, %v2053_v54  ;;  %v2346_v27 = vsel %vm8185_vm0, %v2122_v19, 0.0  ;;  %v3219_v59 = vpop.eup %3218  ;;  %vm2540_vm2 = vcmp.lt.s32.totalorder %v8194_v9, %v8193_v16 }
 0x385   : > { %v2121_v63 = vsub.f32 %v8186_v49, %v2055_v17  ;;  %v2347_v14 = vsel %vm8188_vm5, %v2123_v34, 0.0  ;;  %v2211_v11 = vpop.xlane.xlu0 %2210  ;;  %3228 = vrcp.f32 %v2208_v42  ;;  %v2445_v6 = vmul.f32 %v3219_v59, %v6711_v60  ;;  %v8195_v42 = vld [vmem:[#allocation95_spill] sm:$0xff] }
 0x386   : > { %2433 = vadd.xlane.f32.xlu1 %v2432_v33  ;;  %v2344_v55 = vsel %vm8190_vm15, %v2120_v58, 0.0  ;;  %v2441_v24 = vadd.f32 %v2347_v14, %v2346_v27  ;;  %3230 = vrcp.f32 %v2211_v11  ;;  %vm2541_vm7 = vcmp.lt.s32.totalorder %v8195_v42, %v8193_v16 }
 0x387   : > { %v2345_v45 = vsel %vm8192_vm1, %v2121_v63, 0.0  ;;  %v3221_v2 = vpop.eup %3220  ;;  %v2508_v29 = vmul.f32 -1.4285715, %v2445_v6  ;;  %vm2543_vm4 = vcmp.lt.s32.totalorder %v8196_v43, %v8193_v16  ;;  %vm2544_vm10 = vcmp.lt.s32.totalorder %v6338_v57, %v8193_v16  ;;  %v8198_v6 = vld [vmem:[#allocation90_spill] sm:$0xff] }
 0x388   : > { %v2438_v38 = vadd.f32 %v2345_v45, %v2344_v55  ;;  %2442 = vadd.xlane.f32.xlu0 %v2441_v24  ;;  %v2353_v50 = vpop.xlane.xlu1 %2352  ;;  %v3223_v62 = vpop.eup %3222  ;;  %vm2546_vm6 = vcmp.lt.s32.totalorder %v8198_v6, %v8193_v16 }
 0x389   : > { %v2214_v13 = vpop.xlane.xlu0 %2213  ;;  %v2447_v8 = vmul.f32 %v3217_v28, %v2353_v50  ;;  %v2572_v27 = vsel %vm2540_vm2, %v2508_v29, 0.0  ;;  %v8199_v29 = vld [vmem:[#allocation105_spill] sm:$0xff] }
 0x38a   : > { %2439 = vadd.xlane.f32.xlu1 %v2438_v38  ;;  %3232 = vrcp.f32 %v2214_v13  ;;  %v2605_v55 = vsel %vm2604_vm9, %v2572_v27, 0.0  ;;  %vm2547_vm11 = vcmp.lt.s32.totalorder %v8199_v29, %v8193_v16 }
 0x38b   : > { %v2509_v20 = vmul.f32 -1.4285715, %v2447_v8  ;;  %v3225_v58 = vpop.eup %3224 }
 0x38c   : > { %v2356_v51 = vpop.xlane.xlu1 %2355  ;;  %v3227_v21 = vpop.eup %3226 }
 0x38d   : > { %v2217_v44 = vpop.xlane.xlu0 %2216  ;;  %v2449_v17 = vmul.f32 %v3221_v2, %v2356_v51  ;;  %v2573_v49 = vsel %vm2541_vm7, %v2509_v20, 0.0 }
 0x38e   : > { %3234 = vrcp.f32 %v2217_v44  ;;  %v2606_v50 = vsel %vm2604_vm9, %v2573_v49, 0.0 }
 0x38f   : > { %v2510_v53 = vmul.f32 -1.4285715, %v2449_v17  ;;  %v3229_v11 = vpop.eup %3228 }
 0x390   : > { %v2359_v46 = vpop.xlane.xlu1 %2358  ;;  %v3231_v38 = vpop.eup %3230 }
 0x391   : > { %v2220_v41 = vpop.xlane.xlu0 %2219  ;;  %v2451_v34 = vmul.f32 %v3223_v62, %v2359_v46  ;;  %v2574_v63 = vsel %vm2542_vm14, %v2510_v53, 0.0 }
 0x392   : > { %3236 = vrcp.f32 %v2220_v41  ;;  %v2608_v13 = vsel %vm2604_vm9, %v2574_v63, 0.0 }
 0x393   : > { %v2511_v37 = vmul.f32 -1.4285715, %v2451_v34 }
 0x394   : > { %v2362_v18 = vpop.xlane.xlu1 %2361  ;;  %v3233_v51 = vpop.eup %3232 }
 0x395   : > { %v6729_v5 = vpop.xlane.xlu0 %2222  ;;  %v2453_v60 = vmul.f32 %v3225_v58, %v2362_v18  ;;  %v2575_v44 = vsel %vm2543_vm4, %v2511_v37, 0.0  ;;  %v2607_v18 = vadd.f32 %v2606_v50, %v2605_v55  ;;  %v8200_v58 = vld [vmem:[#allocation107_spill] sm:$0xff] }
 0x396   : > { %3238 = vrcp.f32 %v6729_v5  ;;  %v8197_v5 = vld [vmem:[#allocation102_spill] sm:$0xff]  ;;  %v2610_v57 = vsel %vm2604_vm9, %v2575_v44, 0.0  ;;  %vm2548_vm12 = vcmp.lt.s32.totalorder %v8200_v58, %v8193_v16  ;;  %v8207_v58 = vld [vmem:[#allocation132_spill] sm:$0xff] }
 0x397   : > { %v2512_v24 = vmul.f32 -1.4285715, %v2453_v60  ;;  %vm2545_vm13 = vcmp.lt.s32.totalorder %v8197_v5, %v8193_v16  ;;  %v2609_v2 = vadd.f32 %v2608_v13, %v2607_v18  ;;  %vm2555_vm2 = vcmp.lt.s32.totalorder %v8207_v58, %v8193_v16 }
 0x398   : > { %v2365_v40 = vpop.xlane.xlu1 %2364  ;;  %v3235_v59 = vpop.eup %3234 }
 0x399   : > { %v6731_v26 = vpop.xlane.xlu0 %2225  ;;  %v2455_v14 = vmul.f32 %v3227_v21, %v2365_v40  ;;  %v2611_v53 = vadd.f32 %v2610_v57, %v2609_v2 }
 0x39a   : > { %3240 = vrcp.f32 %v6731_v26 }
 0x39b   : > { %v2513_v46 = vmul.f32 -1.4285715, %v2455_v14 }
 0x39c   : > { %v2368_v15 = vpop.xlane.xlu1 %2367  ;;  %v3237_v26 = vpop.eup %3236 }
 0x39d   : > { %v6733_v35 = vpop.xlane.xlu0 %2228  ;;  %v2457_v47 = vmul.f32 %v3229_v11, %v2368_v15  ;;  %v2576_v15 = vsel %vm2544_vm10, %v2512_v24, 0.0  ;;  %v2577_v8 = vsel %vm2545_vm13, %v2513_v46, 0.0 }
 0x39e   : > { %3242 = vrcp.f32 %v6733_v35  ;;  %v2612_v35 = vsel %vm2604_vm9, %v2576_v15, 0.0 }
 0x39f   : > { %v2514_v28 = vmul.f32 -1.4285715, %v2457_v47  ;;  %v2613_v60 = vadd.f32 %v2612_v35, %v2611_v53 }
 0x3a0   : > { %v6735_v1 = vpop.xlane.xlu1 %2370  ;;  %v3239_v42 = vpop.eup %3238 }
 0x3a1   : > { %v6737_v4 = vpop.xlane.xlu0 %2231  ;;  %v2459_v41 = vmul.f32 %v3231_v38, %v6735_v1  ;;  %v2578_v34 = vsel %vm2546_vm6, %v2514_v28, 0.0 }
 0x3a2   : > { %3244 = vrcp.f32 %v6737_v4  ;;  %v2614_v4 = vsel %vm2604_vm9, %v2577_v8, 0.0 }
 0x3a3   : > { %v2515_v1 = vmul.f32 -1.4285715, %v2459_v41  ;;  %v2615_v11 = vadd.f32 %v2614_v4, %v2613_v60  ;;  %v8203_v41 = vld [vmem:[#allocation119_spill] sm:$0xff] }
 0x3a4   : > { %v6739_v39 = vpop.xlane.xlu1 %2373  ;;  %v3241_v14 = vpop.eup %3240  ;;  %vm2551_vm0 = vcmp.lt.s32.totalorder %v8203_v41, %v8193_v16  ;;  %v8211_v41 = vld [vmem:[#allocation150_spill] sm:$0xff] }
 0x3a5   : > { %v6741_v25 = vpop.xlane.xlu0 %2234  ;;  %v2461_v40 = vmul.f32 %v3233_v51, %v6739_v39  ;;  %v2579_v21 = vsel %vm2547_vm11, %v2515_v1, 0.0  ;;  %vm2559_vm10 = vcmp.lt.s32.totalorder %v8211_v41, %v8193_v16 }
 0x3a6   : > { %3246 = vrcp.f32 %v6741_v25  ;;  %v8202_v25 = vld [vmem:[#allocation113_spill] sm:$0xff]  ;;  %v2618_v24 = vsel %vm2604_vm9, %v2579_v21, 0.0 }
 0x3a7   : > { %v2516_v20 = vmul.f32 -1.4285715, %v2461_v40  ;;  %vm2550_vm8 = vcmp.lt.s32.totalorder %v8202_v25, %v8193_v16 }
 0x3a8   : > { %v6743_v3 = vpop.xlane.xlu1 %2376  ;;  %v3243_v47 = vpop.eup %3242 }
 0x3a9   : > { %v6747_v22 = vpop.xlane.xlu0 %2237  ;;  %v2463_v17 = vmul.f32 %v3235_v59, %v6743_v3  ;;  %v8201_v3 = vld [vmem:[#allocation110_spill] sm:$0xff]  ;;  %v2580_v49 = vsel %vm2548_vm12, %v2516_v20, 0.0 }
 0x3aa   : > { %vm2549_vm3 = vcmp.lt.s32.totalorder %v8201_v3, %v8193_v16  ;;  %3248 = vrcp.f32 %v6747_v22  ;;  %v2620_v50 = vsel %vm2604_vm9, %v2580_v49, 0.0 }
 0x3ab   : > { %v2517_v27 = vmul.f32 -1.4285715, %v2463_v17 }
 0x3ac   : > { %v6745_v48 = vpop.xlane.xlu1 %2379  ;;  %v3245_v44 = vpop.eup %3244 }
 0x3ad   : > { %v6751_v52 = vpop.xlane.xlu0 %2240  ;;  %v2465_v9 = vmul.f32 %v3237_v26, %v6745_v48  ;;  %v2616_v48 = vsel %vm2604_vm9, %v2578_v34, 0.0 }
 0x3ae   : > { %3250 = vrcp.f32 %v6751_v52  ;;  %v2617_v38 = vadd.f32 %v2616_v48, %v2615_v11 }
 0x3af   : > { %v2518_v63 = vmul.f32 -1.4285715, %v2465_v9  ;;  %v8206_v9 = vld [vmem:[#allocation129_spill] sm:$0xff] }
 0x3b0   : > { %v6749_v30 = vpop.xlane.xlu1 %2382  ;;  %v2619_v46 = vadd.f32 %v2618_v24, %v2617_v38  ;;  %v3247_v40 = vpop.eup %3246  ;;  %vm2554_vm1 = vcmp.lt.s32.totalorder %v8206_v9, %v8193_v16  ;;  %v8214_v9 = vld [vmem:[#allocation168_spill] sm:$0xff] }
 0x3b1   : > { %v6755_v0 = vpop.xlane.xlu0 %2243  ;;  %v2467_v37 = vmul.f32 %v3239_v42, %v6749_v30  ;;  %v2581_v30 = vsel %vm2549_vm3, %v2517_v27, 0.0  ;;  %v2582_v13 = vsel %vm2550_vm8, %v2518_v63, 0.0  ;;  %vm2562_vm11 = vcmp.lt.s32.totalorder %v8214_v9, %v8193_v16 }
 0x3b2   : > { %3252 = vrcp.f32 %v6755_v0  ;;  %v2621_v15 = vadd.f32 %v2620_v50, %v2619_v46  ;;  %v2624_v28 = vsel %vm2604_vm9, %v2582_v13, 0.0  ;;  %v8204_v0 = vld [vmem:[#allocation124_spill] sm:$0xff] }
 0x3b3   : > { %v2519_v51 = vmul.f32 -1.4285715, %v2467_v37  ;;  %vm2552_vm5 = vcmp.lt.s32.totalorder %v8204_v0, %v8193_v16  ;;  %v8212_v0 = vld [vmem:[#allocation154_spill] sm:$0xff] }
 0x3b4   : > { %v6753_v10 = vpop.xlane.xlu1 %2385  ;;  %v3249_v26 = vpop.eup %3248  ;;  %vm2560_vm13 = vcmp.lt.s32.totalorder %v8212_v0, %v8193_v16  ;;  %v8220_v0 = vld [vmem:[#allocation188_spill] sm:$0xff] }
 0x3b5   : > { %v6759_v7 = vpop.xlane.xlu0 %2246  ;;  %v2469_v22 = vmul.f32 %v3241_v14, %v6753_v10  ;;  %v2622_v10 = vsel %vm2604_vm9, %v2581_v30, 0.0  ;;  %v2583_v2 = vsel %vm2551_vm0, %v2519_v51, 0.0  ;;  %v8209_v14 = vld [vmem:[#allocation138_spill] sm:$0xff] }
 0x3b6   : > { %3254 = vrcp.f32 %v6759_v7  ;;  %v2623_v7 = vadd.f32 %v2622_v10, %v2621_v15  ;;  %v2626_v20 = vsel %vm2604_vm9, %v2583_v2, 0.0  ;;  %vm2557_vm14 = vcmp.lt.s32.totalorder %v8209_v14, %v8193_v16  ;;  %v8210_v51 = vld [vmem:[#allocation142_spill] sm:$0xff] }
 0x3b7   : > { %v2520_v18 = vmul.f32 -1.4285715, %v2469_v22  ;;  %vm2558_vm4 = vcmp.lt.s32.totalorder %v8210_v51, %v8193_v16  ;;  %v8217_v14 = vld [vmem:[#allocation194_spill] sm:$0xff]  ;;  %v8219_v51 = vld [vmem:[#allocation36_spill] sm:$0xff] }
 0x3b8   : > { %v6757_v61 = vpop.xlane.xlu1 %2388  ;;  %v3251_v35 = vpop.eup %3250  ;;  %v2625_v29 = vadd.f32 %v2624_v28, %v2623_v7  ;;  %vm2565_vm8 = vcmp.lt.s32.totalorder %v8217_v14, %v8193_v16 }
 0x3b9   : > { %v6763_v56 = vpop.xlane.xlu0 %2249  ;;  %v2471_v52 = vmul.f32 %v3243_v47, %v6757_v61  ;;  %v2584_v8 = vsel %vm2552_vm5, %v2520_v18, 0.0  ;;  %vm2567_vm5 = vcmp.lt.s32.totalorder %v8219_v51, %v8193_v16 }
 0x3ba   : > { %3256 = vrcp.f32 %v6763_v56  ;;  %v2628_v34 = vsel %vm2604_vm9, %v2584_v8, 0.0  ;;  %v2627_v3 = vadd.f32 %v2626_v20, %v2625_v29 }
 0x3bb   : > { %v2521_v57 = vmul.f32 -1.4285715, %v2471_v52 }
 0x3bc   : > { %v6761_v12 = vpop.xlane.xlu1 %2391  ;;  %v3253_v4 = vpop.eup %3252  ;;  %v2629_v48 = vadd.f32 %v2628_v34, %v2627_v3 }
 0x3bd   : > { %v6770_v54 = vpop.xlane.xlu0 %2252  ;;  %v2473_v5 = vmul.f32 %v3245_v44, %v6761_v12  ;;  %v8205_v12 = vld [vmem:[#allocation128_spill] sm:$0xff] }
 0x3be   : > { %vm2553_vm15 = vcmp.lt.s32.totalorder %v8205_v12, %v8193_v16  ;;  %3258 = vrcp.f32 %v6770_v54  ;;  %v8213_v12 = vld [vmem:[#allocation161_spill] sm:$0xff] }
 0x3bf   : > { %v2522_v1 = vmul.f32 -1.4285715, %v2473_v5  ;;  %v2585_v56 = vsel %vm2553_vm15, %v2521_v57, 0.0  ;;  %vm2561_vm6 = vcmp.lt.s32.totalorder %v8213_v12, %v8193_v16  ;;  %vm2569_vm15 = vcmp.lt.s32.totalorder %v8220_v0, %v8193_v16 }
 0x3c0   : > { %v6768_v23 = vpop.xlane.xlu1 %2394  ;;  %v2630_v21 = vsel %vm2604_vm9, %v2585_v56, 0.0  ;;  %v3255_v27 = vpop.eup %3254 }
 0x3c1   : > { %v6776_v19 = vpop.xlane.xlu0 %2255  ;;  %v2475_v6 = vmul.f32 %v3247_v40, %v6768_v23  ;;  %v2586_v42 = vsel %vm2554_vm1, %v2522_v1, 0.0  ;;  %v2631_v25 = vadd.f32 %v2630_v21, %v2629_v48 }
 0x3c2   : > { %3260 = vrcp.f32 %v6776_v19  ;;  %v8208_v19 = vld [vmem:[#allocation133_spill] sm:$0xff]  ;;  %v2632_v37 = vsel %vm2604_vm9, %v2586_v42, 0.0 }
 0x3c3   : > { %v2523_v23 = vmul.f32 -1.4285715, %v2475_v6  ;;  %vm2556_vm7 = vcmp.lt.s32.totalorder %v8208_v19, %v8193_v16  ;;  %v2633_v30 = vadd.f32 %v2632_v37, %v2631_v25 }
 0x3c4   : > { %v6774_v32 = vpop.xlane.xlu1 %2397  ;;  %v3257_v11 = vpop.eup %3256 }
 0x3c5   : > { %v6783_v36 = vpop.xlane.xlu0 %2258  ;;  %v2477_v17 = vmul.f32 %v3249_v26, %v6774_v32  ;;  %v2587_v49 = vsel %vm2555_vm2, %v2523_v23, 0.0 }
 0x3c6   : > { %3262 = vrcp.f32 %v6783_v36 }
 0x3c7   : > { %v2524_v60 = vmul.f32 -1.4285715, %v2477_v17 }
 0x3c8   : > { %v6781_v33 = vpop.xlane.xlu1 %2400 }
 0x3c9   : > { %v6795_v45 = vpop.xlane.xlu0 %2261  ;;  %v2479_v53 = vmul.f32 %v3251_v35, %v6781_v33  ;;  %v2588_v24 = vsel %vm2556_vm7, %v2524_v60, 0.0 }
 0x3ca   : > { %3264 = vrcp.f32 %v6795_v45  ;;  %v3259_v45 = vpop.eup %3258 }
 0x3cb   : > { %v2525_v63 = vmul.f32 -1.4285715, %v2479_v53 }
 0x3cc   : > { %v6793_v31 = vpop.xlane.xlu1 %2403 }
 0x3cd   : > { %v6814_v39 = vpop.xlane.xlu0 %2264  ;;  %v2481_v33 = vmul.f32 %v3253_v4, %v6793_v31  ;;  %v2634_v31 = vsel %vm2604_vm9, %v2587_v49, 0.0  ;;  %v2589_v13 = vsel %vm2557_vm14, %v2525_v63, 0.0 }
 0x3ce   : > { %3266 = vrcp.f32 %v6814_v39  ;;  %v3261_v39 = vpop.eup %3260  ;;  %v2635_v46 = vadd.f32 %v2634_v31, %v2633_v30  ;;  %v8218_v31 = vld [vmem:[#allocation33_spill] sm:$0xff] }
 0x3cf   : > { %v2526_v22 = vmul.f32 -1.4285715, %v2481_v33  ;;  %v8216_v33 = vld [vmem:[#allocation176_spill] sm:$0xff]  ;;  %vm2566_vm0 = vcmp.lt.s32.totalorder %v8218_v31, %v8193_v16 }
 0x3d0   : > { %v3263_v15 = vpop.eup %3262  ;;  %vm2564_vm3 = vcmp.lt.s32.totalorder %v8216_v33, %v8193_v16 }
 0x3d1   : > { %v6812_v62 = vpop.xlane.xlu1 %2406  ;;  %v6834_v55 = vpop.xlane.xlu0 %2267  ;;  %v2590_v10 = vsel %vm2558_vm4, %v2526_v22, 0.0 }
 0x3d2   : > { %v2483_v36 = vmul.f32 %v3255_v27, %v6812_v62  ;;  %v2636_v62 = vsel %vm2604_vm9, %v2588_v24, 0.0  ;;  %3268 = vrcp.f32 %v6834_v55  ;;  %v2640_v7 = vsel %vm2604_vm9, %v2590_v10, 0.0 }
 0x3d3   : > { %v2637_v28 = vadd.f32 %v2636_v62, %v2635_v46 }
 0x3d4   : > { %v2527_v52 = vmul.f32 -1.4285715, %v2483_v36  ;;  %v3265_v6 = vpop.eup %3264 }
 0x3d5   : > { %v6832_v43 = vpop.xlane.xlu1 %2409  ;;  %v6852_v59 = vpop.xlane.xlu0 %2270 }
 0x3d6   : > { %v2485_v47 = vmul.f32 %v3257_v11, %v6832_v43  ;;  %v2638_v43 = vsel %vm2604_vm9, %v2589_v13, 0.0  ;;  %v2591_v2 = vsel %vm2559_vm10, %v2527_v52, 0.0  ;;  %3270 = vrcp.f32 %v6852_v59 }
 0x3d7   : > { %v2639_v26 = vadd.f32 %v2638_v43, %v2637_v28  ;;  %v2642_v20 = vsel %vm2604_vm9, %v2591_v2, 0.0 }
 0x3d8   : > { %v2528_v18 = vmul.f32 -1.4285715, %v2485_v47  ;;  %v3267_v29 = vpop.eup %3266 }
 0x3d9   : > { %v6868_v32 = vpop.xlane.xlu0 %2273  ;;  %v2641_v56 = vadd.f32 %v2640_v7, %v2639_v26 }
 0x3da   : > { %v2592_v8 = vsel %vm2560_vm13, %v2528_v18, 0.0 }
 0x3db   : > { %v2644_v58 = vsel %vm2604_vm9, %v2592_v8, 0.0  ;;  %v2643_v59 = vadd.f32 %v2642_v20, %v2641_v56 }
 0x3dc   : > { %v3269_v4 = vpop.eup %3268 }
 0x3dd   : > { %v2277_v50 = vpop.xlane.xlu0 %2276  ;;  %v2645_v48 = vadd.f32 %v2644_v58, %v2643_v59 }
 0x3de   : > { %3272 = vrcp.f32 %v2277_v50 }
 0x3df   : > { %3274 = vrcp.f32 %v6868_v32 }
 0x3e0   : > { %v3271_v22 = vpop.eup %3270 }
 0x3e1   : > { %v2413_v61 = vpop.xlane.xlu1 %2412 }
 0x3e2   : > { %v2487_v44 = vmul.f32 %v3259_v45, %v2413_v61  ;;  %v2280_v61 = vpop.xlane.xlu0 %2279 }
 0x3e4   : > { %v2529_v57 = vmul.f32 -1.4285715, %v2487_v44 }
 0x3e5   : > { %v2416_v54 = vpop.xlane.xlu1 %2415 }
 0x3e6   : > { %v2489_v5 = vmul.f32 %v3261_v39, %v2416_v54  ;;  %v2593_v23 = vsel %vm2561_vm6, %v2529_v57, 0.0  ;;  %v8215_v54 = vld [vmem:[#allocation183_spill] sm:$0xff]  ;;  %v2283_v60 = vpop.xlane.xlu0 %2282 }
 0x3e7   : > { %vm2563_vm12 = vcmp.lt.s32.totalorder %v8215_v54, %v8193_v16  ;;  %v2646_v19 = vsel %vm2604_vm9, %v2593_v23, 0.0  ;;  %3276 = vrcp.f32 %v2283_v60 }
 0x3e8   : > { %v2530_v1 = vmul.f32 -1.4285715, %v2489_v5  ;;  %v2647_v36 = vadd.f32 %v2646_v19, %v2645_v48  ;;  %3278 = vrcp.f32 %v2280_v61  ;;  %v3273_v44 = vpop.eup %3272 }
 0x3e9   : > { %v3275_v18 = vpop.eup %3274 }
 0x3ea   : > { %v2594_v3 = vsel %vm2562_vm11, %v2530_v1, 0.0 }
 0x3eb   : > { %v2648_v37 = vsel %vm2604_vm9, %v2594_v3, 0.0 }
 0x3ec   : > { %v2649_v47 = vadd.f32 %v2648_v37, %v2647_v36 }
 0x3f4   : > { %v2419_v38 = vpop.xlane.xlu1 %2418 }
 0x3f5   : > { %v2491_v55 = vmul.f32 %v3263_v15, %v2419_v38 }
 0x3f7   : > { %v2531_v53 = vmul.f32 -1.4285715, %v2491_v55 }
 0x3f8   : > { %v2422_v40 = vpop.xlane.xlu1 %2421 }
 0x3f9   : > { %v2493_v17 = vmul.f32 %v3265_v6, %v2422_v40  ;;  %v2595_v49 = vsel %vm2563_vm12, %v2531_v53, 0.0  ;;  %v3277_v40 = vpop.eup %3276  ;;  %v8221_v6 = vld [vmem:[#allocation205_spill] sm:$0xff]  ;;  %v8223_v53 = vld [vmem:[#allocation207_spill] sm:$0xff] }
 0x3fa   : > { %v2650_v24 = vsel %vm2604_vm9, %v2595_v49, 0.0  ;;  %v3279_v61 = vpop.eup %3278  ;;  %vm2568_vm1 = vcmp.lt.s32.totalorder %v8221_v6, %v8193_v16  ;;  %vm2570_vm7 = vcmp.lt.s32.totalorder %v8223_v53, %v8193_v16 }
 0x3fb   : > { %v2532_v42 = vmul.f32 -1.4285715, %v2493_v17  ;;  %v2651_v30 = vadd.f32 %v2650_v24, %v2649_v47 }
 0x3fd   : > { %v2425_v35 = vpop.xlane.xlu1 %2424  ;;  %v2596_v11 = vsel %vm2564_vm3, %v2532_v42, 0.0 }
 0x3fe   : > { %v2495_v34 = vmul.f32 %v3267_v29, %v2425_v35  ;;  %v2652_v50 = vsel %vm2604_vm9, %v2596_v11, 0.0  ;;  %v8222_v35 = vld [vmem:[#allocation198_spill] sm:$0xff] }
 0x3ff   : > { %v2653_v39 = vadd.f32 %v2652_v50, %v2651_v30  ;;  %vm2571_vm2 = vcmp.lt.s32.totalorder %v8222_v35, %v8193_v16 }
 0x400   : > { %v2533_v63 = vmul.f32 -1.4285715, %v2495_v34 }
 0x402   : > { %v2597_v32 = vsel %vm2565_vm8, %v2533_v63, 0.0 }
 0x403   : > { %v2428_v21 = vpop.xlane.xlu1 %2427  ;;  %v2654_v62 = vsel %vm2604_vm9, %v2597_v32, 0.0 }
 0x404   : > { %v2497_v27 = vmul.f32 %v3269_v4, %v2428_v21  ;;  %v2655_v5 = vadd.f32 %v2654_v62, %v2653_v39 }
 0x406   : > { %v2534_v25 = vmul.f32 -1.4285715, %v2497_v27 }
 0x408   : > { %v2431_v38 = vpop.xlane.xlu0 %2430  ;;  %v2598_v13 = vsel %vm2566_vm0, %v2534_v25, 0.0 }
 0x409   : > { %v2499_v45 = vmul.f32 %v3271_v22, %v2431_v38  ;;  %v2656_v41 = vsel %vm2604_vm9, %v2598_v13, 0.0 }
 0x40a   : > { %v2657_v57 = vadd.f32 %v2656_v41, %v2655_v5 }
 0x40b   : > { %v2535_v52 = vmul.f32 -1.4285715, %v2499_v45 }
 0x40d   : > { %v2599_v43 = vsel %vm2567_vm5, %v2535_v52, 0.0 }
 0x40e   : > { %v2437_v46 = vpop.xlane.xlu0 %2436  ;;  %v2658_v15 = vsel %vm2604_vm9, %v2599_v43, 0.0 }
 0x40f   : > { %v2503_v10 = vmul.f32 %v3273_v44, %v2437_v46  ;;  %v2659_v7 = vadd.f32 %v2658_v15, %v2657_v57 }
 0x411   : > { %v2537_v2 = vmul.f32 -1.4285715, %v2503_v10 }
 0x413   : > { %v2434_v28 = vpop.xlane.xlu1 %2433  ;;  %v2601_v8 = vsel %vm2569_vm15, %v2537_v2, 0.0 }
 0x414   : > { %v2501_v55 = vmul.f32 %v3275_v18, %v2434_v28  ;;  %v2662_v23 = vsel %vm2604_vm9, %v2601_v8, 0.0 }
 0x415   : > { %v2443_v26 = vpop.xlane.xlu0 %2442 }
 0x416   : > { %v2536_v12 = vmul.f32 -1.4285715, %v2501_v55  ;;  %v2507_v1 = vmul.f32 %v3277_v40, %v2443_v26 }
 0x417   : > { %v2440_v17 = vpop.xlane.xlu1 %2439 }
 0x418   : > { %v2600_v29 = vsel %vm2568_vm1, %v2536_v12, 0.0  ;;  %v2505_v20 = vmul.f32 %v3279_v61, %v2440_v17  ;;  %v2539_v9 = vmul.f32 -1.4285715, %v2507_v1 }
 0x419   : > { %v2660_v56 = vsel %vm2604_vm9, %v2600_v29, 0.0 }
 0x41a   : > { %v2661_v34 = vadd.f32 %v2660_v56, %v2659_v7  ;;  %v2538_v58 = vmul.f32 -1.4285715, %v2505_v20  ;;  %v2603_v54 = vsel %vm2571_vm2, %v2539_v9, 0.0 }
 0x41b   : > { %v2666_v42 = vsel %vm2604_vm9, %v2603_v54, 0.0 }
 0x41c   : > { %v2663_v4 = vadd.f32 %v2662_v23, %v2661_v34  ;;  %v2602_v59 = vsel %vm2570_vm7, %v2538_v58, 0.0 }
 0x41d   : > { %v2664_v3 = vsel %vm2604_vm9, %v2602_v59, 0.0 }
 0x41e   : > { %v2665_v60 = vadd.f32 %v2664_v3, %v2663_v4 }
 0x420   : > { %v2667_v21 = vadd.f32 %v2666_v42, %v2665_v60 }
 0x422   : > { %2668 = vadd.xlane.f32.xlu1 %v2667_v21 }
 0x4af   : > { %v2669_v19 = vpop.xlane.xlu1 %2668 }
 0x4b0   : > { %v2670_v33 = vrot.slane %v2669_v19, 4 }
 0x4b2   : > { %v2671_v27 = vadd.f32 %v2670_v33, %v2669_v19 }
 0x4b4   : > { %v2672_v48 = vrot.slane %v2671_v27, 2 }
 0x4b6   : > { %v2673_v49 = vadd.f32 %v2672_v48, %v2671_v27 }
 0x4b8   : > { %v2674_v63 = vrot.slane %v2673_v49, 1 }
 0x4ba   : > { %v2675_v16 = vadd.f32 %v2674_v63, %v2673_v49 }
 0x4bc   : > { %2874 = vpush %v2675_v16 }
 0x4ed   : > { %s2875_s26 = spop %2874 }
 0x4ee   : > { %v2677_v37 = vstv %s2875_s26 }
 0x4ef   : > { %2678 = vst [vmem:[%s3494_s0] sm:$0xff] %v2677_v37 }
 0x4f0 PF: > { %s2864_s30 = sshll.u32 %s3364_s25, 7  ;;  %s2694_s13 = sshll.u32 %s3494_s0, 4  ;;  %s2695_s13 = int_to_ptr.vmem [resolvable:$true] %s2694_s13 }
 0x4f1   : > { %s6935_s12 = scalar_lea.hbm %s6984_s5, %s2864_s30  ;;  %s8224_s14 = sand.u32 1, %s3356_s24  }
 0x4f2   : > { %s2680_s15 = scalar_lea.sflag [#allocation5], %s8224_s14  ;;  %s3292_s16 = scalar_lea.vmem %s2695_s13, 128 }
 0x4f3   : > { %p3293_p5 = scmp.ne.s32.totalorder %s2695_s13, %s3292_s16  ;;  %s3379_s17 = smov [#allocation4]  }
 0x4f4   : > { %s3296_s18 = sshll.u32 %s3379_s17, 4  ;;  %s3297_s18 = int_to_ptr.vmem [resolvable:$false] %s3296_s18 }
 0x4f5   : > { %p3294_p6 = pnand %p3293_p5, %p3453_p9  ;;  %s3298_s19 = scalar_lea.vmem %s3297_s18, 256 }
 0x4f6   : > { %p3299_p8 = scmp.lt.s32.totalorder %s2695_s13, %s3297_s18  ;;  %p3300_p10 = scmp.lt.s32.totalorder %s3298_s19, %s3292_s16 }
 0x4f7   : > { %p3295_p7 = pneg %p3294_p6 }
 0x4f8   : > { %p3301_p11 = por %p3300_p10, %p3299_p8 }
 0x4fa   : > { %p3302_p12 = pnand %p3301_p11, %p3295_p7 }
 0x4fc   : > { %3305 = shalt.err (!%p3302_p12)
}
 0x4fd   : > { %s3306_s0 = scalar_lea.hbm %s6935_s12, 128  ;;  %s3310_s21 = scalar_lea.hbm %s6984_s5, 256 }
 0x4fe   : > { %p3307_p0 = scmp.ne.s32.totalorder %s6935_s12, %s3306_s0  ;;  %p3311_p3 = scmp.lt.u32.totalorder %s6935_s12, %s6984_s5 }
 0x4ff   : > { %p3312_p4 = scmp.lt.u32.totalorder %s3310_s21, %s3306_s0  ;;  %p3314_p6 = scmp.lt.u32.totalorder %s3306_s0, %s6935_s12 }
 0x500   : > { %p3308_p1 = pnand %p3307_p0, %p3453_p9 }
 0x501   : > { %p3313_p5 = por %p3312_p4, %p3311_p3 }
 0x502   : > { %p3309_p2 = pneg %p3308_p1 }
 0x503   : > { %p3315_p7 = por %p3314_p6, %p3313_p5 }
 0x505   : > { %p3316_p8 = pnand %p3315_p7, %p3309_p2 }
 0x507   : > { %3319 = shalt.err (!%p3316_p8)
}
 0x508   : > { %2876 = dma.vmem_to_hbm [thread:$0]  (%p3453_p9), %s2695_s13, 128, %s6935_s12, %s2680_s15  }
 0x509 PF: > { %p2882_p10 = scmp.ge.s32.totalorder %s3372_s27, 2  ;;  %s2706_s29 = sand.u32 1, %s3352_s23  }
 0x50a   : > { %s2707_s6 = scalar_lea.sflag [#allocation5], %s2706_s29 }
 0x50b   : > { %p2879_p11 = pnand %p2882_p10, %p3460_p13 }
 0x50d   : > { %3347 = dma.done.wait (!%p2879_p11), %s2707_s6, 128  }
 0x50e   : > { %3349 = vsyncadd (!%p2879_p11), %s2707_s6, 4294967168  ;;  %s24_s27 = sadd.s32 1, %s3372_s27   ;;  %s8225_s8 = sld [smem:[#allocation8_spill]] }
 0x50f   : > { %p21_p12 = scmp.ge.s32.totalorder %s24_s27, 4   ;;  %s8226_s0 = sld [smem:[#allocation11_spill]] }
 0x510   : > { %s8227_s25 = sld [smem:[#allocation9_spill]]  ;;  %s8228_s26 = sld [smem:[#allocation10_spill]] }
 0x511   : > { %s8229_s23 = smov %s3356_s24  ;;  %23 = sbr.rel (!%p21_p12) target bundleno = 19 (0x13), region = 88 }
 0x514   : > { %s8230_s24 = smov %s8225_s8 }
 0x518   :  { %2712 = vsyncpa [#allocation5], 1 }
 0x519   :  { %2714 = vsyncpa [#allocation5 + $0x1], 1 }

</bundles_post_ra>
